<compile_context>
chip_gen: v7x
topology: tpu7x:2x2x1
jax: 0.10.0
libtpu: 0.0.40
codegen_flags: <defaults>
</compile_context>

<pallas_src>
from functools import partial

import jax
import jax.numpy as jnp
from jax.experimental import pallas as pl
from jax.experimental.pallas import tpu as pltpu

# ----------------------------- configuration ------------------------------
# Mirrors a small DSAPlainConvUNet:
#   conv_cfg = dict(in_channels=1, out_channels=1, kernel_size=9,
#                   sigma=[1.2, 0.8], mean=[0.3, -0.2])
#   input_channels=2, n_stages=3, features_per_stage=[8,16,32],
#   conv_op=Conv2d, kernel_sizes=3, strides=[1,2,2], n_conv_per_stage=2,
#   num_classes=3, n_conv_per_stage_decoder=2, conv_bias=False,
#   norm_op=InstanceNorm2d(eps=1e-5, affine=True), nonlin=LeakyReLU(0.01),
#   deep_supervision=False
N_STAGES = 3
FEATS = [8, 16, 32]
STRIDES = [1, 2, 2]
N_CONV_PER_STAGE = 2
N_CONV_PER_STAGE_DEC = 2
NUM_CLASSES = 3
INPUT_CHANNELS = 2          # encoder input = cat([img, img_reg])
GAUSS_K = 9
IN_EPS = 1e-5
LRELU_SLOPE = 0.01

# ------------------------------ Pallas kernels ----------------------------


def _double_conv_in_lrelu_kernel(w1_ref, g1_ref, b1_ref, w2_ref, g2_ref, b2_ref,
                                 x_ref, o_ref, pad_ref, *, eps, slope, H, W):
    """Fused stage: [conv3x3 + InstanceNorm2d + LeakyReLU] x 2 (one sample).

    w1_ref: [C1, K1] bf16 (conv1 weight, K1 = Cin*9; stride handled by the
            wrapper-side im2col that produced x_ref: [K1, HW] bf16).
    w2_ref: [C2, 9*C1] bf16, column order (di, dj, ci).
    g*/b*:  [C, 1] f32 InstanceNorm affine params.
    o_ref:  [C2, HW] f32, channel-major (pixels in the lane dim).
    pad_ref: [C1, HW + 2W + 2] f32 scratch (lane-padded flat copy of conv1 out).
    """
    C1 = w1_ref.shape[0]
    HW = H * W

    # ---- conv1 (im2col GEMM) + InstanceNorm + LeakyReLU ----
    y = jnp.dot(w1_ref[...], x_ref[...], preferred_element_type=jnp.float32)
    mu = jnp.mean(y, axis=1, keepdims=True)
    var = jnp.mean((y - mu) ** 2, axis=1, keepdims=True)      # biased, like torch IN
    y = (y - mu) * jax.lax.rsqrt(var + eps)
    y = y * g1_ref[...] + b1_ref[...]
    y = jnp.where(y >= 0, y, slope * y)

    # ---- conv2 (3x3, stride 1, pad 1) entirely in VMEM ----
    # Zero-padded flat (row-major) copy of y: the 9 kernel taps become static
    # lane-offset slices; the W-boundary wrap is removed with lane masks, the
    # H-boundary is covered by the flat zero padding.
    pad_ref[...] = jnp.zeros_like(pad_ref)
    pad_ref[:, W + 1:W + 1 + HW] = y
    wpos = jax.lax.broadcasted_iota(jnp.int32, (C1, HW), 1) % W
    cols = []
    for di in range(3):
        for dj in range(3):
            start = (di - 1) * W + (dj - 1) + (W + 1)
            sl = pad_ref[:, start:start + HW]                 # [C1, HW]
            if dj == 0:
                sl = jnp.where(wpos >= 1, sl, 0.0)
            elif dj == 2:
                sl = jnp.where(wpos <= W - 2, sl, 0.0)
            cols.append(sl)
    patches2 = jnp.concatenate(cols, axis=0).astype(jnp.bfloat16)   # [9*C1, HW]
    y2 = jnp.dot(w2_ref[...], patches2, preferred_element_type=jnp.float32)
    mu2 = jnp.mean(y2, axis=1, keepdims=True)
    var2 = jnp.mean((y2 - mu2) ** 2, axis=1, keepdims=True)
    y2 = (y2 - mu2) * jax.lax.rsqrt(var2 + eps)
    y2 = y2 * g2_ref[...] + b2_ref[...]
    o_ref[...] = jnp.where(y2 >= 0, y2, slope * y2)


def _matmul_kernel(w_ref, x_ref, o_ref):
    """Plain channel-major GEMM (used by the 2x2 transposed conv, no bias)."""
    o_ref[...] = jnp.dot(w_ref[...], x_ref[...], preferred_element_type=jnp.float32)


def _matmul_bias_kernel(w_ref, x_ref, b_ref, o_ref):
    """Channel-major GEMM + bias (final 1x1 seg conv)."""
    o_ref[...] = (jnp.dot(w_ref[...], x_ref[...], preferred_element_type=jnp.float32)
                  + b_ref[...])


def _sep_gauss_kernel(kx_ref, ky_ref, x_ref, o_ref, *, K, H, W):
    """Separable 9x9 Gaussian as two 1-D VPU stencil passes (one sample).

    kx/ky: [K] f32 in SMEM, x_ref: [H+K-1, W+K-1] zero-padded input in VMEM.
    """
    acc_h = jnp.zeros((H, W + K - 1), jnp.float32)
    for i in range(K):                               # vertical (H) pass
        acc_h = acc_h + kx_ref[i] * x_ref[i:i + H, :]
    acc = jnp.zeros((H, W), jnp.float32)
    for j in range(K):                               # horizontal (W) pass
        acc = acc + ky_ref[j] * acc_h[:, j:j + W]
    o_ref[...] = acc


# ------------------------------ conv wrappers ------------------------------

def _im2col_T(x, kh, kw, stride, padding):
    """x: [N, C, H, W] -> patches [N, C*kh*kw, Ho*Wo] (K ordering = PyTorch weight)."""
    N, C, H, W = x.shape
    xp = jnp.pad(x, ((0, 0), (0, 0), (padding, padding), (padding, padding)))
    Ho = (H + 2 * padding - kh) // stride + 1
    Wo = (W + 2 * padding - kw) // stride + 1
    cols = []
    for di in range(kh):
        for dj in range(kw):
            cols.append(xp[:, :,
                           di:di + stride * (Ho - 1) + 1:stride,
                           dj:dj + stride * (Wo - 1) + 1:stride])
    p = jnp.stack(cols, axis=2)                       # [N, C, kh*kw, Ho, Wo]
    return p.reshape(N, C * kh * kw, Ho * Wo), Ho, Wo


def double_conv_block(x, blk1, blk2, stride):
    """Two ConvDropoutNormReLU blocks (conv_bias=False) fused into one kernel."""
    N = x.shape[0]
    w1, w2 = blk1["w"], blk2["w"]
    C1, Cin = w1.shape[0], w1.shape[1]
    C2 = w2.shape[0]
    K1 = Cin * 9
    patches, Ho, Wo = _im2col_T(x.astype(jnp.bfloat16), 3, 3, stride, 1)
    HW = Ho * Wo
    w1m = w1.reshape(C1, K1).astype(jnp.bfloat16)
    w2m = jnp.transpose(w2, (0, 2, 3, 1)).reshape(C2, 9 * C1).astype(jnp.bfloat16)
    g1 = blk1["gamma"].reshape(C1, 1).astype(jnp.float32)
    b1 = blk1["beta"].reshape(C1, 1).astype(jnp.float32)
    g2 = blk2["gamma"].reshape(C2, 1).astype(jnp.float32)
    b2 = blk2["beta"].reshape(C2, 1).astype(jnp.float32)
    out = pl.pallas_call(
        partial(_double_conv_in_lrelu_kernel, eps=IN_EPS, slope=LRELU_SLOPE,
                H=Ho, W=Wo),
        out_shape=jax.ShapeDtypeStruct((N, C2, HW), jnp.float32),
        grid=(N,),
        in_specs=[
            pl.BlockSpec((C1, K1), lambda n: (0, 0)),
            pl.BlockSpec((C1, 1), lambda n: (0, 0)),
            pl.BlockSpec((C1, 1), lambda n: (0, 0)),
            pl.BlockSpec((C2, 9 * C1), lambda n: (0, 0)),
            pl.BlockSpec((C2, 1), lambda n: (0, 0)),
            pl.BlockSpec((C2, 1), lambda n: (0, 0)),
            pl.BlockSpec((None, K1, HW), lambda n: (n, 0, 0)),
        ],
        out_specs=pl.BlockSpec((None, C2, HW), lambda n: (n, 0, 0)),
        scratch_shapes=[pltpu.VMEM((C1, HW + 2 * (Wo + 1)), jnp.float32)],
        compiler_params=pltpu.CompilerParams(dimension_semantics=("parallel",)),
    )(w1m, g1, b1, w2m, g2, b2, patches)
    return out.reshape(N, C2, Ho, Wo)                 # pure reshape, no transpose


def conv_transpose2x2(x, w):
    """ConvTranspose2d, kernel=stride=2, no bias. w: [Cin, Cout, 2, 2]."""
    N, Cin, H, W = x.shape
    Cout = w.shape[1]
    w2 = w.transpose(1, 2, 3, 0).reshape(Cout * 4, Cin).astype(jnp.bfloat16)
    xm = x.astype(jnp.bfloat16).reshape(N, Cin, H * W)
    y = pl.pallas_call(
        _matmul_kernel,
        out_shape=jax.ShapeDtypeStruct((N, Cout * 4, H * W), jnp.float32),
        grid=(N,),
        in_specs=[
            pl.BlockSpec((Cout * 4, Cin), lambda n: (0, 0)),
            pl.BlockSpec((None, Cin, H * W), lambda n: (n, 0, 0)),
        ],
        out_specs=pl.BlockSpec((None, Cout * 4, H * W), lambda n: (n, 0, 0)),
        compiler_params=pltpu.CompilerParams(dimension_semantics=("parallel",)),
    )(w2, xm)
    # TODO(synk): fuse this pixel-shuffle + skip-concat into the decoder stage kernel.
    y = y.reshape(N, Cout, 2, 2, H, W).transpose(0, 1, 4, 2, 5, 3)
    return y.reshape(N, Cout, 2 * H, 2 * W)


def conv1x1_bias(x, w, bias):
    """Final seg layer: 1x1 conv with bias, no norm/nonlin."""
    N, Cin, H, W = x.shape
    Cout = w.shape[0]
    wmat = w.reshape(Cout, Cin).astype(jnp.bfloat16)
    xm = x.astype(jnp.bfloat16).reshape(N, Cin, H * W)
    brow = bias.reshape(Cout, 1).astype(jnp.float32)
    out = pl.pallas_call(
        _matmul_bias_kernel,
        out_shape=jax.ShapeDtypeStruct((N, Cout, H * W), jnp.float32),
        grid=(N,),
        in_specs=[
            pl.BlockSpec((Cout, Cin), lambda n: (0, 0)),
            pl.BlockSpec((None, Cin, H * W), lambda n: (n, 0, 0)),
            pl.BlockSpec((Cout, 1), lambda n: (0, 0)),
        ],
        out_specs=pl.BlockSpec((None, Cout, H * W), lambda n: (n, 0, 0)),
        compiler_params=pltpu.CompilerParams(dimension_semantics=("parallel",)),
    )(wmat, xm, brow)
    return out.reshape(N, Cout, H, W)


def gaussian_sep_conv(x1, sigmas, means, ksize):
    """LearnableGaussianConv (out_channels=1). x1: [N, 1, H, W] -> [N, 1, H, W].

    The axis-aligned 2-D Gaussian normalized over (kh, kw) factors exactly into
    outer(kx/sum(kx), ky/sum(ky)), so the conv is done as two 1-D passes.
    """
    N, _, H, W = x1.shape
    pad = ksize // 2
    coords = jnp.arange(ksize, dtype=jnp.float32)
    mx = (ksize - 1) / 2.0 + means[0, 0]
    my = (ksize - 1) / 2.0 + means[0, 1]
    sx, sy = sigmas[0, 0], sigmas[0, 1]
    kx = jnp.exp(-((coords - mx) ** 2) / (2.0 * sx ** 2))
    ky = jnp.exp(-((coords - my) ** 2) / (2.0 * sy ** 2))
    kx = kx / jnp.sum(kx)
    ky = ky / jnp.sum(ky)
    xp = jnp.pad(x1[:, 0], ((0, 0), (pad, pad), (pad, pad)))     # [N, Hp, Wp]
    Hp, Wp = H + 2 * pad, W + 2 * pad
    out = pl.pallas_call(
        partial(_sep_gauss_kernel, K=ksize, H=H, W=W),
        out_shape=jax.ShapeDtypeStruct((N, H, W), jnp.float32),
        grid=(N,),
        in_specs=[
            pl.BlockSpec(memory_space=pltpu.MemorySpace.SMEM),   # kx
            pl.BlockSpec(memory_space=pltpu.MemorySpace.SMEM),   # ky
            pl.BlockSpec((None, Hp, Wp), lambda n: (n, 0, 0)),
        ],
        out_specs=pl.BlockSpec((None, H, W), lambda n: (n, 0, 0)),
        compiler_params=pltpu.CompilerParams(dimension_semantics=("parallel",)),
    )(kx, ky, xp)
    return out[:, None, :, :]


# --------------------------- parameters (synthetic) ------------------------

def init_params(key):
    def w(shape, scale=0.1):
        nonlocal key
        key, sub = jax.random.split(key)
        return scale * jax.random.normal(sub, shape, jnp.float32)

    params = {}
    # LearnableGaussianConv parameters (out_channels=1): [sigma]*1, [mean]*1
    params["sigmas"] = jnp.array([[1.2, 0.8]], jnp.float32)
    params["means"] = jnp.array([[0.3, -0.2]], jnp.float32)

    # encoder: 3 stages, 2 x ConvDropoutNormReLU each (conv_bias=False)
    enc = []
    cin = INPUT_CHANNELS
    for s in range(N_STAGES):
        f = FEATS[s]
        stage = []
        for c in range(N_CONV_PER_STAGE):
            stage.append({
                "w": w((f, cin if c == 0 else f, 3, 3)),
                "gamma": 1.0 + w((f,), 0.05),
                "beta": w((f,), 0.05),
            })
        cin = f
        enc.append(stage)
    params["encoder"] = enc

    # decoder: transpconv (kernel=stride=2, no bias) + 2 conv blocks per stage
    dec = []
    for s in range(N_STAGES - 1):
        f_below = FEATS[-(s + 1)]
        f_skip = FEATS[-(s + 2)]
        convs = []
        for c in range(N_CONV_PER_STAGE_DEC):
            convs.append({
                "w": w((f_skip, 2 * f_skip if c == 0 else f_skip, 3, 3)),
                "gamma": 1.0 + w((f_skip,), 0.05),
                "beta": w((f_skip,), 0.05),
            })
        dec.append({"tw": w((f_below, f_skip, 2, 2)), "convs": convs})
    params["decoder"] = dec

    # final seg layer (1x1 conv, bias=True); deep_supervision=False -> only last
    params["seg_w"] = w((NUM_CLASSES, FEATS[0], 1, 1))
    params["seg_b"] = w((NUM_CLASSES,), 0.05)
    return params


# --------------------------------- forward ---------------------------------

def forward(params, x):
    assert N_CONV_PER_STAGE == 2 and N_CONV_PER_STAGE_DEC == 2
    # DSAPlainConvUNet.forward
    img = x[:, 0:1, :, :]                                     # x[:,0].unsqueeze(1)
    img_reg = gaussian_sep_conv(x[:, 1:2, :, :], params["sigmas"],
                                params["means"], GAUSS_K)
    h = jnp.concatenate([img, img_reg], axis=1)               # [N, 2, H, W]

    # PlainConvEncoder (return_skips=True): [conv -> InstanceNorm -> LeakyReLU] x 2
    skips = []
    for s, stage in enumerate(params["encoder"]):
        h = double_conv_block(h, stage[0], stage[1], stride=STRIDES[s])
        skips.append(h)

    # UNetDecoder (deep_supervision=False)
    lres = skips[-1]
    for s, dstage in enumerate(params["decoder"]):
        up = conv_transpose2x2(lres, dstage["tw"])
        h = jnp.concatenate([up, skips[-(s + 2)]], axis=1)
        lres = double_conv_block(h, dstage["convs"][0], dstage["convs"][1], stride=1)
    seg = conv1x1_bias(lres, params["seg_w"], params["seg_b"])
    return seg


# ----------------------------------- main -----------------------------------

if __name__ == "__main__":
    key = jax.random.PRNGKey(0)
    pkey, xkey = jax.random.split(key)
    params = init_params(pkey)
    # input: NCHW, channel 0 = image, channel 1 = image to be Gaussian-smoothed
    x = jax.random.normal(xkey, (2, 2, 16, 16), jnp.float32)
    fwd = jax.jit(forward)
    out = jax.block_until_ready(fwd(params, x))
    assert out.shape == (2, NUM_CLASSES, 16, 16), out.shape
    assert bool(jnp.all(jnp.isfinite(out)))
    print("KERNEL_OK")
</pallas_src>

<mosaic_0001>
module attributes {stable_mosaic.version = 11 : i64} {
  func.func @_sep_gauss_kernel(%arg0: i32, %arg1: memref<9xf32, #tpu.memory_space<smem>>, %arg2: memref<9xf32, #tpu.memory_space<smem>>, %arg3: memref<1x24x24xf32, #tpu.memory_space<vmem>>, %arg4: memref<1x16x16xf32, #tpu.memory_space<vmem>>) attributes {dimension_semantics = [#tpu.dimension_semantics<parallel>], iteration_bounds = array<i64: 2>, scalar_prefetch = 0 : i64, scratch_operands = 0 : i64, tpu.core_type = #tpu.core_type<tc>, window_params = [{transform_indices = @transform_0, window_bounds = array<i64: 9>}, {transform_indices = @transform_1, window_bounds = array<i64: 9>}, {transform_indices = @transform_2, window_bounds = array<i64: 1, 24, 24>}, {transform_indices = @transform_3, window_bounds = array<i64: 1, 16, 16>}]} {
    %cst = arith.constant 0.000000e+00 : f32
    %0 = vector.broadcast %cst : f32 to vector<16x24xf32>
    %c0 = arith.constant 0 : index
    %1 = memref.load %arg1[%c0] : memref<9xf32, #tpu.memory_space<smem>>
    %c0_0 = arith.constant 0 : index
    %c0_1 = arith.constant 0 : index
    %c0_2 = arith.constant 0 : index
    %2 = vector.load %arg3[%c0_0, %c0_1, %c0_2] : memref<1x24x24xf32, #tpu.memory_space<vmem>>, vector<1x16x24xf32>
    %3 = vector.shape_cast %2 : vector<1x16x24xf32> to vector<16x24xf32>
    %4 = vector.broadcast %1 : f32 to vector<16x24xf32>
    %5 = arith.mulf %4, %3 : vector<16x24xf32>
    %6 = arith.addf %0, %5 : vector<16x24xf32>
    %c1 = arith.constant 1 : index
    %7 = memref.load %arg1[%c1] : memref<9xf32, #tpu.memory_space<smem>>
    %c0_3 = arith.constant 0 : index
    %c1_4 = arith.constant 1 : index
    %c0_5 = arith.constant 0 : index
    %8 = vector.load %arg3[%c0_3, %c1_4, %c0_5] : memref<1x24x24xf32, #tpu.memory_space<vmem>>, vector<1x16x24xf32>
    %9 = vector.shape_cast %8 : vector<1x16x24xf32> to vector<16x24xf32>
    %10 = vector.broadcast %7 : f32 to vector<16x24xf32>
    %11 = arith.mulf %10, %9 : vector<16x24xf32>
    %12 = arith.addf %6, %11 : vector<16x24xf32>
    %c2 = arith.constant 2 : index
    %13 = memref.load %arg1[%c2] : memref<9xf32, #tpu.memory_space<smem>>
    %c0_6 = arith.constant 0 : index
    %c2_7 = arith.constant 2 : index
    %c0_8 = arith.constant 0 : index
    %14 = vector.load %arg3[%c0_6, %c2_7, %c0_8] : memref<1x24x24xf32, #tpu.memory_space<vmem>>, vector<1x16x24xf32>
    %15 = vector.shape_cast %14 : vector<1x16x24xf32> to vector<16x24xf32>
    %16 = vector.broadcast %13 : f32 to vector<16x24xf32>
    %17 = arith.mulf %16, %15 : vector<16x24xf32>
    %18 = arith.addf %12, %17 : vector<16x24xf32>
    %c3 = arith.constant 3 : index
    %19 = memref.load %arg1[%c3] : memref<9xf32, #tpu.memory_space<smem>>
    %c0_9 = arith.constant 0 : index
    %c3_10 = arith.constant 3 : index
    %c0_11 = arith.constant 0 : index
    %20 = vector.load %arg3[%c0_9, %c3_10, %c0_11] : memref<1x24x24xf32, #tpu.memory_space<vmem>>, vector<1x16x24xf32>
    %21 = vector.shape_cast %20 : vector<1x16x24xf32> to vector<16x24xf32>
    %22 = vector.broadcast %19 : f32 to vector<16x24xf32>
    %23 = arith.mulf %22, %21 : vector<16x24xf32>
    %24 = arith.addf %18, %23 : vector<16x24xf32>
    %c4 = arith.constant 4 : index
    %25 = memref.load %arg1[%c4] : memref<9xf32, #tpu.memory_space<smem>>
    %c0_12 = arith.constant 0 : index
    %c4_13 = arith.constant 4 : index
    %c0_14 = arith.constant 0 : index
    %26 = vector.load %arg3[%c0_12, %c4_13, %c0_14] : memref<1x24x24xf32, #tpu.memory_space<vmem>>, vector<1x16x24xf32>
    %27 = vector.shape_cast %26 : vector<1x16x24xf32> to vector<16x24xf32>
    %28 = vector.broadcast %25 : f32 to vector<16x24xf32>
    %29 = arith.mulf %28, %27 : vector<16x24xf32>
    %30 = arith.addf %24, %29 : vector<16x24xf32>
    %c5 = arith.constant 5 : index
    %31 = memref.load %arg1[%c5] : memref<9xf32, #tpu.memory_space<smem>>
    %c0_15 = arith.constant 0 : index
    %c5_16 = arith.constant 5 : index
    %c0_17 = arith.constant 0 : index
    %32 = vector.load %arg3[%c0_15, %c5_16, %c0_17] : memref<1x24x24xf32, #tpu.memory_space<vmem>>, vector<1x16x24xf32>
    %33 = vector.shape_cast %32 : vector<1x16x24xf32> to vector<16x24xf32>
    %34 = vector.broadcast %31 : f32 to vector<16x24xf32>
    %35 = arith.mulf %34, %33 : vector<16x24xf32>
    %36 = arith.addf %30, %35 : vector<16x24xf32>
    %c6 = arith.constant 6 : index
    %37 = memref.load %arg1[%c6] : memref<9xf32, #tpu.memory_space<smem>>
    %c0_18 = arith.constant 0 : index
    %c6_19 = arith.constant 6 : index
    %c0_20 = arith.constant 0 : index
    %38 = vector.load %arg3[%c0_18, %c6_19, %c0_20] : memref<1x24x24xf32, #tpu.memory_space<vmem>>, vector<1x16x24xf32>
    %39 = vector.shape_cast %38 : vector<1x16x24xf32> to vector<16x24xf32>
    %40 = vector.broadcast %37 : f32 to vector<16x24xf32>
    %41 = arith.mulf %40, %39 : vector<16x24xf32>
    %42 = arith.addf %36, %41 : vector<16x24xf32>
    %c7 = arith.constant 7 : index
    %43 = memref.load %arg1[%c7] : memref<9xf32, #tpu.memory_space<smem>>
    %c0_21 = arith.constant 0 : index
    %c7_22 = arith.constant 7 : index
    %c0_23 = arith.constant 0 : index
    %44 = vector.load %arg3[%c0_21, %c7_22, %c0_23] : memref<1x24x24xf32, #tpu.memory_space<vmem>>, vector<1x16x24xf32>
    %45 = vector.shape_cast %44 : vector<1x16x24xf32> to vector<16x24xf32>
    %46 = vector.broadcast %43 : f32 to vector<16x24xf32>
    %47 = arith.mulf %46, %45 : vector<16x24xf32>
    %48 = arith.addf %42, %47 : vector<16x24xf32>
    %c8 = arith.constant 8 : index
    %49 = memref.load %arg1[%c8] : memref<9xf32, #tpu.memory_space<smem>>
    %c0_24 = arith.constant 0 : index
    %c8_25 = arith.constant 8 : index
    %c0_26 = arith.constant 0 : index
    %50 = vector.load %arg3[%c0_24, %c8_25, %c0_26] : memref<1x24x24xf32, #tpu.memory_space<vmem>>, vector<1x16x24xf32>
    %51 = vector.shape_cast %50 : vector<1x16x24xf32> to vector<16x24xf32>
    %52 = vector.broadcast %49 : f32 to vector<16x24xf32>
    %53 = arith.mulf %52, %51 : vector<16x24xf32>
    %54 = arith.addf %48, %53 : vector<16x24xf32>
    %cst_27 = arith.constant 0.000000e+00 : f32
    %55 = vector.broadcast %cst_27 : f32 to vector<16x16xf32>
    %c0_28 = arith.constant 0 : index
    %56 = memref.load %arg2[%c0_28] : memref<9xf32, #tpu.memory_space<smem>>
    %57 = vector.extract_strided_slice %54 {offsets = [0, 0], sizes = [16, 16], strides = [1, 1]} : vector<16x24xf32> to vector<16x16xf32>
    %58 = vector.broadcast %56 : f32 to vector<16x16xf32>
    %59 = arith.mulf %58, %57 : vector<16x16xf32>
    %60 = arith.addf %55, %59 : vector<16x16xf32>
    %c1_29 = arith.constant 1 : index
    %61 = memref.load %arg2[%c1_29] : memref<9xf32, #tpu.memory_space<smem>>
    %62 = vector.extract_strided_slice %54 {offsets = [0, 1], sizes = [16, 16], strides = [1, 1]} : vector<16x24xf32> to vector<16x16xf32>
    %63 = vector.broadcast %61 : f32 to vector<16x16xf32>
    %64 = arith.mulf %63, %62 : vector<16x16xf32>
    %65 = arith.addf %60, %64 : vector<16x16xf32>
    %c2_30 = arith.constant 2 : index
    %66 = memref.load %arg2[%c2_30] : memref<9xf32, #tpu.memory_space<smem>>
    %67 = vector.extract_strided_slice %54 {offsets = [0, 2], sizes = [16, 16], strides = [1, 1]} : vector<16x24xf32> to vector<16x16xf32>
    %68 = vector.broadcast %66 : f32 to vector<16x16xf32>
    %69 = arith.mulf %68, %67 : vector<16x16xf32>
    %70 = arith.addf %65, %69 : vector<16x16xf32>
    %c3_31 = arith.constant 3 : index
    %71 = memref.load %arg2[%c3_31] : memref<9xf32, #tpu.memory_space<smem>>
    %72 = vector.extract_strided_slice %54 {offsets = [0, 3], sizes = [16, 16], strides = [1, 1]} : vector<16x24xf32> to vector<16x16xf32>
    %73 = vector.broadcast %71 : f32 to vector<16x16xf32>
    %74 = arith.mulf %73, %72 : vector<16x16xf32>
    %75 = arith.addf %70, %74 : vector<16x16xf32>
    %c4_32 = arith.constant 4 : index
    %76 = memref.load %arg2[%c4_32] : memref<9xf32, #tpu.memory_space<smem>>
    %77 = vector.extract_strided_slice %54 {offsets = [0, 4], sizes = [16, 16], strides = [1, 1]} : vector<16x24xf32> to vector<16x16xf32>
    %78 = vector.broadcast %76 : f32 to vector<16x16xf32>
    %79 = arith.mulf %78, %77 : vector<16x16xf32>
    %80 = arith.addf %75, %79 : vector<16x16xf32>
    %c5_33 = arith.constant 5 : index
    %81 = memref.load %arg2[%c5_33] : memref<9xf32, #tpu.memory_space<smem>>
    %82 = vector.extract_strided_slice %54 {offsets = [0, 5], sizes = [16, 16], strides = [1, 1]} : vector<16x24xf32> to vector<16x16xf32>
    %83 = vector.broadcast %81 : f32 to vector<16x16xf32>
    %84 = arith.mulf %83, %82 : vector<16x16xf32>
    %85 = arith.addf %80, %84 : vector<16x16xf32>
    %c6_34 = arith.constant 6 : index
    %86 = memref.load %arg2[%c6_34] : memref<9xf32, #tpu.memory_space<smem>>
    %87 = vector.extract_strided_slice %54 {offsets = [0, 6], sizes = [16, 16], strides = [1, 1]} : vector<16x24xf32> to vector<16x16xf32>
    %88 = vector.broadcast %86 : f32 to vector<16x16xf32>
    %89 = arith.mulf %88, %87 : vector<16x16xf32>
    %90 = arith.addf %85, %89 : vector<16x16xf32>
    %c7_35 = arith.constant 7 : index
    %91 = memref.load %arg2[%c7_35] : memref<9xf32, #tpu.memory_space<smem>>
    %92 = vector.extract_strided_slice %54 {offsets = [0, 7], sizes = [16, 16], strides = [1, 1]} : vector<16x24xf32> to vector<16x16xf32>
    %93 = vector.broadcast %91 : f32 to vector<16x16xf32>
    %94 = arith.mulf %93, %92 : vector<16x16xf32>
    %95 = arith.addf %90, %94 : vector<16x16xf32>
    %c8_36 = arith.constant 8 : index
    %96 = memref.load %arg2[%c8_36] : memref<9xf32, #tpu.memory_space<smem>>
    %97 = vector.extract_strided_slice %54 {offsets = [0, 8], sizes = [16, 16], strides = [1, 1]} : vector<16x24xf32> to vector<16x16xf32>
    %98 = vector.broadcast %96 : f32 to vector<16x16xf32>
    %99 = arith.mulf %98, %97 : vector<16x16xf32>
    %100 = arith.addf %95, %99 : vector<16x16xf32>
    %c0_37 = arith.constant 0 : index
    %c0_38 = arith.constant 0 : index
    %c0_39 = arith.constant 0 : index
    %101 = vector.load %arg4[%c0_37, %c0_38, %c0_39] : memref<1x16x16xf32, #tpu.memory_space<vmem>>, vector<1x16x16xf32>
    %102 = vector.shape_cast %101 : vector<1x16x16xf32> to vector<16x16xf32>
    %103 = vector.shape_cast %100 : vector<16x16xf32> to vector<1x16x16xf32>
    tpu.vector_store %arg4[%c0_37, %c0_38, %c0_39], %103 {strides = array<i32>} : memref<1x16x16xf32, #tpu.memory_space<vmem>>, vector<1x16x16xf32>,
    return
  }
  func.func @transform_0(%arg0: i32) -> i32 {
    %c0_i32 = arith.constant 0 : i32
    %c0_i32_0 = arith.constant 0 : i32
    return %c0_i32 : i32
  }
  func.func @transform_1(%arg0: i32) -> i32 {
    %c0_i32 = arith.constant 0 : i32
    %c0_i32_0 = arith.constant 0 : i32
    return %c0_i32 : i32
  }
  func.func @transform_2(%arg0: i32) -> (i32, i32, i32) {
    %c0_i32 = arith.constant 0 : i32
    %c0_i32_0 = arith.constant 0 : i32
    %c0_i32_1 = arith.constant 0 : i32
    return %arg0, %c0_i32, %c0_i32_0 : i32, i32, i32
  }
  func.func @transform_3(%arg0: i32) -> (i32, i32, i32) {
    %c0_i32 = arith.constant 0 : i32
    %c0_i32_0 = arith.constant 0 : i32
    %c0_i32_1 = arith.constant 0 : i32
    return %arg0, %c0_i32, %c0_i32_0 : i32, i32, i32
  }
}

module attributes {stable_mosaic.version = 11 : i64} {
  func.func @_double_conv_in_lrelu_kernel(%arg0: i32, %arg1: memref<8x18xbf16, #tpu.memory_space<vmem>>, %arg2: memref<8x1xf32, #tpu.memory_space<vmem>>, %arg3: memref<8x1xf32, #tpu.memory_space<vmem>>, %arg4: memref<8x72xbf16, #tpu.memory_space<vmem>>, %arg5: memref<8x1xf32, #tpu.memory_space<vmem>>, %arg6: memref<8x1xf32, #tpu.memory_space<vmem>>, %arg7: memref<1x18x256xbf16, #tpu.memory_space<vmem>>, %arg8: memref<1x8x256xf32, #tpu.memory_space<vmem>>, %arg9: memref<8x290xf32, #tpu.memory_space<vmem>>) attributes {dimension_semantics = [#tpu.dimension_semantics<parallel>], iteration_bounds = array<i64: 2>, scalar_prefetch = 0 : i64, scratch_operands = 1 : i64, tpu.core_type = #tpu.core_type<tc>, window_params = [{pipeline_mode = #tpu.pipeline_mode<synchronous>, transform_indices = @transform_0, window_bounds = array<i64: 8, 18>}, {pipeline_mode = #tpu.pipeline_mode<synchronous>, transform_indices = @transform_1, window_bounds = array<i64: 8, 1>}, {pipeline_mode = #tpu.pipeline_mode<synchronous>, transform_indices = @transform_2, window_bounds = array<i64: 8, 1>}, {pipeline_mode = #tpu.pipeline_mode<synchronous>, transform_indices = @transform_3, window_bounds = array<i64: 8, 72>}, {pipeline_mode = #tpu.pipeline_mode<synchronous>, transform_indices = @transform_4, window_bounds = array<i64: 8, 1>}, {pipeline_mode = #tpu.pipeline_mode<synchronous>, transform_indices = @transform_5, window_bounds = array<i64: 8, 1>}, {transform_indices = @transform_6, window_bounds = array<i64: 1, 18, 256>}, {transform_indices = @transform_7, window_bounds = array<i64: 1, 8, 256>}]} {
    %c0 = arith.constant 0 : index
    %c0_0 = arith.constant 0 : index
    %0 = vector.load %arg1[%c0, %c0_0] : memref<8x18xbf16, #tpu.memory_space<vmem>>, vector<8x18xbf16>
    %c0_1 = arith.constant 0 : index
    %c0_2 = arith.constant 0 : index
    %c0_3 = arith.constant 0 : index
    %1 = vector.load %arg7[%c0_1, %c0_2, %c0_3] : memref<1x18x256xbf16, #tpu.memory_space<vmem>>, vector<1x18x256xbf16>
    %2 = vector.shape_cast %1 : vector<1x18x256xbf16> to vector<18x256xbf16>
    %cst = arith.constant dense<0.000000e+00> : vector<8x256xf32>
    %3 = tpu.matmul %0, %2, %cst {dimension_numbers = #tpu.dot_dimension_numbers<[1], [0], [0], [1], [0, 0, 1, 1], [], []>} : vector<8x18xbf16>, vector<18x256xbf16>, vector<8x256xf32> -> vector<8x256xf32>
    %cst_4 = arith.constant dense<0.000000e+00> : vector<8xf32>
    %4 = vector.multi_reduction <add>, %3, %cst_4 [1] : vector<8x256xf32> to vector<8xf32>
    %5 = vector.shape_cast %4 : vector<8xf32> to vector<8x1xf32>
    %cst_5 = arith.constant 2.560000e+02 : f32
    %6 = vector.broadcast %cst_5 : f32 to vector<8x1xf32>
    %7 = arith.divf %5, %6 : vector<8x1xf32>
    %8 = vector.broadcast %7 : vector<8x1xf32> to vector<8x256xf32>
    %9 = arith.subf %3, %8 : vector<8x256xf32>
    %10 = arith.mulf %9, %9 : vector<8x256xf32>
    %cst_6 = arith.constant dense<0.000000e+00> : vector<8xf32>
    %11 = vector.multi_reduction <add>, %10, %cst_6 [1] : vector<8x256xf32> to vector<8xf32>
    %12 = vector.shape_cast %11 : vector<8xf32> to vector<8x1xf32>
    %cst_7 = arith.constant 2.560000e+02 : f32
    %13 = vector.broadcast %cst_7 : f32 to vector<8x1xf32>
    %14 = arith.divf %12, %13 : vector<8x1xf32>
    %15 = vector.broadcast %7 : vector<8x1xf32> to vector<8x256xf32>
    %16 = arith.subf %3, %15 : vector<8x256xf32>
    %cst_8 = arith.constant 9.99999974E-6 : f32
    %17 = vector.broadcast %cst_8 : f32 to vector<8x1xf32>
    %18 = arith.addf %14, %17 : vector<8x1xf32>
    %19 = math.rsqrt %18 : vector<8x1xf32>
    %20 = vector.broadcast %19 : vector<8x1xf32> to vector<8x256xf32>
    %21 = arith.mulf %16, %20 : vector<8x256xf32>
    %c0_9 = arith.constant 0 : index
    %c0_10 = arith.constant 0 : index
    %22 = vector.load %arg2[%c0_9, %c0_10] : memref<8x1xf32, #tpu.memory_space<vmem>>, vector<8x1xf32>
    %23 = vector.broadcast %22 : vector<8x1xf32> to vector<8x256xf32>
    %24 = arith.mulf %21, %23 : vector<8x256xf32>
    %c0_11 = arith.constant 0 : index
    %c0_12 = arith.constant 0 : index
    %25 = vector.load %arg3[%c0_11, %c0_12] : memref<8x1xf32, #tpu.memory_space<vmem>>, vector<8x1xf32>
    %26 = vector.broadcast %25 : vector<8x1xf32> to vector<8x256xf32>
    %27 = arith.addf %24, %26 : vector<8x256xf32>
    %cst_13 = arith.constant 0.000000e+00 : f32
    %28 = vector.broadcast %cst_13 : f32 to vector<8x256xf32>
    %29 = arith.cmpf oge, %27, %28 : vector<8x256xf32>
    %cst_14 = arith.constant 0.00999999977 : f32
    %30 = vector.broadcast %cst_14 : f32 to vector<8x256xf32>
    %31 = arith.mulf %30, %27 : vector<8x256xf32>
    %32 = arith.select %29, %27, %31 : vector<8x256xi1>, vector<8x256xf32>
    %cst_15 = arith.constant 0.000000e+00 : f32
    %33 = vector.broadcast %cst_15 : f32 to vector<8x290xf32>
    %c0_16 = arith.constant 0 : index
    %c0_17 = arith.constant 0 : index
    %34 = vector.load %arg9[%c0_16, %c0_17] : memref<8x290xf32, #tpu.memory_space<vmem>>, vector<8x290xf32>
    tpu.vector_store %arg9[%c0_16, %c0_17], %33 {strides = array<i32>} : memref<8x290xf32, #tpu.memory_space<vmem>>, vector<8x290xf32>,
    %c0_18 = arith.constant 0 : index
    %c17 = arith.constant 17 : index
    %35 = vector.load %arg9[%c0_18, %c17] : memref<8x290xf32, #tpu.memory_space<vmem>>, vector<8x256xf32>
    tpu.vector_store %arg9[%c0_18, %c17], %32 {strides = array<i32>} : memref<8x290xf32, #tpu.memory_space<vmem>>, vector<8x256xf32>,
    %36 = tpu.iota {dimensions = array<i32: 1>} : vector<8x256xi32>
    %c16_i32 = arith.constant 16 : i32
    %c0_i32 = arith.constant 0 : i32
    %37 = arith.cmpi eq, %c16_i32, %c0_i32 : i32
    %c1_i32 = arith.constant 1 : i32
    %38 = arith.select %37, %c1_i32, %c16_i32 : i32
    %39 = vector.broadcast %38 : i32 to vector<8x256xi32>
    %40 = arith.remsi %36, %39 : vector<8x256xi32>
    %c0_i32_19 = arith.constant 0 : i32
    %41 = vector.broadcast %c0_i32_19 : i32 to vector<8x256xi32>
    %42 = arith.cmpi ne, %40, %41 : vector<8x256xi32>
    %c0_i32_20 = arith.constant 0 : i32
    %43 = vector.broadcast %c0_i32_20 : i32 to vector<8x256xi32>
    %44 = arith.cmpi slt, %40, %43 : vector<8x256xi32>
    %c0_i32_21 = arith.constant 0 : i32
    %45 = arith.cmpi slt, %38, %c0_i32_21 : i32
    %46 = vector.broadcast %45 : i1 to vector<8x256xi1>
    %47 = vector.broadcast %46 : vector<8x256xi1> to vector<8x256xi1>
    %48 = arith.xori %44, %47 : vector<8x256xi1>
    %49 = arith.andi %48, %42 : vector<8x256xi1>
    %50 = vector.broadcast %38 : i32 to vector<8x256xi32>
    %51 = arith.addi %40, %50 : vector<8x256xi32>
    %52 = arith.select %49, %51, %40 : vector<8x256xi1>, vector<8x256xi32>
    %c0_22 = arith.constant 0 : index
    %c0_23 = arith.constant 0 : index
    %53 = vector.load %arg9[%c0_22, %c0_23] : memref<8x290xf32, #tpu.memory_space<vmem>>, vector<8x256xf32>
    %c1_i32_24 = arith.constant 1 : i32
    %54 = vector.broadcast %c1_i32_24 : i32 to vector<8x256xi32>
    %55 = arith.cmpi sge, %52, %54 : vector<8x256xi32>
    %cst_25 = arith.constant 0.000000e+00 : f32
    %56 = vector.broadcast %cst_25 : f32 to vector<8x256xf32>
    %57 = arith.select %55, %53, %56 : vector<8x256xi1>, vector<8x256xf32>
    %c0_26 = arith.constant 0 : index
    %c1 = arith.constant 1 : index
    %58 = vector.load %arg9[%c0_26, %c1] : memref<8x290xf32, #tpu.memory_space<vmem>>, vector<8x256xf32>
    %c0_27 = arith.constant 0 : index
    %c2 = arith.constant 2 : index
    %59 = vector.load %arg9[%c0_27, %c2] : memref<8x290xf32, #tpu.memory_space<vmem>>, vector<8x256xf32>
    %c14_i32 = arith.constant 14 : i32
    %60 = vector.broadcast %c14_i32 : i32 to vector<8x256xi32>
    %61 = arith.cmpi sle, %52, %60 : vector<8x256xi32>
    %cst_28 = arith.constant 0.000000e+00 : f32
    %62 = vector.broadcast %cst_28 : f32 to vector<8x256xf32>
    %63 = arith.select %61, %59, %62 : vector<8x256xi1>, vector<8x256xf32>
    %c0_29 = arith.constant 0 : index
    %c16 = arith.constant 16 : index
    %64 = vector.load %arg9[%c0_29, %c16] : memref<8x290xf32, #tpu.memory_space<vmem>>, vector<8x256xf32>
    %c1_i32_30 = arith.constant 1 : i32
    %65 = vector.broadcast %c1_i32_30 : i32 to vector<8x256xi32>
    %66 = arith.cmpi sge, %52, %65 : vector<8x256xi32>
    %cst_31 = arith.constant 0.000000e+00 : f32
    %67 = vector.broadcast %cst_31 : f32 to vector<8x256xf32>
    %68 = arith.select %66, %64, %67 : vector<8x256xi1>, vector<8x256xf32>
    %c0_32 = arith.constant 0 : index
    %c17_33 = arith.constant 17 : index
    %69 = vector.load %arg9[%c0_32, %c17_33] : memref<8x290xf32, #tpu.memory_space<vmem>>, vector<8x256xf32>
    %c0_34 = arith.constant 0 : index
    %c18 = arith.constant 18 : index
    %70 = vector.load %arg9[%c0_34, %c18] : memref<8x290xf32, #tpu.memory_space<vmem>>, vector<8x256xf32>
    %c14_i32_35 = arith.constant 14 : i32
    %71 = vector.broadcast %c14_i32_35 : i32 to vector<8x256xi32>
    %72 = arith.cmpi sle, %52, %71 : vector<8x256xi32>
    %cst_36 = arith.constant 0.000000e+00 : f32
    %73 = vector.broadcast %cst_36 : f32 to vector<8x256xf32>
    %74 = arith.select %72, %70, %73 : vector<8x256xi1>, vector<8x256xf32>
    %c0_37 = arith.constant 0 : index
    %c32 = arith.constant 32 : index
    %75 = vector.load %arg9[%c0_37, %c32] : memref<8x290xf32, #tpu.memory_space<vmem>>, vector<8x256xf32>
    %c1_i32_38 = arith.constant 1 : i32
    %76 = vector.broadcast %c1_i32_38 : i32 to vector<8x256xi32>
    %77 = arith.cmpi sge, %52, %76 : vector<8x256xi32>
    %cst_39 = arith.constant 0.000000e+00 : f32
    %78 = vector.broadcast %cst_39 : f32 to vector<8x256xf32>
    %79 = arith.select %77, %75, %78 : vector<8x256xi1>, vector<8x256xf32>
    %c0_40 = arith.constant 0 : index
    %c33 = arith.constant 33 : index
    %80 = vector.load %arg9[%c0_40, %c33] : memref<8x290xf32, #tpu.memory_space<vmem>>, vector<8x256xf32>
    %c0_41 = arith.constant 0 : index
    %c34 = arith.constant 34 : index
    %81 = vector.load %arg9[%c0_41, %c34] : memref<8x290xf32, #tpu.memory_space<vmem>>, vector<8x256xf32>
    %c14_i32_42 = arith.constant 14 : i32
    %82 = vector.broadcast %c14_i32_42 : i32 to vector<8x256xi32>
    %83 = arith.cmpi sle, %52, %82 : vector<8x256xi32>
    %cst_43 = arith.constant 0.000000e+00 : f32
    %84 = vector.broadcast %cst_43 : f32 to vector<8x256xf32>
    %85 = arith.select %83, %81, %84 : vector<8x256xi1>, vector<8x256xf32>
    %86 = tpu.concatenate %57, %58, %63, %68, %69, %74, %79, %80, %85 in 0 : vector<8x256xf32>, vector<8x256xf32>, vector<8x256xf32>, vector<8x256xf32>, vector<8x256xf32>, vector<8x256xf32>, vector<8x256xf32>, vector<8x256xf32>, vector<8x256xf32> -> vector<72x256xf32>
    %87 = arith.truncf %86 : vector<72x256xf32> to vector<72x256xbf16>
    %c0_44 = arith.constant 0 : index
    %c0_45 = arith.constant 0 : index
    %88 = vector.load %arg4[%c0_44, %c0_45] : memref<8x72xbf16, #tpu.memory_space<vmem>>, vector<8x72xbf16>
    %cst_46 = arith.constant dense<0.000000e+00> : vector<8x256xf32>
    %89 = tpu.matmul %88, %87, %cst_46 {dimension_numbers = #tpu.dot_dimension_numbers<[1], [0], [0], [1], [0, 0, 1, 1], [], []>} : vector<8x72xbf16>, vector<72x256xbf16>, vector<8x256xf32> -> vector<8x256xf32>
    %cst_47 = arith.constant dense<0.000000e+00> : vector<8xf32>
    %90 = vector.multi_reduction <add>, %89, %cst_47 [1] : vector<8x256xf32> to vector<8xf32>
    %91 = vector.shape_cast %90 : vector<8xf32> to vector<8x1xf32>
    %cst_48 = arith.constant 2.560000e+02 : f32
    %92 = vector.broadcast %cst_48 : f32 to vector<8x1xf32>
    %93 = arith.divf %91, %92 : vector<8x1xf32>
    %94 = vector.broadcast %93 : vector<8x1xf32> to vector<8x256xf32>
    %95 = arith.subf %89, %94 : vector<8x256xf32>
    %96 = arith.mulf %95, %95 : vector<8x256xf32>
    %cst_49 = arith.constant dense<0.000000e+00> : vector<8xf32>
    %97 = vector.multi_reduction <add>, %96, %cst_49 [1] : vector<8x256xf32> to vector<8xf32>
    %98 = vector.shape_cast %97 : vector<8xf32> to vector<8x1xf32>
    %cst_50 = arith.constant 2.560000e+02 : f32
    %99 = vector.broadcast %cst_50 : f32 to vector<8x1xf32>
    %100 = arith.divf %98, %99 : vector<8x1xf32>
    %101 = vector.broadcast %93 : vector<8x1xf32> to vector<8x256xf32>
    %102 = arith.subf %89, %101 : vector<8x256xf32>
    %cst_51 = arith.constant 9.99999974E-6 : f32
    %103 = vector.broadcast %cst_51 : f32 to vector<8x1xf32>
    %104 = arith.addf %100, %103 : vector<8x1xf32>
    %105 = math.rsqrt %104 : vector<8x1xf32>
    %106 = vector.broadcast %105 : vector<8x1xf32> to vector<8x256xf32>
    %107 = arith.mulf %102, %106 : vector<8x256xf32>
    %c0_52 = arith.constant 0 : index
    %c0_53 = arith.constant 0 : index
    %108 = vector.load %arg5[%c0_52, %c0_53] : memref<8x1xf32, #tpu.memory_space<vmem>>, vector<8x1xf32>
    %109 = vector.broadcast %108 : vector<8x1xf32> to vector<8x256xf32>
    %110 = arith.mulf %107, %109 : vector<8x256xf32>
    %c0_54 = arith.constant 0 : index
    %c0_55 = arith.constant 0 : index
    %111 = vector.load %arg6[%c0_54, %c0_55] : memref<8x1xf32, #tpu.memory_space<vmem>>, vector<8x1xf32>
    %112 = vector.broadcast %111 : vector<8x1xf32> to vector<8x256xf32>
    %113 = arith.addf %110, %112 : vector<8x256xf32>
    %cst_56 = arith.constant 0.000000e+00 : f32
    %114 = vector.broadcast %cst_56 : f32 to vector<8x256xf32>
    %115 = arith.cmpf oge, %113, %114 : vector<8x256xf32>
    %cst_57 = arith.constant 0.00999999977 : f32
    %116 = vector.broadcast %cst_57 : f32 to vector<8x256xf32>
    %117 = arith.mulf %116, %113 : vector<8x256xf32>
    %118 = arith.select %115, %113, %117 : vector<8x256xi1>, vector<8x256xf32>
    %c0_58 = arith.constant 0 : index
    %c0_59 = arith.constant 0 : index
    %c0_60 = arith.constant 0 : index
    %119 = vector.load %arg8[%c0_58, %c0_59, %c0_60] : memref<1x8x256xf32, #tpu.memory_space<vmem>>, vector<1x8x256xf32>
    %120 = vector.shape_cast %119 : vector<1x8x256xf32> to vector<8x256xf32>
    %121 = vector.shape_cast %118 : vector<8x256xf32> to vector<1x8x256xf32>
    tpu.vector_store %arg8[%c0_58, %c0_59, %c0_60], %121 {strides = array<i32>} : memref<1x8x256xf32, #tpu.memory_space<vmem>>, vector<1x8x256xf32>,
    return
  }
  func.func @transform_0(%arg0: i32) -> (i32, i32) {
    %c0_i32 = arith.constant 0 : i32
    %c0_i32_0 = arith.constant 0 : i32
    %c0_i32_1 = arith.constant 0 : i32
    return %c0_i32, %c0_i32_0 : i32, i32
  }
  func.func @transform_1(%arg0: i32) -> (i32, i32) {
    %c0_i32 = arith.constant 0 : i32
    %c0_i32_0 = arith.constant 0 : i32
    %c0_i32_1 = arith.constant 0 : i32
    return %c0_i32, %c0_i32_0 : i32, i32
  }
  func.func @transform_2(%arg0: i32) -> (i32, i32) {
    %c0_i32 = arith.constant 0 : i32
    %c0_i32_0 = arith.constant 0 : i32
    %c0_i32_1 = arith.constant 0 : i32
    return %c0_i32, %c0_i32_0 : i32, i32
  }
  func.func @transform_3(%arg0: i32) -> (i32, i32) {
    %c0_i32 = arith.constant 0 : i32
    %c0_i32_0 = arith.constant 0 : i32
    %c0_i32_1 = arith.constant 0 : i32
    return %c0_i32, %c0_i32_0 : i32, i32
  }
  func.func @transform_4(%arg0: i32) -> (i32, i32) {
    %c0_i32 = arith.constant 0 : i32
    %c0_i32_0 = arith.constant 0 : i32
    %c0_i32_1 = arith.constant 0 : i32
    return %c0_i32, %c0_i32_0 : i32, i32
  }
  func.func @transform_5(%arg0: i32) -> (i32, i32) {
    %c0_i32 = arith.constant 0 : i32
    %c0_i32_0 = arith.constant 0 : i32
    %c0_i32_1 = arith.constant 0 : i32
    return %c0_i32, %c0_i32_0 : i32, i32
  }
  func.func @transform_6(%arg0: i32) -> (i32, i32, i32) {
    %c0_i32 = arith.constant 0 : i32
    %c0_i32_0 = arith.constant 0 : i32
    %c0_i32_1 = arith.constant 0 : i32
    return %arg0, %c0_i32, %c0_i32_0 : i32, i32, i32
  }
  func.func @transform_7(%arg0: i32) -> (i32, i32, i32) {
    %c0_i32 = arith.constant 0 : i32
    %c0_i32_0 = arith.constant 0 : i32
    %c0_i32_1 = arith.constant 0 : i32
    return %arg0, %c0_i32, %c0_i32_0 : i32, i32, i32
  }
}

module attributes {stable_mosaic.version = 11 : i64} {
  func.func @_double_conv_in_lrelu_kernel(%arg0: i32, %arg1: memref<16x72xbf16, #tpu.memory_space<vmem>>, %arg2: memref<16x1xf32, #tpu.memory_space<vmem>>, %arg3: memref<16x1xf32, #tpu.memory_space<vmem>>, %arg4: memref<16x144xbf16, #tpu.memory_space<vmem>>, %arg5: memref<16x1xf32, #tpu.memory_space<vmem>>, %arg6: memref<16x1xf32, #tpu.memory_space<vmem>>, %arg7: memref<1x72x64xbf16, #tpu.memory_space<vmem>>, %arg8: memref<1x16x64xf32, #tpu.memory_space<vmem>>, %arg9: memref<16x82xf32, #tpu.memory_space<vmem>>) attributes {dimension_semantics = [#tpu.dimension_semantics<parallel>], iteration_bounds = array<i64: 2>, scalar_prefetch = 0 : i64, scratch_operands = 1 : i64, tpu.core_type = #tpu.core_type<tc>, window_params = [{pipeline_mode = #tpu.pipeline_mode<synchronous>, transform_indices = @transform_0, window_bounds = array<i64: 16, 72>}, {pipeline_mode = #tpu.pipeline_mode<synchronous>, transform_indices = @transform_1, window_bounds = array<i64: 16, 1>}, {pipeline_mode = #tpu.pipeline_mode<synchronous>, transform_indices = @transform_2, window_bounds = array<i64: 16, 1>}, {pipeline_mode = #tpu.pipeline_mode<synchronous>, transform_indices = @transform_3, window_bounds = array<i64: 16, 144>}, {pipeline_mode = #tpu.pipeline_mode<synchronous>, transform_indices = @transform_4, window_bounds = array<i64: 16, 1>}, {pipeline_mode = #tpu.pipeline_mode<synchronous>, transform_indices = @transform_5, window_bounds = array<i64: 16, 1>}, {transform_indices = @transform_6, window_bounds = array<i64: 1, 72, 64>}, {transform_indices = @transform_7, window_bounds = array<i64: 1, 16, 64>}]} {
    %c0 = arith.constant 0 : index
    %c0_0 = arith.constant 0 : index
    %0 = vector.load %arg1[%c0, %c0_0] : memref<16x72xbf16, #tpu.memory_space<vmem>>, vector<16x72xbf16>
    %c0_1 = arith.constant 0 : index
    %c0_2 = arith.constant 0 : index
    %c0_3 = arith.constant 0 : index
    %1 = vector.load %arg7[%c0_1, %c0_2, %c0_3] : memref<1x72x64xbf16, #tpu.memory_space<vmem>>, vector<1x72x64xbf16>
    %2 = vector.shape_cast %1 : vector<1x72x64xbf16> to vector<72x64xbf16>
    %cst = arith.constant dense<0.000000e+00> : vector<16x64xf32>
    %3 = tpu.matmul %0, %2, %cst {dimension_numbers = #tpu.dot_dimension_numbers<[1], [0], [0], [1], [0, 0, 1, 1], [], []>} : vector<16x72xbf16>, vector<72x64xbf16>, vector<16x64xf32> -> vector<16x64xf32>
    %cst_4 = arith.constant dense<0.000000e+00> : vector<16xf32>
    %4 = vector.multi_reduction <add>, %3, %cst_4 [1] : vector<16x64xf32> to vector<16xf32>
    %5 = vector.shape_cast %4 : vector<16xf32> to vector<16x1xf32>
    %cst_5 = arith.constant 6.400000e+01 : f32
    %6 = vector.broadcast %cst_5 : f32 to vector<16x1xf32>
    %7 = arith.divf %5, %6 : vector<16x1xf32>
    %8 = vector.broadcast %7 : vector<16x1xf32> to vector<16x64xf32>
    %9 = arith.subf %3, %8 : vector<16x64xf32>
    %10 = arith.mulf %9, %9 : vector<16x64xf32>
    %cst_6 = arith.constant dense<0.000000e+00> : vector<16xf32>
    %11 = vector.multi_reduction <add>, %10, %cst_6 [1] : vector<16x64xf32> to vector<16xf32>
    %12 = vector.shape_cast %11 : vector<16xf32> to vector<16x1xf32>
    %cst_7 = arith.constant 6.400000e+01 : f32
    %13 = vector.broadcast %cst_7 : f32 to vector<16x1xf32>
    %14 = arith.divf %12, %13 : vector<16x1xf32>
    %15 = vector.broadcast %7 : vector<16x1xf32> to vector<16x64xf32>
    %16 = arith.subf %3, %15 : vector<16x64xf32>
    %cst_8 = arith.constant 9.99999974E-6 : f32
    %17 = vector.broadcast %cst_8 : f32 to vector<16x1xf32>
    %18 = arith.addf %14, %17 : vector<16x1xf32>
    %19 = math.rsqrt %18 : vector<16x1xf32>
    %20 = vector.broadcast %19 : vector<16x1xf32> to vector<16x64xf32>
    %21 = arith.mulf %16, %20 : vector<16x64xf32>
    %c0_9 = arith.constant 0 : index
    %c0_10 = arith.constant 0 : index
    %22 = vector.load %arg2[%c0_9, %c0_10] : memref<16x1xf32, #tpu.memory_space<vmem>>, vector<16x1xf32>
    %23 = vector.broadcast %22 : vector<16x1xf32> to vector<16x64xf32>
    %24 = arith.mulf %21, %23 : vector<16x64xf32>
    %c0_11 = arith.constant 0 : index
    %c0_12 = arith.constant 0 : index
    %25 = vector.load %arg3[%c0_11, %c0_12] : memref<16x1xf32, #tpu.memory_space<vmem>>, vector<16x1xf32>
    %26 = vector.broadcast %25 : vector<16x1xf32> to vector<16x64xf32>
    %27 = arith.addf %24, %26 : vector<16x64xf32>
    %cst_13 = arith.constant 0.000000e+00 : f32
    %28 = vector.broadcast %cst_13 : f32 to vector<16x64xf32>
    %29 = arith.cmpf oge, %27, %28 : vector<16x64xf32>
    %cst_14 = arith.constant 0.00999999977 : f32
    %30 = vector.broadcast %cst_14 : f32 to vector<16x64xf32>
    %31 = arith.mulf %30, %27 : vector<16x64xf32>
    %32 = arith.select %29, %27, %31 : vector<16x64xi1>, vector<16x64xf32>
    %cst_15 = arith.constant 0.000000e+00 : f32
    %33 = vector.broadcast %cst_15 : f32 to vector<16x82xf32>
    %c0_16 = arith.constant 0 : index
    %c0_17 = arith.constant 0 : index
    %34 = vector.load %arg9[%c0_16, %c0_17] : memref<16x82xf32, #tpu.memory_space<vmem>>, vector<16x82xf32>
    tpu.vector_store %arg9[%c0_16, %c0_17], %33 {strides = array<i32>} : memref<16x82xf32, #tpu.memory_space<vmem>>, vector<16x82xf32>,
    %c0_18 = arith.constant 0 : index
    %c9 = arith.constant 9 : index
    %35 = vector.load %arg9[%c0_18, %c9] : memref<16x82xf32, #tpu.memory_space<vmem>>, vector<16x64xf32>
    tpu.vector_store %arg9[%c0_18, %c9], %32 {strides = array<i32>} : memref<16x82xf32, #tpu.memory_space<vmem>>, vector<16x64xf32>,
    %36 = tpu.iota {dimensions = array<i32: 1>} : vector<16x64xi32>
    %c8_i32 = arith.constant 8 : i32
    %c0_i32 = arith.constant 0 : i32
    %37 = arith.cmpi eq, %c8_i32, %c0_i32 : i32
    %c1_i32 = arith.constant 1 : i32
    %38 = arith.select %37, %c1_i32, %c8_i32 : i32
    %39 = vector.broadcast %38 : i32 to vector<16x64xi32>
    %40 = arith.remsi %36, %39 : vector<16x64xi32>
    %c0_i32_19 = arith.constant 0 : i32
    %41 = vector.broadcast %c0_i32_19 : i32 to vector<16x64xi32>
    %42 = arith.cmpi ne, %40, %41 : vector<16x64xi32>
    %c0_i32_20 = arith.constant 0 : i32
    %43 = vector.broadcast %c0_i32_20 : i32 to vector<16x64xi32>
    %44 = arith.cmpi slt, %40, %43 : vector<16x64xi32>
    %c0_i32_21 = arith.constant 0 : i32
    %45 = arith.cmpi slt, %38, %c0_i32_21 : i32
    %46 = vector.broadcast %45 : i1 to vector<16x64xi1>
    %47 = vector.broadcast %46 : vector<16x64xi1> to vector<16x64xi1>
    %48 = arith.xori %44, %47 : vector<16x64xi1>
    %49 = arith.andi %48, %42 : vector<16x64xi1>
    %50 = vector.broadcast %38 : i32 to vector<16x64xi32>
    %51 = arith.addi %40, %50 : vector<16x64xi32>
    %52 = arith.select %49, %51, %40 : vector<16x64xi1>, vector<16x64xi32>
    %c0_22 = arith.constant 0 : index
    %c0_23 = arith.constant 0 : index
    %53 = vector.load %arg9[%c0_22, %c0_23] : memref<16x82xf32, #tpu.memory_space<vmem>>, vector<16x64xf32>
    %c1_i32_24 = arith.constant 1 : i32
    %54 = vector.broadcast %c1_i32_24 : i32 to vector<16x64xi32>
    %55 = arith.cmpi sge, %52, %54 : vector<16x64xi32>
    %cst_25 = arith.constant 0.000000e+00 : f32
    %56 = vector.broadcast %cst_25 : f32 to vector<16x64xf32>
    %57 = arith.select %55, %53, %56 : vector<16x64xi1>, vector<16x64xf32>
    %c0_26 = arith.constant 0 : index
    %c1 = arith.constant 1 : index
    %58 = vector.load %arg9[%c0_26, %c1] : memref<16x82xf32, #tpu.memory_space<vmem>>, vector<16x64xf32>
    %c0_27 = arith.constant 0 : index
    %c2 = arith.constant 2 : index
    %59 = vector.load %arg9[%c0_27, %c2] : memref<16x82xf32, #tpu.memory_space<vmem>>, vector<16x64xf32>
    %c6_i32 = arith.constant 6 : i32
    %60 = vector.broadcast %c6_i32 : i32 to vector<16x64xi32>
    %61 = arith.cmpi sle, %52, %60 : vector<16x64xi32>
    %cst_28 = arith.constant 0.000000e+00 : f32
    %62 = vector.broadcast %cst_28 : f32 to vector<16x64xf32>
    %63 = arith.select %61, %59, %62 : vector<16x64xi1>, vector<16x64xf32>
    %c0_29 = arith.constant 0 : index
    %c8 = arith.constant 8 : index
    %64 = vector.load %arg9[%c0_29, %c8] : memref<16x82xf32, #tpu.memory_space<vmem>>, vector<16x64xf32>
    %c1_i32_30 = arith.constant 1 : i32
    %65 = vector.broadcast %c1_i32_30 : i32 to vector<16x64xi32>
    %66 = arith.cmpi sge, %52, %65 : vector<16x64xi32>
    %cst_31 = arith.constant 0.000000e+00 : f32
    %67 = vector.broadcast %cst_31 : f32 to vector<16x64xf32>
    %68 = arith.select %66, %64, %67 : vector<16x64xi1>, vector<16x64xf32>
    %c0_32 = arith.constant 0 : index
    %c9_33 = arith.constant 9 : index
    %69 = vector.load %arg9[%c0_32, %c9_33] : memref<16x82xf32, #tpu.memory_space<vmem>>, vector<16x64xf32>
    %c0_34 = arith.constant 0 : index
    %c10 = arith.constant 10 : index
    %70 = vector.load %arg9[%c0_34, %c10] : memref<16x82xf32, #tpu.memory_space<vmem>>, vector<16x64xf32>
    %c6_i32_35 = arith.constant 6 : i32
    %71 = vector.broadcast %c6_i32_35 : i32 to vector<16x64xi32>
    %72 = arith.cmpi sle, %52, %71 : vector<16x64xi32>
    %cst_36 = arith.constant 0.000000e+00 : f32
    %73 = vector.broadcast %cst_36 : f32 to vector<16x64xf32>
    %74 = arith.select %72, %70, %73 : vector<16x64xi1>, vector<16x64xf32>
    %c0_37 = arith.constant 0 : index
    %c16 = arith.constant 16 : index
    %75 = vector.load %arg9[%c0_37, %c16] : memref<16x82xf32, #tpu.memory_space<vmem>>, vector<16x64xf32>
    %c1_i32_38 = arith.constant 1 : i32
    %76 = vector.broadcast %c1_i32_38 : i32 to vector<16x64xi32>
    %77 = arith.cmpi sge, %52, %76 : vector<16x64xi32>
    %cst_39 = arith.constant 0.000000e+00 : f32
    %78 = vector.broadcast %cst_39 : f32 to vector<16x64xf32>
    %79 = arith.select %77, %75, %78 : vector<16x64xi1>, vector<16x64xf32>
    %c0_40 = arith.constant 0 : index
    %c17 = arith.constant 17 : index
    %80 = vector.load %arg9[%c0_40, %c17] : memref<16x82xf32, #tpu.memory_space<vmem>>, vector<16x64xf32>
    %c0_41 = arith.constant 0 : index
    %c18 = arith.constant 18 : index
    %81 = vector.load %arg9[%c0_41, %c18] : memref<16x82xf32, #tpu.memory_space<vmem>>, vector<16x64xf32>
    %c6_i32_42 = arith.constant 6 : i32
    %82 = vector.broadcast %c6_i32_42 : i32 to vector<16x64xi32>
    %83 = arith.cmpi sle, %52, %82 : vector<16x64xi32>
    %cst_43 = arith.constant 0.000000e+00 : f32
    %84 = vector.broadcast %cst_43 : f32 to vector<16x64xf32>
    %85 = arith.select %83, %81, %84 : vector<16x64xi1>, vector<16x64xf32>
    %86 = tpu.concatenate %57, %58, %63, %68, %69, %74, %79, %80, %85 in 0 : vector<16x64xf32>, vector<16x64xf32>, vector<16x64xf32>, vector<16x64xf32>, vector<16x64xf32>, vector<16x64xf32>, vector<16x64xf32>, vector<16x64xf32>, vector<16x64xf32> -> vector<144x64xf32>
    %87 = arith.truncf %86 : vector<144x64xf32> to vector<144x64xbf16>
    %c0_44 = arith.constant 0 : index
    %c0_45 = arith.constant 0 : index
    %88 = vector.load %arg4[%c0_44, %c0_45] : memref<16x144xbf16, #tpu.memory_space<vmem>>, vector<16x144xbf16>
    %cst_46 = arith.constant dense<0.000000e+00> : vector<16x64xf32>
    %89 = tpu.matmul %88, %87, %cst_46 {dimension_numbers = #tpu.dot_dimension_numbers<[1], [0], [0], [1], [0, 0, 1, 1], [], []>} : vector<16x144xbf16>, vector<144x64xbf16>, vector<16x64xf32> -> vector<16x64xf32>
    %cst_47 = arith.constant dense<0.000000e+00> : vector<16xf32>
    %90 = vector.multi_reduction <add>, %89, %cst_47 [1] : vector<16x64xf32> to vector<16xf32>
    %91 = vector.shape_cast %90 : vector<16xf32> to vector<16x1xf32>
    %cst_48 = arith.constant 6.400000e+01 : f32
    %92 = vector.broadcast %cst_48 : f32 to vector<16x1xf32>
    %93 = arith.divf %91, %92 : vector<16x1xf32>
    %94 = vector.broadcast %93 : vector<16x1xf32> to vector<16x64xf32>
    %95 = arith.subf %89, %94 : vector<16x64xf32>
    %96 = arith.mulf %95, %95 : vector<16x64xf32>
    %cst_49 = arith.constant dense<0.000000e+00> : vector<16xf32>
    %97 = vector.multi_reduction <add>, %96, %cst_49 [1] : vector<16x64xf32> to vector<16xf32>
    %98 = vector.shape_cast %97 : vector<16xf32> to vector<16x1xf32>
    %cst_50 = arith.constant 6.400000e+01 : f32
    %99 = vector.broadcast %cst_50 : f32 to vector<16x1xf32>
    %100 = arith.divf %98, %99 : vector<16x1xf32>
    %101 = vector.broadcast %93 : vector<16x1xf32> to vector<16x64xf32>
    %102 = arith.subf %89, %101 : vector<16x64xf32>
    %cst_51 = arith.constant 9.99999974E-6 : f32
    %103 = vector.broadcast %cst_51 : f32 to vector<16x1xf32>
    %104 = arith.addf %100, %103 : vector<16x1xf32>
    %105 = math.rsqrt %104 : vector<16x1xf32>
    %106 = vector.broadcast %105 : vector<16x1xf32> to vector<16x64xf32>
    %107 = arith.mulf %102, %106 : vector<16x64xf32>
    %c0_52 = arith.constant 0 : index
    %c0_53 = arith.constant 0 : index
    %108 = vector.load %arg5[%c0_52, %c0_53] : memref<16x1xf32, #tpu.memory_space<vmem>>, vector<16x1xf32>
    %109 = vector.broadcast %108 : vector<16x1xf32> to vector<16x64xf32>
    %110 = arith.mulf %107, %109 : vector<16x64xf32>
    %c0_54 = arith.constant 0 : index
    %c0_55 = arith.constant 0 : index
    %111 = vector.load %arg6[%c0_54, %c0_55] : memref<16x1xf32, #tpu.memory_space<vmem>>, vector<16x1xf32>
    %112 = vector.broadcast %111 : vector<16x1xf32> to vector<16x64xf32>
    %113 = arith.addf %110, %112 : vector<16x64xf32>
    %cst_56 = arith.constant 0.000000e+00 : f32
    %114 = vector.broadcast %cst_56 : f32 to vector<16x64xf32>
    %115 = arith.cmpf oge, %113, %114 : vector<16x64xf32>
    %cst_57 = arith.constant 0.00999999977 : f32
    %116 = vector.broadcast %cst_57 : f32 to vector<16x64xf32>
    %117 = arith.mulf %116, %113 : vector<16x64xf32>
    %118 = arith.select %115, %113, %117 : vector<16x64xi1>, vector<16x64xf32>
    %c0_58 = arith.constant 0 : index
    %c0_59 = arith.constant 0 : index
    %c0_60 = arith.constant 0 : index
    %119 = vector.load %arg8[%c0_58, %c0_59, %c0_60] : memref<1x16x64xf32, #tpu.memory_space<vmem>>, vector<1x16x64xf32>
    %120 = vector.shape_cast %119 : vector<1x16x64xf32> to vector<16x64xf32>
    %121 = vector.shape_cast %118 : vector<16x64xf32> to vector<1x16x64xf32>
    tpu.vector_store %arg8[%c0_58, %c0_59, %c0_60], %121 {strides = array<i32>} : memref<1x16x64xf32, #tpu.memory_space<vmem>>, vector<1x16x64xf32>,
    return
  }
  func.func @transform_0(%arg0: i32) -> (i32, i32) {
    %c0_i32 = arith.constant 0 : i32
    %c0_i32_0 = arith.constant 0 : i32
    %c0_i32_1 = arith.constant 0 : i32
    return %c0_i32, %c0_i32_0 : i32, i32
  }
  func.func @transform_1(%arg0: i32) -> (i32, i32) {
    %c0_i32 = arith.constant 0 : i32
    %c0_i32_0 = arith.constant 0 : i32
    %c0_i32_1 = arith.constant 0 : i32
    return %c0_i32, %c0_i32_0 : i32, i32
  }
  func.func @transform_2(%arg0: i32) -> (i32, i32) {
    %c0_i32 = arith.constant 0 : i32
    %c0_i32_0 = arith.constant 0 : i32
    %c0_i32_1 = arith.constant 0 : i32
    return %c0_i32, %c0_i32_0 : i32, i32
  }
  func.func @transform_3(%arg0: i32) -> (i32, i32) {
    %c0_i32 = arith.constant 0 : i32
    %c0_i32_0 = arith.constant 0 : i32
    %c0_i32_1 = arith.constant 0 : i32
    return %c0_i32, %c0_i32_0 : i32, i32
  }
  func.func @transform_4(%arg0: i32) -> (i32, i32) {
    %c0_i32 = arith.constant 0 : i32
    %c0_i32_0 = arith.constant 0 : i32
    %c0_i32_1 = arith.constant 0 : i32
    return %c0_i32, %c0_i32_0 : i32, i32
  }
  func.func @transform_5(%arg0: i32) -> (i32, i32) {
    %c0_i32 = arith.constant 0 : i32
    %c0_i32_0 = arith.constant 0 : i32
    %c0_i32_1 = arith.constant 0 : i32
    return %c0_i32, %c0_i32_0 : i32, i32
  }
  func.func @transform_6(%arg0: i32) -> (i32, i32, i32) {
    %c0_i32 = arith.constant 0 : i32
    %c0_i32_0 = arith.constant 0 : i32
    %c0_i32_1 = arith.constant 0 : i32
    return %arg0, %c0_i32, %c0_i32_0 : i32, i32, i32
  }
  func.func @transform_7(%arg0: i32) -> (i32, i32, i32) {
    %c0_i32 = arith.constant 0 : i32
    %c0_i32_0 = arith.constant 0 : i32
    %c0_i32_1 = arith.constant 0 : i32
    return %arg0, %c0_i32, %c0_i32_0 : i32, i32, i32
  }
}

module attributes {stable_mosaic.version = 11 : i64} {
  func.func @_double_conv_in_lrelu_kernel(%arg0: i32, %arg1: memref<32x144xbf16, #tpu.memory_space<vmem>>, %arg2: memref<32x1xf32, #tpu.memory_space<vmem>>, %arg3: memref<32x1xf32, #tpu.memory_space<vmem>>, %arg4: memref<32x288xbf16, #tpu.memory_space<vmem>>, %arg5: memref<32x1xf32, #tpu.memory_space<vmem>>, %arg6: memref<32x1xf32, #tpu.memory_space<vmem>>, %arg7: memref<1x144x16xbf16, #tpu.memory_space<vmem>>, %arg8: memref<1x32x16xf32, #tpu.memory_space<vmem>>, %arg9: memref<32x26xf32, #tpu.memory_space<vmem>>) attributes {dimension_semantics = [#tpu.dimension_semantics<parallel>], iteration_bounds = array<i64: 2>, scalar_prefetch = 0 : i64, scratch_operands = 1 : i64, tpu.core_type = #tpu.core_type<tc>, window_params = [{pipeline_mode = #tpu.pipeline_mode<synchronous>, transform_indices = @transform_0, window_bounds = array<i64: 32, 144>}, {pipeline_mode = #tpu.pipeline_mode<synchronous>, transform_indices = @transform_1, window_bounds = array<i64: 32, 1>}, {pipeline_mode = #tpu.pipeline_mode<synchronous>, transform_indices = @transform_2, window_bounds = array<i64: 32, 1>}, {pipeline_mode = #tpu.pipeline_mode<synchronous>, transform_indices = @transform_3, window_bounds = array<i64: 32, 288>}, {pipeline_mode = #tpu.pipeline_mode<synchronous>, transform_indices = @transform_4, window_bounds = array<i64: 32, 1>}, {pipeline_mode = #tpu.pipeline_mode<synchronous>, transform_indices = @transform_5, window_bounds = array<i64: 32, 1>}, {transform_indices = @transform_6, window_bounds = array<i64: 1, 144, 16>}, {transform_indices = @transform_7, window_bounds = array<i64: 1, 32, 16>}]} {
    %c0 = arith.constant 0 : index
    %c0_0 = arith.constant 0 : index
    %0 = vector.load %arg1[%c0, %c0_0] : memref<32x144xbf16, #tpu.memory_space<vmem>>, vector<32x144xbf16>
    %c0_1 = arith.constant 0 : index
    %c0_2 = arith.constant 0 : index
    %c0_3 = arith.constant 0 : index
    %1 = vector.load %arg7[%c0_1, %c0_2, %c0_3] : memref<1x144x16xbf16, #tpu.memory_space<vmem>>, vector<1x144x16xbf16>
    %2 = vector.shape_cast %1 : vector<1x144x16xbf16> to vector<144x16xbf16>
    %cst = arith.constant dense<0.000000e+00> : vector<32x16xf32>
    %3 = tpu.matmul %0, %2, %cst {dimension_numbers = #tpu.dot_dimension_numbers<[1], [0], [0], [1], [0, 0, 1, 1], [], []>} : vector<32x144xbf16>, vector<144x16xbf16>, vector<32x16xf32> -> vector<32x16xf32>
    %cst_4 = arith.constant dense<0.000000e+00> : vector<32xf32>
    %4 = vector.multi_reduction <add>, %3, %cst_4 [1] : vector<32x16xf32> to vector<32xf32>
    %5 = vector.shape_cast %4 : vector<32xf32> to vector<32x1xf32>
    %cst_5 = arith.constant 1.600000e+01 : f32
    %6 = vector.broadcast %cst_5 : f32 to vector<32x1xf32>
    %7 = arith.divf %5, %6 : vector<32x1xf32>
    %8 = vector.broadcast %7 : vector<32x1xf32> to vector<32x16xf32>
    %9 = arith.subf %3, %8 : vector<32x16xf32>
    %10 = arith.mulf %9, %9 : vector<32x16xf32>
    %cst_6 = arith.constant dense<0.000000e+00> : vector<32xf32>
    %11 = vector.multi_reduction <add>, %10, %cst_6 [1] : vector<32x16xf32> to vector<32xf32>
    %12 = vector.shape_cast %11 : vector<32xf32> to vector<32x1xf32>
    %cst_7 = arith.constant 1.600000e+01 : f32
    %13 = vector.broadcast %cst_7 : f32 to vector<32x1xf32>
    %14 = arith.divf %12, %13 : vector<32x1xf32>
    %15 = vector.broadcast %7 : vector<32x1xf32> to vector<32x16xf32>
    %16 = arith.subf %3, %15 : vector<32x16xf32>
    %cst_8 = arith.constant 9.99999974E-6 : f32
    %17 = vector.broadcast %cst_8 : f32 to vector<32x1xf32>
    %18 = arith.addf %14, %17 : vector<32x1xf32>
    %19 = math.rsqrt %18 : vector<32x1xf32>
    %20 = vector.broadcast %19 : vector<32x1xf32> to vector<32x16xf32>
    %21 = arith.mulf %16, %20 : vector<32x16xf32>
    %c0_9 = arith.constant 0 : index
    %c0_10 = arith.constant 0 : index
    %22 = vector.load %arg2[%c0_9, %c0_10] : memref<32x1xf32, #tpu.memory_space<vmem>>, vector<32x1xf32>
    %23 = vector.broadcast %22 : vector<32x1xf32> to vector<32x16xf32>
    %24 = arith.mulf %21, %23 : vector<32x16xf32>
    %c0_11 = arith.constant 0 : index
    %c0_12 = arith.constant 0 : index
    %25 = vector.load %arg3[%c0_11, %c0_12] : memref<32x1xf32, #tpu.memory_space<vmem>>, vector<32x1xf32>
    %26 = vector.broadcast %25 : vector<32x1xf32> to vector<32x16xf32>
    %27 = arith.addf %24, %26 : vector<32x16xf32>
    %cst_13 = arith.constant 0.000000e+00 : f32
    %28 = vector.broadcast %cst_13 : f32 to vector<32x16xf32>
    %29 = arith.cmpf oge, %27, %28 : vector<32x16xf32>
    %cst_14 = arith.constant 0.00999999977 : f32
    %30 = vector.broadcast %cst_14 : f32 to vector<32x16xf32>
    %31 = arith.mulf %30, %27 : vector<32x16xf32>
    %32 = arith.select %29, %27, %31 : vector<32x16xi1>, vector<32x16xf32>
    %cst_15 = arith.constant 0.000000e+00 : f32
    %33 = vector.broadcast %cst_15 : f32 to vector<32x26xf32>
    %c0_16 = arith.constant 0 : index
    %c0_17 = arith.constant 0 : index
    %34 = vector.load %arg9[%c0_16, %c0_17] : memref<32x26xf32, #tpu.memory_space<vmem>>, vector<32x26xf32>
    tpu.vector_store %arg9[%c0_16, %c0_17], %33 {strides = array<i32>} : memref<32x26xf32, #tpu.memory_space<vmem>>, vector<32x26xf32>,
    %c0_18 = arith.constant 0 : index
    %c5 = arith.constant 5 : index
    %35 = vector.load %arg9[%c0_18, %c5] : memref<32x26xf32, #tpu.memory_space<vmem>>, vector<32x16xf32>
    tpu.vector_store %arg9[%c0_18, %c5], %32 {strides = array<i32>} : memref<32x26xf32, #tpu.memory_space<vmem>>, vector<32x16xf32>,
    %36 = tpu.iota {dimensions = array<i32: 1>} : vector<32x16xi32>
    %c4_i32 = arith.constant 4 : i32
    %c0_i32 = arith.constant 0 : i32
    %37 = arith.cmpi eq, %c4_i32, %c0_i32 : i32
    %c1_i32 = arith.constant 1 : i32
    %38 = arith.select %37, %c1_i32, %c4_i32 : i32
    %39 = vector.broadcast %38 : i32 to vector<32x16xi32>
    %40 = arith.remsi %36, %39 : vector<32x16xi32>
    %c0_i32_19 = arith.constant 0 : i32
    %41 = vector.broadcast %c0_i32_19 : i32 to vector<32x16xi32>
    %42 = arith.cmpi ne, %40, %41 : vector<32x16xi32>
    %c0_i32_20 = arith.constant 0 : i32
    %43 = vector.broadcast %c0_i32_20 : i32 to vector<32x16xi32>
    %44 = arith.cmpi slt, %40, %43 : vector<32x16xi32>
    %c0_i32_21 = arith.constant 0 : i32
    %45 = arith.cmpi slt, %38, %c0_i32_21 : i32
    %46 = vector.broadcast %45 : i1 to vector<32x16xi1>
    %47 = vector.broadcast %46 : vector<32x16xi1> to vector<32x16xi1>
    %48 = arith.xori %44, %47 : vector<32x16xi1>
    %49 = arith.andi %48, %42 : vector<32x16xi1>
    %50 = vector.broadcast %38 : i32 to vector<32x16xi32>
    %51 = arith.addi %40, %50 : vector<32x16xi32>
    %52 = arith.select %49, %51, %40 : vector<32x16xi1>, vector<32x16xi32>
    %c0_22 = arith.constant 0 : index
    %c0_23 = arith.constant 0 : index
    %53 = vector.load %arg9[%c0_22, %c0_23] : memref<32x26xf32, #tpu.memory_space<vmem>>, vector<32x16xf32>
    %c1_i32_24 = arith.constant 1 : i32
    %54 = vector.broadcast %c1_i32_24 : i32 to vector<32x16xi32>
    %55 = arith.cmpi sge, %52, %54 : vector<32x16xi32>
    %cst_25 = arith.constant 0.000000e+00 : f32
    %56 = vector.broadcast %cst_25 : f32 to vector<32x16xf32>
    %57 = arith.select %55, %53, %56 : vector<32x16xi1>, vector<32x16xf32>
    %c0_26 = arith.constant 0 : index
    %c1 = arith.constant 1 : index
    %58 = vector.load %arg9[%c0_26, %c1] : memref<32x26xf32, #tpu.memory_space<vmem>>, vector<32x16xf32>
    %c0_27 = arith.constant 0 : index
    %c2 = arith.constant 2 : index
    %59 = vector.load %arg9[%c0_27, %c2] : memref<32x26xf32, #tpu.memory_space<vmem>>, vector<32x16xf32>
    %c2_i32 = arith.constant 2 : i32
    %60 = vector.broadcast %c2_i32 : i32 to vector<32x16xi32>
    %61 = arith.cmpi sle, %52, %60 : vector<32x16xi32>
    %cst_28 = arith.constant 0.000000e+00 : f32
    %62 = vector.broadcast %cst_28 : f32 to vector<32x16xf32>
    %63 = arith.select %61, %59, %62 : vector<32x16xi1>, vector<32x16xf32>
    %c0_29 = arith.constant 0 : index
    %c4 = arith.constant 4 : index
    %64 = vector.load %arg9[%c0_29, %c4] : memref<32x26xf32, #tpu.memory_space<vmem>>, vector<32x16xf32>
    %c1_i32_30 = arith.constant 1 : i32
    %65 = vector.broadcast %c1_i32_30 : i32 to vector<32x16xi32>
    %66 = arith.cmpi sge, %52, %65 : vector<32x16xi32>
    %cst_31 = arith.constant 0.000000e+00 : f32
    %67 = vector.broadcast %cst_31 : f32 to vector<32x16xf32>
    %68 = arith.select %66, %64, %67 : vector<32x16xi1>, vector<32x16xf32>
    %c0_32 = arith.constant 0 : index
    %c5_33 = arith.constant 5 : index
    %69 = vector.load %arg9[%c0_32, %c5_33] : memref<32x26xf32, #tpu.memory_space<vmem>>, vector<32x16xf32>
    %c0_34 = arith.constant 0 : index
    %c6 = arith.constant 6 : index
    %70 = vector.load %arg9[%c0_34, %c6] : memref<32x26xf32, #tpu.memory_space<vmem>>, vector<32x16xf32>
    %c2_i32_35 = arith.constant 2 : i32
    %71 = vector.broadcast %c2_i32_35 : i32 to vector<32x16xi32>
    %72 = arith.cmpi sle, %52, %71 : vector<32x16xi32>
    %cst_36 = arith.constant 0.000000e+00 : f32
    %73 = vector.broadcast %cst_36 : f32 to vector<32x16xf32>
    %74 = arith.select %72, %70, %73 : vector<32x16xi1>, vector<32x16xf32>
    %c0_37 = arith.constant 0 : index
    %c8 = arith.constant 8 : index
    %75 = vector.load %arg9[%c0_37, %c8] : memref<32x26xf32, #tpu.memory_space<vmem>>, vector<32x16xf32>
    %c1_i32_38 = arith.constant 1 : i32
    %76 = vector.broadcast %c1_i32_38 : i32 to vector<32x16xi32>
    %77 = arith.cmpi sge, %52, %76 : vector<32x16xi32>
    %cst_39 = arith.constant 0.000000e+00 : f32
    %78 = vector.broadcast %cst_39 : f32 to vector<32x16xf32>
    %79 = arith.select %77, %75, %78 : vector<32x16xi1>, vector<32x16xf32>
    %c0_40 = arith.constant 0 : index
    %c9 = arith.constant 9 : index
    %80 = vector.load %arg9[%c0_40, %c9] : memref<32x26xf32, #tpu.memory_space<vmem>>, vector<32x16xf32>
    %c0_41 = arith.constant 0 : index
    %c10 = arith.constant 10 : index
    %81 = vector.load %arg9[%c0_41, %c10] : memref<32x26xf32, #tpu.memory_space<vmem>>, vector<32x16xf32>
    %c2_i32_42 = arith.constant 2 : i32
    %82 = vector.broadcast %c2_i32_42 : i32 to vector<32x16xi32>
    %83 = arith.cmpi sle, %52, %82 : vector<32x16xi32>
    %cst_43 = arith.constant 0.000000e+00 : f32
    %84 = vector.broadcast %cst_43 : f32 to vector<32x16xf32>
    %85 = arith.select %83, %81, %84 : vector<32x16xi1>, vector<32x16xf32>
    %86 = tpu.concatenate %57, %58, %63, %68, %69, %74, %79, %80, %85 in 0 : vector<32x16xf32>, vector<32x16xf32>, vector<32x16xf32>, vector<32x16xf32>, vector<32x16xf32>, vector<32x16xf32>, vector<32x16xf32>, vector<32x16xf32>, vector<32x16xf32> -> vector<288x16xf32>
    %87 = arith.truncf %86 : vector<288x16xf32> to vector<288x16xbf16>
    %c0_44 = arith.constant 0 : index
    %c0_45 = arith.constant 0 : index
    %88 = vector.load %arg4[%c0_44, %c0_45] : memref<32x288xbf16, #tpu.memory_space<vmem>>, vector<32x288xbf16>
    %cst_46 = arith.constant dense<0.000000e+00> : vector<32x16xf32>
    %89 = tpu.matmul %88, %87, %cst_46 {dimension_numbers = #tpu.dot_dimension_numbers<[1], [0], [0], [1], [0, 0, 1, 1], [], []>} : vector<32x288xbf16>, vector<288x16xbf16>, vector<32x16xf32> -> vector<32x16xf32>
    %cst_47 = arith.constant dense<0.000000e+00> : vector<32xf32>
    %90 = vector.multi_reduction <add>, %89, %cst_47 [1] : vector<32x16xf32> to vector<32xf32>
    %91 = vector.shape_cast %90 : vector<32xf32> to vector<32x1xf32>
    %cst_48 = arith.constant 1.600000e+01 : f32
    %92 = vector.broadcast %cst_48 : f32 to vector<32x1xf32>
    %93 = arith.divf %91, %92 : vector<32x1xf32>
    %94 = vector.broadcast %93 : vector<32x1xf32> to vector<32x16xf32>
    %95 = arith.subf %89, %94 : vector<32x16xf32>
    %96 = arith.mulf %95, %95 : vector<32x16xf32>
    %cst_49 = arith.constant dense<0.000000e+00> : vector<32xf32>
    %97 = vector.multi_reduction <add>, %96, %cst_49 [1] : vector<32x16xf32> to vector<32xf32>
    %98 = vector.shape_cast %97 : vector<32xf32> to vector<32x1xf32>
    %cst_50 = arith.constant 1.600000e+01 : f32
    %99 = vector.broadcast %cst_50 : f32 to vector<32x1xf32>
    %100 = arith.divf %98, %99 : vector<32x1xf32>
    %101 = vector.broadcast %93 : vector<32x1xf32> to vector<32x16xf32>
    %102 = arith.subf %89, %101 : vector<32x16xf32>
    %cst_51 = arith.constant 9.99999974E-6 : f32
    %103 = vector.broadcast %cst_51 : f32 to vector<32x1xf32>
    %104 = arith.addf %100, %103 : vector<32x1xf32>
    %105 = math.rsqrt %104 : vector<32x1xf32>
    %106 = vector.broadcast %105 : vector<32x1xf32> to vector<32x16xf32>
    %107 = arith.mulf %102, %106 : vector<32x16xf32>
    %c0_52 = arith.constant 0 : index
    %c0_53 = arith.constant 0 : index
    %108 = vector.load %arg5[%c0_52, %c0_53] : memref<32x1xf32, #tpu.memory_space<vmem>>, vector<32x1xf32>
    %109 = vector.broadcast %108 : vector<32x1xf32> to vector<32x16xf32>
    %110 = arith.mulf %107, %109 : vector<32x16xf32>
    %c0_54 = arith.constant 0 : index
    %c0_55 = arith.constant 0 : index
    %111 = vector.load %arg6[%c0_54, %c0_55] : memref<32x1xf32, #tpu.memory_space<vmem>>, vector<32x1xf32>
    %112 = vector.broadcast %111 : vector<32x1xf32> to vector<32x16xf32>
    %113 = arith.addf %110, %112 : vector<32x16xf32>
    %cst_56 = arith.constant 0.000000e+00 : f32
    %114 = vector.broadcast %cst_56 : f32 to vector<32x16xf32>
    %115 = arith.cmpf oge, %113, %114 : vector<32x16xf32>
    %cst_57 = arith.constant 0.00999999977 : f32
    %116 = vector.broadcast %cst_57 : f32 to vector<32x16xf32>
    %117 = arith.mulf %116, %113 : vector<32x16xf32>
    %118 = arith.select %115, %113, %117 : vector<32x16xi1>, vector<32x16xf32>
    %c0_58 = arith.constant 0 : index
    %c0_59 = arith.constant 0 : index
    %c0_60 = arith.constant 0 : index
    %119 = vector.load %arg8[%c0_58, %c0_59, %c0_60] : memref<1x32x16xf32, #tpu.memory_space<vmem>>, vector<1x32x16xf32>
    %120 = vector.shape_cast %119 : vector<1x32x16xf32> to vector<32x16xf32>
    %121 = vector.shape_cast %118 : vector<32x16xf32> to vector<1x32x16xf32>
    tpu.vector_store %arg8[%c0_58, %c0_59, %c0_60], %121 {strides = array<i32>} : memref<1x32x16xf32, #tpu.memory_space<vmem>>, vector<1x32x16xf32>,
    return
  }
  func.func @transform_0(%arg0: i32) -> (i32, i32) {
    %c0_i32 = arith.constant 0 : i32
    %c0_i32_0 = arith.constant 0 : i32
    %c0_i32_1 = arith.constant 0 : i32
    return %c0_i32, %c0_i32_0 : i32, i32
  }
  func.func @transform_1(%arg0: i32) -> (i32, i32) {
    %c0_i32 = arith.constant 0 : i32
    %c0_i32_0 = arith.constant 0 : i32
    %c0_i32_1 = arith.constant 0 : i32
    return %c0_i32, %c0_i32_0 : i32, i32
  }
  func.func @transform_2(%arg0: i32) -> (i32, i32) {
    %c0_i32 = arith.constant 0 : i32
    %c0_i32_0 = arith.constant 0 : i32
    %c0_i32_1 = arith.constant 0 : i32
    return %c0_i32, %c0_i32_0 : i32, i32
  }
  func.func @transform_3(%arg0: i32) -> (i32, i32) {
    %c0_i32 = arith.constant 0 : i32
    %c0_i32_0 = arith.constant 0 : i32
    %c0_i32_1 = arith.constant 0 : i32
    return %c0_i32, %c0_i32_0 : i32, i32
  }
  func.func @transform_4(%arg0: i32) -> (i32, i32) {
    %c0_i32 = arith.constant 0 : i32
    %c0_i32_0 = arith.constant 0 : i32
    %c0_i32_1 = arith.constant 0 : i32
    return %c0_i32, %c0_i32_0 : i32, i32
  }
  func.func @transform_5(%arg0: i32) -> (i32, i32) {
    %c0_i32 = arith.constant 0 : i32
    %c0_i32_0 = arith.constant 0 : i32
    %c0_i32_1 = arith.constant 0 : i32
    return %c0_i32, %c0_i32_0 : i32, i32
  }
  func.func @transform_6(%arg0: i32) -> (i32, i32, i32) {
    %c0_i32 = arith.constant 0 : i32
    %c0_i32_0 = arith.constant 0 : i32
    %c0_i32_1 = arith.constant 0 : i32
    return %arg0, %c0_i32, %c0_i32_0 : i32, i32, i32
  }
  func.func @transform_7(%arg0: i32) -> (i32, i32, i32) {
    %c0_i32 = arith.constant 0 : i32
    %c0_i32_0 = arith.constant 0 : i32
    %c0_i32_1 = arith.constant 0 : i32
    return %arg0, %c0_i32, %c0_i32_0 : i32, i32, i32
  }
}

module attributes {stable_mosaic.version = 11 : i64} {
  func.func @_matmul_kernel(%arg0: i32, %arg1: memref<64x32xbf16, #tpu.memory_space<vmem>>, %arg2: memref<1x32x16xbf16, #tpu.memory_space<vmem>>, %arg3: memref<1x64x16xf32, #tpu.memory_space<vmem>>) attributes {dimension_semantics = [#tpu.dimension_semantics<parallel>], iteration_bounds = array<i64: 2>, scalar_prefetch = 0 : i64, scratch_operands = 0 : i64, tpu.core_type = #tpu.core_type<tc>, window_params = [{pipeline_mode = #tpu.pipeline_mode<synchronous>, transform_indices = @transform_0, window_bounds = array<i64: 64, 32>}, {transform_indices = @transform_1, window_bounds = array<i64: 1, 32, 16>}, {transform_indices = @transform_2, window_bounds = array<i64: 1, 64, 16>}]} {
    %c0 = arith.constant 0 : index
    %c0_0 = arith.constant 0 : index
    %0 = vector.load %arg1[%c0, %c0_0] : memref<64x32xbf16, #tpu.memory_space<vmem>>, vector<64x32xbf16>
    %c0_1 = arith.constant 0 : index
    %c0_2 = arith.constant 0 : index
    %c0_3 = arith.constant 0 : index
    %1 = vector.load %arg2[%c0_1, %c0_2, %c0_3] : memref<1x32x16xbf16, #tpu.memory_space<vmem>>, vector<1x32x16xbf16>
    %2 = vector.shape_cast %1 : vector<1x32x16xbf16> to vector<32x16xbf16>
    %cst = arith.constant dense<0.000000e+00> : vector<64x16xf32>
    %3 = tpu.matmul %0, %2, %cst {dimension_numbers = #tpu.dot_dimension_numbers<[1], [0], [0], [1], [0, 0, 1, 1], [], []>} : vector<64x32xbf16>, vector<32x16xbf16>, vector<64x16xf32> -> vector<64x16xf32>
    %c0_4 = arith.constant 0 : index
    %c0_5 = arith.constant 0 : index
    %c0_6 = arith.constant 0 : index
    %4 = vector.load %arg3[%c0_4, %c0_5, %c0_6] : memref<1x64x16xf32, #tpu.memory_space<vmem>>, vector<1x64x16xf32>
    %5 = vector.shape_cast %4 : vector<1x64x16xf32> to vector<64x16xf32>
    %6 = vector.shape_cast %3 : vector<64x16xf32> to vector<1x64x16xf32>
    tpu.vector_store %arg3[%c0_4, %c0_5, %c0_6], %6 {strides = array<i32>} : memref<1x64x16xf32, #tpu.memory_space<vmem>>, vector<1x64x16xf32>,
    return
  }
  func.func @transform_0(%arg0: i32) -> (i32, i32) {
    %c0_i32 = arith.constant 0 : i32
    %c0_i32_0 = arith.constant 0 : i32
    %c0_i32_1 = arith.constant 0 : i32
    return %c0_i32, %c0_i32_0 : i32, i32
  }
  func.func @transform_1(%arg0: i32) -> (i32, i32, i32) {
    %c0_i32 = arith.constant 0 : i32
    %c0_i32_0 = arith.constant 0 : i32
    %c0_i32_1 = arith.constant 0 : i32
    return %arg0, %c0_i32, %c0_i32_0 : i32, i32, i32
  }
  func.func @transform_2(%arg0: i32) -> (i32, i32, i32) {
    %c0_i32 = arith.constant 0 : i32
    %c0_i32_0 = arith.constant 0 : i32
    %c0_i32_1 = arith.constant 0 : i32
    return %arg0, %c0_i32, %c0_i32_0 : i32, i32, i32
  }
}

module attributes {stable_mosaic.version = 11 : i64} {
  func.func @_matmul_kernel(%arg0: i32, %arg1: memref<32x16xbf16, #tpu.memory_space<vmem>>, %arg2: memref<1x16x64xbf16, #tpu.memory_space<vmem>>, %arg3: memref<1x32x64xf32, #tpu.memory_space<vmem>>) attributes {dimension_semantics = [#tpu.dimension_semantics<parallel>], iteration_bounds = array<i64: 2>, scalar_prefetch = 0 : i64, scratch_operands = 0 : i64, tpu.core_type = #tpu.core_type<tc>, window_params = [{pipeline_mode = #tpu.pipeline_mode<synchronous>, transform_indices = @transform_0, window_bounds = array<i64: 32, 16>}, {transform_indices = @transform_1, window_bounds = array<i64: 1, 16, 64>}, {transform_indices = @transform_2, window_bounds = array<i64: 1, 32, 64>}]} {
    %c0 = arith.constant 0 : index
    %c0_0 = arith.constant 0 : index
    %0 = vector.load %arg1[%c0, %c0_0] : memref<32x16xbf16, #tpu.memory_space<vmem>>, vector<32x16xbf16>
    %c0_1 = arith.constant 0 : index
    %c0_2 = arith.constant 0 : index
    %c0_3 = arith.constant 0 : index
    %1 = vector.load %arg2[%c0_1, %c0_2, %c0_3] : memref<1x16x64xbf16, #tpu.memory_space<vmem>>, vector<1x16x64xbf16>
    %2 = vector.shape_cast %1 : vector<1x16x64xbf16> to vector<16x64xbf16>
    %cst = arith.constant dense<0.000000e+00> : vector<32x64xf32>
    %3 = tpu.matmul %0, %2, %cst {dimension_numbers = #tpu.dot_dimension_numbers<[1], [0], [0], [1], [0, 0, 1, 1], [], []>} : vector<32x16xbf16>, vector<16x64xbf16>, vector<32x64xf32> -> vector<32x64xf32>
    %c0_4 = arith.constant 0 : index
    %c0_5 = arith.constant 0 : index
    %c0_6 = arith.constant 0 : index
    %4 = vector.load %arg3[%c0_4, %c0_5, %c0_6] : memref<1x32x64xf32, #tpu.memory_space<vmem>>, vector<1x32x64xf32>
    %5 = vector.shape_cast %4 : vector<1x32x64xf32> to vector<32x64xf32>
    %6 = vector.shape_cast %3 : vector<32x64xf32> to vector<1x32x64xf32>
    tpu.vector_store %arg3[%c0_4, %c0_5, %c0_6], %6 {strides = array<i32>} : memref<1x32x64xf32, #tpu.memory_space<vmem>>, vector<1x32x64xf32>,
    return
  }
  func.func @transform_0(%arg0: i32) -> (i32, i32) {
    %c0_i32 = arith.constant 0 : i32
    %c0_i32_0 = arith.constant 0 : i32
    %c0_i32_1 = arith.constant 0 : i32
    return %c0_i32, %c0_i32_0 : i32, i32
  }
  func.func @transform_1(%arg0: i32) -> (i32, i32, i32) {
    %c0_i32 = arith.constant 0 : i32
    %c0_i32_0 = arith.constant 0 : i32
    %c0_i32_1 = arith.constant 0 : i32
    return %arg0, %c0_i32, %c0_i32_0 : i32, i32, i32
  }
  func.func @transform_2(%arg0: i32) -> (i32, i32, i32) {
    %c0_i32 = arith.constant 0 : i32
    %c0_i32_0 = arith.constant 0 : i32
    %c0_i32_1 = arith.constant 0 : i32
    return %arg0, %c0_i32, %c0_i32_0 : i32, i32, i32
  }
}

module attributes {stable_mosaic.version = 11 : i64} {
  func.func @_double_conv_in_lrelu_kernel(%arg0: i32, %arg1: memref<16x288xbf16, #tpu.memory_space<vmem>>, %arg2: memref<16x1xf32, #tpu.memory_space<vmem>>, %arg3: memref<16x1xf32, #tpu.memory_space<vmem>>, %arg4: memref<16x144xbf16, #tpu.memory_space<vmem>>, %arg5: memref<16x1xf32, #tpu.memory_space<vmem>>, %arg6: memref<16x1xf32, #tpu.memory_space<vmem>>, %arg7: memref<1x288x64xbf16, #tpu.memory_space<vmem>>, %arg8: memref<1x16x64xf32, #tpu.memory_space<vmem>>, %arg9: memref<16x82xf32, #tpu.memory_space<vmem>>) attributes {dimension_semantics = [#tpu.dimension_semantics<parallel>], iteration_bounds = array<i64: 2>, scalar_prefetch = 0 : i64, scratch_operands = 1 : i64, tpu.core_type = #tpu.core_type<tc>, window_params = [{pipeline_mode = #tpu.pipeline_mode<synchronous>, transform_indices = @transform_0, window_bounds = array<i64: 16, 288>}, {pipeline_mode = #tpu.pipeline_mode<synchronous>, transform_indices = @transform_1, window_bounds = array<i64: 16, 1>}, {pipeline_mode = #tpu.pipeline_mode<synchronous>, transform_indices = @transform_2, window_bounds = array<i64: 16, 1>}, {pipeline_mode = #tpu.pipeline_mode<synchronous>, transform_indices = @transform_3, window_bounds = array<i64: 16, 144>}, {pipeline_mode = #tpu.pipeline_mode<synchronous>, transform_indices = @transform_4, window_bounds = array<i64: 16, 1>}, {pipeline_mode = #tpu.pipeline_mode<synchronous>, transform_indices = @transform_5, window_bounds = array<i64: 16, 1>}, {transform_indices = @transform_6, window_bounds = array<i64: 1, 288, 64>}, {transform_indices = @transform_7, window_bounds = array<i64: 1, 16, 64>}]} {
    %c0 = arith.constant 0 : index
    %c0_0 = arith.constant 0 : index
    %0 = vector.load %arg1[%c0, %c0_0] : memref<16x288xbf16, #tpu.memory_space<vmem>>, vector<16x288xbf16>
    %c0_1 = arith.constant 0 : index
    %c0_2 = arith.constant 0 : index
    %c0_3 = arith.constant 0 : index
    %1 = vector.load %arg7[%c0_1, %c0_2, %c0_3] : memref<1x288x64xbf16, #tpu.memory_space<vmem>>, vector<1x288x64xbf16>
    %2 = vector.shape_cast %1 : vector<1x288x64xbf16> to vector<288x64xbf16>
    %cst = arith.constant dense<0.000000e+00> : vector<16x64xf32>
    %3 = tpu.matmul %0, %2, %cst {dimension_numbers = #tpu.dot_dimension_numbers<[1], [0], [0], [1], [0, 0, 1, 1], [], []>} : vector<16x288xbf16>, vector<288x64xbf16>, vector<16x64xf32> -> vector<16x64xf32>
    %cst_4 = arith.constant dense<0.000000e+00> : vector<16xf32>
    %4 = vector.multi_reduction <add>, %3, %cst_4 [1] : vector<16x64xf32> to vector<16xf32>
    %5 = vector.shape_cast %4 : vector<16xf32> to vector<16x1xf32>
    %cst_5 = arith.constant 6.400000e+01 : f32
    %6 = vector.broadcast %cst_5 : f32 to vector<16x1xf32>
    %7 = arith.divf %5, %6 : vector<16x1xf32>
    %8 = vector.broadcast %7 : vector<16x1xf32> to vector<16x64xf32>
    %9 = arith.subf %3, %8 : vector<16x64xf32>
    %10 = arith.mulf %9, %9 : vector<16x64xf32>
    %cst_6 = arith.constant dense<0.000000e+00> : vector<16xf32>
    %11 = vector.multi_reduction <add>, %10, %cst_6 [1] : vector<16x64xf32> to vector<16xf32>
    %12 = vector.shape_cast %11 : vector<16xf32> to vector<16x1xf32>
    %cst_7 = arith.constant 6.400000e+01 : f32
    %13 = vector.broadcast %cst_7 : f32 to vector<16x1xf32>
    %14 = arith.divf %12, %13 : vector<16x1xf32>
    %15 = vector.broadcast %7 : vector<16x1xf32> to vector<16x64xf32>
    %16 = arith.subf %3, %15 : vector<16x64xf32>
    %cst_8 = arith.constant 9.99999974E-6 : f32
    %17 = vector.broadcast %cst_8 : f32 to vector<16x1xf32>
    %18 = arith.addf %14, %17 : vector<16x1xf32>
    %19 = math.rsqrt %18 : vector<16x1xf32>
    %20 = vector.broadcast %19 : vector<16x1xf32> to vector<16x64xf32>
    %21 = arith.mulf %16, %20 : vector<16x64xf32>
    %c0_9 = arith.constant 0 : index
    %c0_10 = arith.constant 0 : index
    %22 = vector.load %arg2[%c0_9, %c0_10] : memref<16x1xf32, #tpu.memory_space<vmem>>, vector<16x1xf32>
    %23 = vector.broadcast %22 : vector<16x1xf32> to vector<16x64xf32>
    %24 = arith.mulf %21, %23 : vector<16x64xf32>
    %c0_11 = arith.constant 0 : index
    %c0_12 = arith.constant 0 : index
    %25 = vector.load %arg3[%c0_11, %c0_12] : memref<16x1xf32, #tpu.memory_space<vmem>>, vector<16x1xf32>
    %26 = vector.broadcast %25 : vector<16x1xf32> to vector<16x64xf32>
    %27 = arith.addf %24, %26 : vector<16x64xf32>
    %cst_13 = arith.constant 0.000000e+00 : f32
    %28 = vector.broadcast %cst_13 : f32 to vector<16x64xf32>
    %29 = arith.cmpf oge, %27, %28 : vector<16x64xf32>
    %cst_14 = arith.constant 0.00999999977 : f32
    %30 = vector.broadcast %cst_14 : f32 to vector<16x64xf32>
    %31 = arith.mulf %30, %27 : vector<16x64xf32>
    %32 = arith.select %29, %27, %31 : vector<16x64xi1>, vector<16x64xf32>
    %cst_15 = arith.constant 0.000000e+00 : f32
    %33 = vector.broadcast %cst_15 : f32 to vector<16x82xf32>
    %c0_16 = arith.constant 0 : index
    %c0_17 = arith.constant 0 : index
    %34 = vector.load %arg9[%c0_16, %c0_17] : memref<16x82xf32, #tpu.memory_space<vmem>>, vector<16x82xf32>
    tpu.vector_store %arg9[%c0_16, %c0_17], %33 {strides = array<i32>} : memref<16x82xf32, #tpu.memory_space<vmem>>, vector<16x82xf32>,
    %c0_18 = arith.constant 0 : index
    %c9 = arith.constant 9 : index
    %35 = vector.load %arg9[%c0_18, %c9] : memref<16x82xf32, #tpu.memory_space<vmem>>, vector<16x64xf32>
    tpu.vector_store %arg9[%c0_18, %c9], %32 {strides = array<i32>} : memref<16x82xf32, #tpu.memory_space<vmem>>, vector<16x64xf32>,
    %36 = tpu.iota {dimensions = array<i32: 1>} : vector<16x64xi32>
    %c8_i32 = arith.constant 8 : i32
    %c0_i32 = arith.constant 0 : i32
    %37 = arith.cmpi eq, %c8_i32, %c0_i32 : i32
    %c1_i32 = arith.constant 1 : i32
    %38 = arith.select %37, %c1_i32, %c8_i32 : i32
    %39 = vector.broadcast %38 : i32 to vector<16x64xi32>
    %40 = arith.remsi %36, %39 : vector<16x64xi32>
    %c0_i32_19 = arith.constant 0 : i32
    %41 = vector.broadcast %c0_i32_19 : i32 to vector<16x64xi32>
    %42 = arith.cmpi ne, %40, %41 : vector<16x64xi32>
    %c0_i32_20 = arith.constant 0 : i32
    %43 = vector.broadcast %c0_i32_20 : i32 to vector<16x64xi32>
    %44 = arith.cmpi slt, %40, %43 : vector<16x64xi32>
    %c0_i32_21 = arith.constant 0 : i32
    %45 = arith.cmpi slt, %38, %c0_i32_21 : i32
    %46 = vector.broadcast %45 : i1 to vector<16x64xi1>
    %47 = vector.broadcast %46 : vector<16x64xi1> to vector<16x64xi1>
    %48 = arith.xori %44, %47 : vector<16x64xi1>
    %49 = arith.andi %48, %42 : vector<16x64xi1>
    %50 = vector.broadcast %38 : i32 to vector<16x64xi32>
    %51 = arith.addi %40, %50 : vector<16x64xi32>
    %52 = arith.select %49, %51, %40 : vector<16x64xi1>, vector<16x64xi32>
    %c0_22 = arith.constant 0 : index
    %c0_23 = arith.constant 0 : index
    %53 = vector.load %arg9[%c0_22, %c0_23] : memref<16x82xf32, #tpu.memory_space<vmem>>, vector<16x64xf32>
    %c1_i32_24 = arith.constant 1 : i32
    %54 = vector.broadcast %c1_i32_24 : i32 to vector<16x64xi32>
    %55 = arith.cmpi sge, %52, %54 : vector<16x64xi32>
    %cst_25 = arith.constant 0.000000e+00 : f32
    %56 = vector.broadcast %cst_25 : f32 to vector<16x64xf32>
    %57 = arith.select %55, %53, %56 : vector<16x64xi1>, vector<16x64xf32>
    %c0_26 = arith.constant 0 : index
    %c1 = arith.constant 1 : index
    %58 = vector.load %arg9[%c0_26, %c1] : memref<16x82xf32, #tpu.memory_space<vmem>>, vector<16x64xf32>
    %c0_27 = arith.constant 0 : index
    %c2 = arith.constant 2 : index
    %59 = vector.load %arg9[%c0_27, %c2] : memref<16x82xf32, #tpu.memory_space<vmem>>, vector<16x64xf32>
    %c6_i32 = arith.constant 6 : i32
    %60 = vector.broadcast %c6_i32 : i32 to vector<16x64xi32>
    %61 = arith.cmpi sle, %52, %60 : vector<16x64xi32>
    %cst_28 = arith.constant 0.000000e+00 : f32
    %62 = vector.broadcast %cst_28 : f32 to vector<16x64xf32>
    %63 = arith.select %61, %59, %62 : vector<16x64xi1>, vector<16x64xf32>
    %c0_29 = arith.constant 0 : index
    %c8 = arith.constant 8 : index
    %64 = vector.load %arg9[%c0_29, %c8] : memref<16x82xf32, #tpu.memory_space<vmem>>, vector<16x64xf32>
    %c1_i32_30 = arith.constant 1 : i32
    %65 = vector.broadcast %c1_i32_30 : i32 to vector<16x64xi32>
    %66 = arith.cmpi sge, %52, %65 : vector<16x64xi32>
    %cst_31 = arith.constant 0.000000e+00 : f32
    %67 = vector.broadcast %cst_31 : f32 to vector<16x64xf32>
    %68 = arith.select %66, %64, %67 : vector<16x64xi1>, vector<16x64xf32>
    %c0_32 = arith.constant 0 : index
    %c9_33 = arith.constant 9 : index
    %69 = vector.load %arg9[%c0_32, %c9_33] : memref<16x82xf32, #tpu.memory_space<vmem>>, vector<16x64xf32>
    %c0_34 = arith.constant 0 : index
    %c10 = arith.constant 10 : index
    %70 = vector.load %arg9[%c0_34, %c10] : memref<16x82xf32, #tpu.memory_space<vmem>>, vector<16x64xf32>
    %c6_i32_35 = arith.constant 6 : i32
    %71 = vector.broadcast %c6_i32_35 : i32 to vector<16x64xi32>
    %72 = arith.cmpi sle, %52, %71 : vector<16x64xi32>
    %cst_36 = arith.constant 0.000000e+00 : f32
    %73 = vector.broadcast %cst_36 : f32 to vector<16x64xf32>
    %74 = arith.select %72, %70, %73 : vector<16x64xi1>, vector<16x64xf32>
    %c0_37 = arith.constant 0 : index
    %c16 = arith.constant 16 : index
    %75 = vector.load %arg9[%c0_37, %c16] : memref<16x82xf32, #tpu.memory_space<vmem>>, vector<16x64xf32>
    %c1_i32_38 = arith.constant 1 : i32
    %76 = vector.broadcast %c1_i32_38 : i32 to vector<16x64xi32>
    %77 = arith.cmpi sge, %52, %76 : vector<16x64xi32>
    %cst_39 = arith.constant 0.000000e+00 : f32
    %78 = vector.broadcast %cst_39 : f32 to vector<16x64xf32>
    %79 = arith.select %77, %75, %78 : vector<16x64xi1>, vector<16x64xf32>
    %c0_40 = arith.constant 0 : index
    %c17 = arith.constant 17 : index
    %80 = vector.load %arg9[%c0_40, %c17] : memref<16x82xf32, #tpu.memory_space<vmem>>, vector<16x64xf32>
    %c0_41 = arith.constant 0 : index
    %c18 = arith.constant 18 : index
    %81 = vector.load %arg9[%c0_41, %c18] : memref<16x82xf32, #tpu.memory_space<vmem>>, vector<16x64xf32>
    %c6_i32_42 = arith.constant 6 : i32
    %82 = vector.broadcast %c6_i32_42 : i32 to vector<16x64xi32>
    %83 = arith.cmpi sle, %52, %82 : vector<16x64xi32>
    %cst_43 = arith.constant 0.000000e+00 : f32
    %84 = vector.broadcast %cst_43 : f32 to vector<16x64xf32>
    %85 = arith.select %83, %81, %84 : vector<16x64xi1>, vector<16x64xf32>
    %86 = tpu.concatenate %57, %58, %63, %68, %69, %74, %79, %80, %85 in 0 : vector<16x64xf32>, vector<16x64xf32>, vector<16x64xf32>, vector<16x64xf32>, vector<16x64xf32>, vector<16x64xf32>, vector<16x64xf32>, vector<16x64xf32>, vector<16x64xf32> -> vector<144x64xf32>
    %87 = arith.truncf %86 : vector<144x64xf32> to vector<144x64xbf16>
    %c0_44 = arith.constant 0 : index
    %c0_45 = arith.constant 0 : index
    %88 = vector.load %arg4[%c0_44, %c0_45] : memref<16x144xbf16, #tpu.memory_space<vmem>>, vector<16x144xbf16>
    %cst_46 = arith.constant dense<0.000000e+00> : vector<16x64xf32>
    %89 = tpu.matmul %88, %87, %cst_46 {dimension_numbers = #tpu.dot_dimension_numbers<[1], [0], [0], [1], [0, 0, 1, 1], [], []>} : vector<16x144xbf16>, vector<144x64xbf16>, vector<16x64xf32> -> vector<16x64xf32>
    %cst_47 = arith.constant dense<0.000000e+00> : vector<16xf32>
    %90 = vector.multi_reduction <add>, %89, %cst_47 [1] : vector<16x64xf32> to vector<16xf32>
    %91 = vector.shape_cast %90 : vector<16xf32> to vector<16x1xf32>
    %cst_48 = arith.constant 6.400000e+01 : f32
    %92 = vector.broadcast %cst_48 : f32 to vector<16x1xf32>
    %93 = arith.divf %91, %92 : vector<16x1xf32>
    %94 = vector.broadcast %93 : vector<16x1xf32> to vector<16x64xf32>
    %95 = arith.subf %89, %94 : vector<16x64xf32>
    %96 = arith.mulf %95, %95 : vector<16x64xf32>
    %cst_49 = arith.constant dense<0.000000e+00> : vector<16xf32>
    %97 = vector.multi_reduction <add>, %96, %cst_49 [1] : vector<16x64xf32> to vector<16xf32>
    %98 = vector.shape_cast %97 : vector<16xf32> to vector<16x1xf32>
    %cst_50 = arith.constant 6.400000e+01 : f32
    %99 = vector.broadcast %cst_50 : f32 to vector<16x1xf32>
    %100 = arith.divf %98, %99 : vector<16x1xf32>
    %101 = vector.broadcast %93 : vector<16x1xf32> to vector<16x64xf32>
    %102 = arith.subf %89, %101 : vector<16x64xf32>
    %cst_51 = arith.constant 9.99999974E-6 : f32
    %103 = vector.broadcast %cst_51 : f32 to vector<16x1xf32>
    %104 = arith.addf %100, %103 : vector<16x1xf32>
    %105 = math.rsqrt %104 : vector<16x1xf32>
    %106 = vector.broadcast %105 : vector<16x1xf32> to vector<16x64xf32>
    %107 = arith.mulf %102, %106 : vector<16x64xf32>
    %c0_52 = arith.constant 0 : index
    %c0_53 = arith.constant 0 : index
    %108 = vector.load %arg5[%c0_52, %c0_53] : memref<16x1xf32, #tpu.memory_space<vmem>>, vector<16x1xf32>
    %109 = vector.broadcast %108 : vector<16x1xf32> to vector<16x64xf32>
    %110 = arith.mulf %107, %109 : vector<16x64xf32>
    %c0_54 = arith.constant 0 : index
    %c0_55 = arith.constant 0 : index
    %111 = vector.load %arg6[%c0_54, %c0_55] : memref<16x1xf32, #tpu.memory_space<vmem>>, vector<16x1xf32>
    %112 = vector.broadcast %111 : vector<16x1xf32> to vector<16x64xf32>
    %113 = arith.addf %110, %112 : vector<16x64xf32>
    %cst_56 = arith.constant 0.000000e+00 : f32
    %114 = vector.broadcast %cst_56 : f32 to vector<16x64xf32>
    %115 = arith.cmpf oge, %113, %114 : vector<16x64xf32>
    %cst_57 = arith.constant 0.00999999977 : f32
    %116 = vector.broadcast %cst_57 : f32 to vector<16x64xf32>
    %117 = arith.mulf %116, %113 : vector<16x64xf32>
    %118 = arith.select %115, %113, %117 : vector<16x64xi1>, vector<16x64xf32>
    %c0_58 = arith.constant 0 : index
    %c0_59 = arith.constant 0 : index
    %c0_60 = arith.constant 0 : index
    %119 = vector.load %arg8[%c0_58, %c0_59, %c0_60] : memref<1x16x64xf32, #tpu.memory_space<vmem>>, vector<1x16x64xf32>
    %120 = vector.shape_cast %119 : vector<1x16x64xf32> to vector<16x64xf32>
    %121 = vector.shape_cast %118 : vector<16x64xf32> to vector<1x16x64xf32>
    tpu.vector_store %arg8[%c0_58, %c0_59, %c0_60], %121 {strides = array<i32>} : memref<1x16x64xf32, #tpu.memory_space<vmem>>, vector<1x16x64xf32>,
    return
  }
  func.func @transform_0(%arg0: i32) -> (i32, i32) {
    %c0_i32 = arith.constant 0 : i32
    %c0_i32_0 = arith.constant 0 : i32
    %c0_i32_1 = arith.constant 0 : i32
    return %c0_i32, %c0_i32_0 : i32, i32
  }
  func.func @transform_1(%arg0: i32) -> (i32, i32) {
    %c0_i32 = arith.constant 0 : i32
    %c0_i32_0 = arith.constant 0 : i32
    %c0_i32_1 = arith.constant 0 : i32
    return %c0_i32, %c0_i32_0 : i32, i32
  }
  func.func @transform_2(%arg0: i32) -> (i32, i32) {
    %c0_i32 = arith.constant 0 : i32
    %c0_i32_0 = arith.constant 0 : i32
    %c0_i32_1 = arith.constant 0 : i32
    return %c0_i32, %c0_i32_0 : i32, i32
  }
  func.func @transform_3(%arg0: i32) -> (i32, i32) {
    %c0_i32 = arith.constant 0 : i32
    %c0_i32_0 = arith.constant 0 : i32
    %c0_i32_1 = arith.constant 0 : i32
    return %c0_i32, %c0_i32_0 : i32, i32
  }
  func.func @transform_4(%arg0: i32) -> (i32, i32) {
    %c0_i32 = arith.constant 0 : i32
    %c0_i32_0 = arith.constant 0 : i32
    %c0_i32_1 = arith.constant 0 : i32
    return %c0_i32, %c0_i32_0 : i32, i32
  }
  func.func @transform_5(%arg0: i32) -> (i32, i32) {
    %c0_i32 = arith.constant 0 : i32
    %c0_i32_0 = arith.constant 0 : i32
    %c0_i32_1 = arith.constant 0 : i32
    return %c0_i32, %c0_i32_0 : i32, i32
  }
  func.func @transform_6(%arg0: i32) -> (i32, i32, i32) {
    %c0_i32 = arith.constant 0 : i32
    %c0_i32_0 = arith.constant 0 : i32
    %c0_i32_1 = arith.constant 0 : i32
    return %arg0, %c0_i32, %c0_i32_0 : i32, i32, i32
  }
  func.func @transform_7(%arg0: i32) -> (i32, i32, i32) {
    %c0_i32 = arith.constant 0 : i32
    %c0_i32_0 = arith.constant 0 : i32
    %c0_i32_1 = arith.constant 0 : i32
    return %arg0, %c0_i32, %c0_i32_0 : i32, i32, i32
  }
}

module attributes {stable_mosaic.version = 11 : i64} {
  func.func @_double_conv_in_lrelu_kernel(%arg0: i32, %arg1: memref<8x144xbf16, #tpu.memory_space<vmem>>, %arg2: memref<8x1xf32, #tpu.memory_space<vmem>>, %arg3: memref<8x1xf32, #tpu.memory_space<vmem>>, %arg4: memref<8x72xbf16, #tpu.memory_space<vmem>>, %arg5: memref<8x1xf32, #tpu.memory_space<vmem>>, %arg6: memref<8x1xf32, #tpu.memory_space<vmem>>, %arg7: memref<1x144x256xbf16, #tpu.memory_space<vmem>>, %arg8: memref<1x8x256xf32, #tpu.memory_space<vmem>>, %arg9: memref<8x290xf32, #tpu.memory_space<vmem>>) attributes {dimension_semantics = [#tpu.dimension_semantics<parallel>], iteration_bounds = array<i64: 2>, scalar_prefetch = 0 : i64, scratch_operands = 1 : i64, tpu.core_type = #tpu.core_type<tc>, window_params = [{pipeline_mode = #tpu.pipeline_mode<synchronous>, transform_indices = @transform_0, window_bounds = array<i64: 8, 144>}, {pipeline_mode = #tpu.pipeline_mode<synchronous>, transform_indices = @transform_1, window_bounds = array<i64: 8, 1>}, {pipeline_mode = #tpu.pipeline_mode<synchronous>, transform_indices = @transform_2, window_bounds = array<i64: 8, 1>}, {pipeline_mode = #tpu.pipeline_mode<synchronous>, transform_indices = @transform_3, window_bounds = array<i64: 8, 72>}, {pipeline_mode = #tpu.pipeline_mode<synchronous>, transform_indices = @transform_4, window_bounds = array<i64: 8, 1>}, {pipeline_mode = #tpu.pipeline_mode<synchronous>, transform_indices = @transform_5, window_bounds = array<i64: 8, 1>}, {transform_indices = @transform_6, window_bounds = array<i64: 1, 144, 256>}, {transform_indices = @transform_7, window_bounds = array<i64: 1, 8, 256>}]} {
    %c0 = arith.constant 0 : index
    %c0_0 = arith.constant 0 : index
    %0 = vector.load %arg1[%c0, %c0_0] : memref<8x144xbf16, #tpu.memory_space<vmem>>, vector<8x144xbf16>
    %c0_1 = arith.constant 0 : index
    %c0_2 = arith.constant 0 : index
    %c0_3 = arith.constant 0 : index
    %1 = vector.load %arg7[%c0_1, %c0_2, %c0_3] : memref<1x144x256xbf16, #tpu.memory_space<vmem>>, vector<1x144x256xbf16>
    %2 = vector.shape_cast %1 : vector<1x144x256xbf16> to vector<144x256xbf16>
    %cst = arith.constant dense<0.000000e+00> : vector<8x256xf32>
    %3 = tpu.matmul %0, %2, %cst {dimension_numbers = #tpu.dot_dimension_numbers<[1], [0], [0], [1], [0, 0, 1, 1], [], []>} : vector<8x144xbf16>, vector<144x256xbf16>, vector<8x256xf32> -> vector<8x256xf32>
    %cst_4 = arith.constant dense<0.000000e+00> : vector<8xf32>
    %4 = vector.multi_reduction <add>, %3, %cst_4 [1] : vector<8x256xf32> to vector<8xf32>
    %5 = vector.shape_cast %4 : vector<8xf32> to vector<8x1xf32>
    %cst_5 = arith.constant 2.560000e+02 : f32
    %6 = vector.broadcast %cst_5 : f32 to vector<8x1xf32>
    %7 = arith.divf %5, %6 : vector<8x1xf32>
    %8 = vector.broadcast %7 : vector<8x1xf32> to vector<8x256xf32>
    %9 = arith.subf %3, %8 : vector<8x256xf32>
    %10 = arith.mulf %9, %9 : vector<8x256xf32>
    %cst_6 = arith.constant dense<0.000000e+00> : vector<8xf32>
    %11 = vector.multi_reduction <add>, %10, %cst_6 [1] : vector<8x256xf32> to vector<8xf32>
    %12 = vector.shape_cast %11 : vector<8xf32> to vector<8x1xf32>
    %cst_7 = arith.constant 2.560000e+02 : f32
    %13 = vector.broadcast %cst_7 : f32 to vector<8x1xf32>
    %14 = arith.divf %12, %13 : vector<8x1xf32>
    %15 = vector.broadcast %7 : vector<8x1xf32> to vector<8x256xf32>
    %16 = arith.subf %3, %15 : vector<8x256xf32>
    %cst_8 = arith.constant 9.99999974E-6 : f32
    %17 = vector.broadcast %cst_8 : f32 to vector<8x1xf32>
    %18 = arith.addf %14, %17 : vector<8x1xf32>
    %19 = math.rsqrt %18 : vector<8x1xf32>
    %20 = vector.broadcast %19 : vector<8x1xf32> to vector<8x256xf32>
    %21 = arith.mulf %16, %20 : vector<8x256xf32>
    %c0_9 = arith.constant 0 : index
    %c0_10 = arith.constant 0 : index
    %22 = vector.load %arg2[%c0_9, %c0_10] : memref<8x1xf32, #tpu.memory_space<vmem>>, vector<8x1xf32>
    %23 = vector.broadcast %22 : vector<8x1xf32> to vector<8x256xf32>
    %24 = arith.mulf %21, %23 : vector<8x256xf32>
    %c0_11 = arith.constant 0 : index
    %c0_12 = arith.constant 0 : index
    %25 = vector.load %arg3[%c0_11, %c0_12] : memref<8x1xf32, #tpu.memory_space<vmem>>, vector<8x1xf32>
    %26 = vector.broadcast %25 : vector<8x1xf32> to vector<8x256xf32>
    %27 = arith.addf %24, %26 : vector<8x256xf32>
    %cst_13 = arith.constant 0.000000e+00 : f32
    %28 = vector.broadcast %cst_13 : f32 to vector<8x256xf32>
    %29 = arith.cmpf oge, %27, %28 : vector<8x256xf32>
    %cst_14 = arith.constant 0.00999999977 : f32
    %30 = vector.broadcast %cst_14 : f32 to vector<8x256xf32>
    %31 = arith.mulf %30, %27 : vector<8x256xf32>
    %32 = arith.select %29, %27, %31 : vector<8x256xi1>, vector<8x256xf32>
    %cst_15 = arith.constant 0.000000e+00 : f32
    %33 = vector.broadcast %cst_15 : f32 to vector<8x290xf32>
    %c0_16 = arith.constant 0 : index
    %c0_17 = arith.constant 0 : index
    %34 = vector.load %arg9[%c0_16, %c0_17] : memref<8x290xf32, #tpu.memory_space<vmem>>, vector<8x290xf32>
    tpu.vector_store %arg9[%c0_16, %c0_17], %33 {strides = array<i32>} : memref<8x290xf32, #tpu.memory_space<vmem>>, vector<8x290xf32>,
    %c0_18 = arith.constant 0 : index
    %c17 = arith.constant 17 : index
    %35 = vector.load %arg9[%c0_18, %c17] : memref<8x290xf32, #tpu.memory_space<vmem>>, vector<8x256xf32>
    tpu.vector_store %arg9[%c0_18, %c17], %32 {strides = array<i32>} : memref<8x290xf32, #tpu.memory_space<vmem>>, vector<8x256xf32>,
    %36 = tpu.iota {dimensions = array<i32: 1>} : vector<8x256xi32>
    %c16_i32 = arith.constant 16 : i32
    %c0_i32 = arith.constant 0 : i32
    %37 = arith.cmpi eq, %c16_i32, %c0_i32 : i32
    %c1_i32 = arith.constant 1 : i32
    %38 = arith.select %37, %c1_i32, %c16_i32 : i32
    %39 = vector.broadcast %38 : i32 to vector<8x256xi32>
    %40 = arith.remsi %36, %39 : vector<8x256xi32>
    %c0_i32_19 = arith.constant 0 : i32
    %41 = vector.broadcast %c0_i32_19 : i32 to vector<8x256xi32>
    %42 = arith.cmpi ne, %40, %41 : vector<8x256xi32>
    %c0_i32_20 = arith.constant 0 : i32
    %43 = vector.broadcast %c0_i32_20 : i32 to vector<8x256xi32>
    %44 = arith.cmpi slt, %40, %43 : vector<8x256xi32>
    %c0_i32_21 = arith.constant 0 : i32
    %45 = arith.cmpi slt, %38, %c0_i32_21 : i32
    %46 = vector.broadcast %45 : i1 to vector<8x256xi1>
    %47 = vector.broadcast %46 : vector<8x256xi1> to vector<8x256xi1>
    %48 = arith.xori %44, %47 : vector<8x256xi1>
    %49 = arith.andi %48, %42 : vector<8x256xi1>
    %50 = vector.broadcast %38 : i32 to vector<8x256xi32>
    %51 = arith.addi %40, %50 : vector<8x256xi32>
    %52 = arith.select %49, %51, %40 : vector<8x256xi1>, vector<8x256xi32>
    %c0_22 = arith.constant 0 : index
    %c0_23 = arith.constant 0 : index
    %53 = vector.load %arg9[%c0_22, %c0_23] : memref<8x290xf32, #tpu.memory_space<vmem>>, vector<8x256xf32>
    %c1_i32_24 = arith.constant 1 : i32
    %54 = vector.broadcast %c1_i32_24 : i32 to vector<8x256xi32>
    %55 = arith.cmpi sge, %52, %54 : vector<8x256xi32>
    %cst_25 = arith.constant 0.000000e+00 : f32
    %56 = vector.broadcast %cst_25 : f32 to vector<8x256xf32>
    %57 = arith.select %55, %53, %56 : vector<8x256xi1>, vector<8x256xf32>
    %c0_26 = arith.constant 0 : index
    %c1 = arith.constant 1 : index
    %58 = vector.load %arg9[%c0_26, %c1] : memref<8x290xf32, #tpu.memory_space<vmem>>, vector<8x256xf32>
    %c0_27 = arith.constant 0 : index
    %c2 = arith.constant 2 : index
    %59 = vector.load %arg9[%c0_27, %c2] : memref<8x290xf32, #tpu.memory_space<vmem>>, vector<8x256xf32>
    %c14_i32 = arith.constant 14 : i32
    %60 = vector.broadcast %c14_i32 : i32 to vector<8x256xi32>
    %61 = arith.cmpi sle, %52, %60 : vector<8x256xi32>
    %cst_28 = arith.constant 0.000000e+00 : f32
    %62 = vector.broadcast %cst_28 : f32 to vector<8x256xf32>
    %63 = arith.select %61, %59, %62 : vector<8x256xi1>, vector<8x256xf32>
    %c0_29 = arith.constant 0 : index
    %c16 = arith.constant 16 : index
    %64 = vector.load %arg9[%c0_29, %c16] : memref<8x290xf32, #tpu.memory_space<vmem>>, vector<8x256xf32>
    %c1_i32_30 = arith.constant 1 : i32
    %65 = vector.broadcast %c1_i32_30 : i32 to vector<8x256xi32>
    %66 = arith.cmpi sge, %52, %65 : vector<8x256xi32>
    %cst_31 = arith.constant 0.000000e+00 : f32
    %67 = vector.broadcast %cst_31 : f32 to vector<8x256xf32>
    %68 = arith.select %66, %64, %67 : vector<8x256xi1>, vector<8x256xf32>
    %c0_32 = arith.constant 0 : index
    %c17_33 = arith.constant 17 : index
    %69 = vector.load %arg9[%c0_32, %c17_33] : memref<8x290xf32, #tpu.memory_space<vmem>>, vector<8x256xf32>
    %c0_34 = arith.constant 0 : index
    %c18 = arith.constant 18 : index
    %70 = vector.load %arg9[%c0_34, %c18] : memref<8x290xf32, #tpu.memory_space<vmem>>, vector<8x256xf32>
    %c14_i32_35 = arith.constant 14 : i32
    %71 = vector.broadcast %c14_i32_35 : i32 to vector<8x256xi32>
    %72 = arith.cmpi sle, %52, %71 : vector<8x256xi32>
    %cst_36 = arith.constant 0.000000e+00 : f32
    %73 = vector.broadcast %cst_36 : f32 to vector<8x256xf32>
    %74 = arith.select %72, %70, %73 : vector<8x256xi1>, vector<8x256xf32>
    %c0_37 = arith.constant 0 : index
    %c32 = arith.constant 32 : index
    %75 = vector.load %arg9[%c0_37, %c32] : memref<8x290xf32, #tpu.memory_space<vmem>>, vector<8x256xf32>
    %c1_i32_38 = arith.constant 1 : i32
    %76 = vector.broadcast %c1_i32_38 : i32 to vector<8x256xi32>
    %77 = arith.cmpi sge, %52, %76 : vector<8x256xi32>
    %cst_39 = arith.constant 0.000000e+00 : f32
    %78 = vector.broadcast %cst_39 : f32 to vector<8x256xf32>
    %79 = arith.select %77, %75, %78 : vector<8x256xi1>, vector<8x256xf32>
    %c0_40 = arith.constant 0 : index
    %c33 = arith.constant 33 : index
    %80 = vector.load %arg9[%c0_40, %c33] : memref<8x290xf32, #tpu.memory_space<vmem>>, vector<8x256xf32>
    %c0_41 = arith.constant 0 : index
    %c34 = arith.constant 34 : index
    %81 = vector.load %arg9[%c0_41, %c34] : memref<8x290xf32, #tpu.memory_space<vmem>>, vector<8x256xf32>
    %c14_i32_42 = arith.constant 14 : i32
    %82 = vector.broadcast %c14_i32_42 : i32 to vector<8x256xi32>
    %83 = arith.cmpi sle, %52, %82 : vector<8x256xi32>
    %cst_43 = arith.constant 0.000000e+00 : f32
    %84 = vector.broadcast %cst_43 : f32 to vector<8x256xf32>
    %85 = arith.select %83, %81, %84 : vector<8x256xi1>, vector<8x256xf32>
    %86 = tpu.concatenate %57, %58, %63, %68, %69, %74, %79, %80, %85 in 0 : vector<8x256xf32>, vector<8x256xf32>, vector<8x256xf32>, vector<8x256xf32>, vector<8x256xf32>, vector<8x256xf32>, vector<8x256xf32>, vector<8x256xf32>, vector<8x256xf32> -> vector<72x256xf32>
    %87 = arith.truncf %86 : vector<72x256xf32> to vector<72x256xbf16>
    %c0_44 = arith.constant 0 : index
    %c0_45 = arith.constant 0 : index
    %88 = vector.load %arg4[%c0_44, %c0_45] : memref<8x72xbf16, #tpu.memory_space<vmem>>, vector<8x72xbf16>
    %cst_46 = arith.constant dense<0.000000e+00> : vector<8x256xf32>
    %89 = tpu.matmul %88, %87, %cst_46 {dimension_numbers = #tpu.dot_dimension_numbers<[1], [0], [0], [1], [0, 0, 1, 1], [], []>} : vector<8x72xbf16>, vector<72x256xbf16>, vector<8x256xf32> -> vector<8x256xf32>
    %cst_47 = arith.constant dense<0.000000e+00> : vector<8xf32>
    %90 = vector.multi_reduction <add>, %89, %cst_47 [1] : vector<8x256xf32> to vector<8xf32>
    %91 = vector.shape_cast %90 : vector<8xf32> to vector<8x1xf32>
    %cst_48 = arith.constant 2.560000e+02 : f32
    %92 = vector.broadcast %cst_48 : f32 to vector<8x1xf32>
    %93 = arith.divf %91, %92 : vector<8x1xf32>
    %94 = vector.broadcast %93 : vector<8x1xf32> to vector<8x256xf32>
    %95 = arith.subf %89, %94 : vector<8x256xf32>
    %96 = arith.mulf %95, %95 : vector<8x256xf32>
    %cst_49 = arith.constant dense<0.000000e+00> : vector<8xf32>
    %97 = vector.multi_reduction <add>, %96, %cst_49 [1] : vector<8x256xf32> to vector<8xf32>
    %98 = vector.shape_cast %97 : vector<8xf32> to vector<8x1xf32>
    %cst_50 = arith.constant 2.560000e+02 : f32
    %99 = vector.broadcast %cst_50 : f32 to vector<8x1xf32>
    %100 = arith.divf %98, %99 : vector<8x1xf32>
    %101 = vector.broadcast %93 : vector<8x1xf32> to vector<8x256xf32>
    %102 = arith.subf %89, %101 : vector<8x256xf32>
    %cst_51 = arith.constant 9.99999974E-6 : f32
    %103 = vector.broadcast %cst_51 : f32 to vector<8x1xf32>
    %104 = arith.addf %100, %103 : vector<8x1xf32>
    %105 = math.rsqrt %104 : vector<8x1xf32>
    %106 = vector.broadcast %105 : vector<8x1xf32> to vector<8x256xf32>
    %107 = arith.mulf %102, %106 : vector<8x256xf32>
    %c0_52 = arith.constant 0 : index
    %c0_53 = arith.constant 0 : index
    %108 = vector.load %arg5[%c0_52, %c0_53] : memref<8x1xf32, #tpu.memory_space<vmem>>, vector<8x1xf32>
    %109 = vector.broadcast %108 : vector<8x1xf32> to vector<8x256xf32>
    %110 = arith.mulf %107, %109 : vector<8x256xf32>
    %c0_54 = arith.constant 0 : index
    %c0_55 = arith.constant 0 : index
    %111 = vector.load %arg6[%c0_54, %c0_55] : memref<8x1xf32, #tpu.memory_space<vmem>>, vector<8x1xf32>
    %112 = vector.broadcast %111 : vector<8x1xf32> to vector<8x256xf32>
    %113 = arith.addf %110, %112 : vector<8x256xf32>
    %cst_56 = arith.constant 0.000000e+00 : f32
    %114 = vector.broadcast %cst_56 : f32 to vector<8x256xf32>
    %115 = arith.cmpf oge, %113, %114 : vector<8x256xf32>
    %cst_57 = arith.constant 0.00999999977 : f32
    %116 = vector.broadcast %cst_57 : f32 to vector<8x256xf32>
    %117 = arith.mulf %116, %113 : vector<8x256xf32>
    %118 = arith.select %115, %113, %117 : vector<8x256xi1>, vector<8x256xf32>
    %c0_58 = arith.constant 0 : index
    %c0_59 = arith.constant 0 : index
    %c0_60 = arith.constant 0 : index
    %119 = vector.load %arg8[%c0_58, %c0_59, %c0_60] : memref<1x8x256xf32, #tpu.memory_space<vmem>>, vector<1x8x256xf32>
    %120 = vector.shape_cast %119 : vector<1x8x256xf32> to vector<8x256xf32>
    %121 = vector.shape_cast %118 : vector<8x256xf32> to vector<1x8x256xf32>
    tpu.vector_store %arg8[%c0_58, %c0_59, %c0_60], %121 {strides = array<i32>} : memref<1x8x256xf32, #tpu.memory_space<vmem>>, vector<1x8x256xf32>,
    return
  }
  func.func @transform_0(%arg0: i32) -> (i32, i32) {
    %c0_i32 = arith.constant 0 : i32
    %c0_i32_0 = arith.constant 0 : i32
    %c0_i32_1 = arith.constant 0 : i32
    return %c0_i32, %c0_i32_0 : i32, i32
  }
  func.func @transform_1(%arg0: i32) -> (i32, i32) {
    %c0_i32 = arith.constant 0 : i32
    %c0_i32_0 = arith.constant 0 : i32
    %c0_i32_1 = arith.constant 0 : i32
    return %c0_i32, %c0_i32_0 : i32, i32
  }
  func.func @transform_2(%arg0: i32) -> (i32, i32) {
    %c0_i32 = arith.constant 0 : i32
    %c0_i32_0 = arith.constant 0 : i32
    %c0_i32_1 = arith.constant 0 : i32
    return %c0_i32, %c0_i32_0 : i32, i32
  }
  func.func @transform_3(%arg0: i32) -> (i32, i32) {
    %c0_i32 = arith.constant 0 : i32
    %c0_i32_0 = arith.constant 0 : i32
    %c0_i32_1 = arith.constant 0 : i32
    return %c0_i32, %c0_i32_0 : i32, i32
  }
  func.func @transform_4(%arg0: i32) -> (i32, i32) {
    %c0_i32 = arith.constant 0 : i32
    %c0_i32_0 = arith.constant 0 : i32
    %c0_i32_1 = arith.constant 0 : i32
    return %c0_i32, %c0_i32_0 : i32, i32
  }
  func.func @transform_5(%arg0: i32) -> (i32, i32) {
    %c0_i32 = arith.constant 0 : i32
    %c0_i32_0 = arith.constant 0 : i32
    %c0_i32_1 = arith.constant 0 : i32
    return %c0_i32, %c0_i32_0 : i32, i32
  }
  func.func @transform_6(%arg0: i32) -> (i32, i32, i32) {
    %c0_i32 = arith.constant 0 : i32
    %c0_i32_0 = arith.constant 0 : i32
    %c0_i32_1 = arith.constant 0 : i32
    return %arg0, %c0_i32, %c0_i32_0 : i32, i32, i32
  }
  func.func @transform_7(%arg0: i32) -> (i32, i32, i32) {
    %c0_i32 = arith.constant 0 : i32
    %c0_i32_0 = arith.constant 0 : i32
    %c0_i32_1 = arith.constant 0 : i32
    return %arg0, %c0_i32, %c0_i32_0 : i32, i32, i32
  }
}

module attributes {stable_mosaic.version = 11 : i64} {
  func.func @_matmul_bias_kernel(%arg0: i32, %arg1: memref<3x8xbf16, #tpu.memory_space<vmem>>, %arg2: memref<1x8x256xbf16, #tpu.memory_space<vmem>>, %arg3: memref<3x1xf32, #tpu.memory_space<vmem>>, %arg4: memref<1x3x256xf32, #tpu.memory_space<vmem>>) attributes {dimension_semantics = [#tpu.dimension_semantics<parallel>], iteration_bounds = array<i64: 2>, scalar_prefetch = 0 : i64, scratch_operands = 0 : i64, tpu.core_type = #tpu.core_type<tc>, window_params = [{pipeline_mode = #tpu.pipeline_mode<synchronous>, transform_indices = @transform_0, window_bounds = array<i64: 3, 8>}, {transform_indices = @transform_1, window_bounds = array<i64: 1, 8, 256>}, {pipeline_mode = #tpu.pipeline_mode<synchronous>, transform_indices = @transform_2, window_bounds = array<i64: 3, 1>}, {transform_indices = @transform_3, window_bounds = array<i64: 1, 3, 256>}]} {
    %c0 = arith.constant 0 : index
    %c0_0 = arith.constant 0 : index
    %0 = vector.load %arg1[%c0, %c0_0] : memref<3x8xbf16, #tpu.memory_space<vmem>>, vector<3x8xbf16>
    %c0_1 = arith.constant 0 : index
    %c0_2 = arith.constant 0 : index
    %c0_3 = arith.constant 0 : index
    %1 = vector.load %arg2[%c0_1, %c0_2, %c0_3] : memref<1x8x256xbf16, #tpu.memory_space<vmem>>, vector<1x8x256xbf16>
    %2 = vector.shape_cast %1 : vector<1x8x256xbf16> to vector<8x256xbf16>
    %cst = arith.constant dense<0.000000e+00> : vector<3x256xf32>
    %3 = tpu.matmul %0, %2, %cst {dimension_numbers = #tpu.dot_dimension_numbers<[1], [0], [0], [1], [0, 0, 1, 1], [], []>} : vector<3x8xbf16>, vector<8x256xbf16>, vector<3x256xf32> -> vector<3x256xf32>
    %c0_4 = arith.constant 0 : index
    %c0_5 = arith.constant 0 : index
    %4 = vector.load %arg3[%c0_4, %c0_5] : memref<3x1xf32, #tpu.memory_space<vmem>>, vector<3x1xf32>
    %5 = vector.broadcast %4 : vector<3x1xf32> to vector<3x256xf32>
    %6 = arith.addf %3, %5 : vector<3x256xf32>
    %c0_6 = arith.constant 0 : index
    %c0_7 = arith.constant 0 : index
    %c0_8 = arith.constant 0 : index
    %7 = vector.load %arg4[%c0_6, %c0_7, %c0_8] : memref<1x3x256xf32, #tpu.memory_space<vmem>>, vector<1x3x256xf32>
    %8 = vector.shape_cast %7 : vector<1x3x256xf32> to vector<3x256xf32>
    %9 = vector.shape_cast %6 : vector<3x256xf32> to vector<1x3x256xf32>
    tpu.vector_store %arg4[%c0_6, %c0_7, %c0_8], %9 {strides = array<i32>} : memref<1x3x256xf32, #tpu.memory_space<vmem>>, vector<1x3x256xf32>,
    return
  }
  func.func @transform_0(%arg0: i32) -> (i32, i32) {
    %c0_i32 = arith.constant 0 : i32
    %c0_i32_0 = arith.constant 0 : i32
    %c0_i32_1 = arith.constant 0 : i32
    return %c0_i32, %c0_i32_0 : i32, i32
  }
  func.func @transform_1(%arg0: i32) -> (i32, i32, i32) {
    %c0_i32 = arith.constant 0 : i32
    %c0_i32_0 = arith.constant 0 : i32
    %c0_i32_1 = arith.constant 0 : i32
    return %arg0, %c0_i32, %c0_i32_0 : i32, i32, i32
  }
  func.func @transform_2(%arg0: i32) -> (i32, i32) {
    %c0_i32 = arith.constant 0 : i32
    %c0_i32_0 = arith.constant 0 : i32
    %c0_i32_1 = arith.constant 0 : i32
    return %c0_i32, %c0_i32_0 : i32, i32
  }
  func.func @transform_3(%arg0: i32) -> (i32, i32, i32) {
    %c0_i32 = arith.constant 0 : i32
    %c0_i32_0 = arith.constant 0 : i32
    %c0_i32_1 = arith.constant 0 : i32
    return %arg0, %c0_i32, %c0_i32_0 : i32, i32, i32
  }
}

</mosaic_0001>

<bundles_post_ra>
// kernel: forward.9
= control target key start
LH: loop header
LB: loop body
LE: loop exit
PB: predicated region body
PF: predicated region fallthrough
CT: control target
= control target key end

     0   :  { %8 = vsyncpa [#allocation3], 0  ;;  %s710_s0 = inlined_call_operand.vmem [shape: f32[9], index: 0, kind: input, shape index: {}]   ;;  %s711_s1 = inlined_call_operand.vmem [shape: f32[9], index: 1, kind: input, shape index: {}]   ;;  %s712_s2 = inlined_call_operand.vmem [shape: f32[2,24,24], index: 2, kind: input, shape index: {}]   ;;  %s713_s3 = inlined_call_operand.vmem [shape: f32[2,16,16], index: 3, kind: output, shape index: {}]  }
   0x1   :  { %9 = vsyncpa [#allocation5], 0  ;;  %s613_s12 = smov 0  }
   0x2 LB: > { %s619_s13 = sadd.s32 4294967295, %s581_s12   ;;  %p470_p0 = scmp.ge.s32.totalorder %s581_s12, 1  ;;  %s581_s12 = sphi %s613_s12, %s15_s12  }
   0x3   : > { %p114_p1 = scmp.lt.s32.totalorder %s581_s12, 3  ;;  %s127_s16 = sshll.u32 %s710_s0, 4  ;;  %s128_s16 = int_to_ptr.vmem [resolvable:$true] %s127_s16 }
   0x4   : > { %p714_p3 = scmp.eq.s32.totalorder %s619_s13, 0  ;;  %s138_s20 = sshll.u32 %s711_s1, 4  ;;  %s139_s20 = int_to_ptr.vmem [resolvable:$true] %s138_s20 }
   0x5   : > { %p626_p2 = pnand %p470_p0, %p114_p1  ;;  %s537_s22 = scalar_lea.vmem %s128_s16, 16 }
   0x6   : > { %p538_p6 = scmp.ne.s32.totalorder %s128_s16, %s537_s22  ;;  %p545_p10 = scmp.lt.s32.totalorder %s128_s16, %s128_s16 }
   0x7   : > { %s716_s17 = scalar_select %p626_p2, 1, 0 }
   0x8   : > { %p508_p4 = pneg %p626_p2  ;;  %p546_p11 = scmp.lt.s32.totalorder %s537_s22, %s537_s22 }
   0xa   : > { %p638_p5 = pnand %p714_p3, %p508_p4  ;;  %p547_p12 = por %p546_p11, %p545_p10 }
   0xc   : > { %p539_p7 = pneg %p638_p5 }
   0xe   : > { %p540_p8 = pnand %p539_p7, %p538_p6 }
  0x10   : > { %p541_p9 = pneg %p540_p8 }
  0x12   : > { %p548_p13 = pnand %p547_p12, %p541_p9 }
  0x14   : > { %551 = shalt.err (!%p548_p13)
}
  0x15   : > { %s583_s23 = smov [#allocation2]   ;;  %s552_s24 = scalar_lea.vmem %s139_s20, 16 }
  0x16   : > { %511 = dma.vmem_to_smem (!%p638_p5), %s128_s16, 16, %s583_s23, [#allocation3]  }
  0x17   : > { %p553_p0 = scmp.ne.s32.totalorder %s139_s20, %s552_s24  ;;  %p560_p3 = scmp.lt.s32.totalorder %s139_s20, %s139_s20 }
  0x18   : > { %p561_p2 = scmp.lt.s32.totalorder %s552_s24, %s552_s24 }
  0x19   : > { %p555_p1 = pnand %p553_p0, %p539_p7 }
  0x1a   : > { %p562_p6 = por %p561_p2, %p560_p3 }
  0x1b   : > { %p556_p4 = pneg %p555_p1 }
  0x1d   : > { %p563_p8 = pnand %p562_p6, %p556_p4 }
  0x1f   : > { %566 = shalt.err (!%p563_p8)
}
  0x20   : > { %s584_s25 = smov [#allocation4]   ;;  %p718_p9 = scmp.ne.s32.totalorder %s716_s17, 0 }
  0x21   : > { %514 = dma.vmem_to_smem (!%p638_p5), %s139_s20, 16, %s584_s25, [#allocation5]  }
  0x22   : > { %159 = sbr.rel (%p718_p9) target bundleno = 222 (0xde), region = 32  ;;  %p719_p10 = scmp.eq.s32.totalorder (!%p718_p9), %s619_s13, 0 }
  0x29   : > { %572 = dma.done.wait (%p719_p10), [#allocation3], 16   ;;  %p720_p11 = pmov %p719_p10 }
  0x2a   : > { %p721_p7 = pmov %p719_p10 }
  0x2b   : > { %574 = vsyncadd (%p720_p11), [#allocation3], 4294967280 }
  0x2c   : > { %576 = dma.done.wait (%p721_p7), [#allocation5], 16   ;;  %p722_p2 = pmov %p721_p7 }
  0x2e   : > { %578 = vsyncadd (%p722_p2), [#allocation5], 4294967280 }
  0x2f   : > { %169 = sfence }
  0x30   : > { %p188_p3 = scmp.lt.s32.totalorder %s619_s13, 1  ;;  %s198_s26 = sld [smem:[#allocation2]]  ;;  %vm388_vm0 = vcmask 130048  }
  0x31   : > { %s480_s27 = sld [smem:[#allocation2 + $0x1]]  ;;  %s481_s28 = sld [smem:[#allocation2 + $0x2]] }
  0x32   : > { %s724_s13 = smov (!%p188_p3, %s619_s13), 1  ;;  %s662_s29 = sld [smem:[#allocation2 + $0x3]] }
  0x33   : > { %s664_s30 = sld [smem:[#allocation2 + $0x4]]  ;;  %s499_s4 = smul.u32 24, %s724_s13 }
  0x34   : > { %s667_s5 = sld [smem:[#allocation2 + $0x5]]  ;;  %s669_s6 = sld [smem:[#allocation2 + $0x6]] }
  0x35   : > { %s674_s9 = scalar_lea.vmem %s712_s2, %s499_s4  ;;  %s679_s10 = sld [smem:[#allocation2 + $0x7]] }
  0x36   : > { %v201_v0 = vstv %s198_s26  ;;  %v199_v1 = vld [vmem:[%s674_s9] sm:$0xff]  ;;  %v200_v2 = vld [vmem:[%s674_s9 + $0x8] sm:$0xff]  ;;  %s688_s11 = sld [smem:[#allocation2 + $0x8]]  ;;  %s489_s14 = sld [smem:[#allocation4 + $0x2]]  ;;  %v264_v49 = vld [vmem:[%s674_s9 + $0x10] sm:$0xff] }
  0x37   : > { %v207_v3 = vld [vmem:[%s674_s9 + $0x1] sm:$0xff]  ;;  %v209_v4 = vstv %s480_s27  ;;  %v202_v5 = vmul.f32 %v201_v0, %v199_v1  ;;  %v203_v6 = vmul.f32 %v201_v0, %v200_v2  ;;  %v208_v7 = vld [vmem:[%s674_s9 + $0x9] sm:$0xff]  ;;  %v217_v11 = vstv %s481_s28  ;;  %s488_s15 = sld [smem:[#allocation4 + $0x1]]  ;;  %s490_s16 = sld [smem:[#allocation4 + $0x3]] }
  0x38   : > { %v210_v8 = vmul.f32 %v209_v4, %v207_v3  ;;  %v215_v9 = vld [vmem:[%s674_s9 + $0x2] sm:$0xff]  ;;  %v216_v10 = vld [vmem:[%s674_s9 + $0xa] sm:$0xff]  ;;  %v211_v12 = vmul.f32 %v209_v4, %v208_v7  ;;  %v225_v17 = vstv %s662_s29  ;;  %s491_s17 = sld [smem:[#allocation4 + $0x4]]  ;;  %s585_s18 = smov 126  }
  0x39   : > { %v218_v13 = vmul.f32 %v217_v11, %v215_v9  ;;  %v219_v14 = vmul.f32 %v217_v11, %v216_v10  ;;  %v223_v15 = vld [vmem:[%s674_s9 + $0x3] sm:$0xff]  ;;  %v224_v16 = vld [vmem:[%s674_s9 + $0xb] sm:$0xff]  ;;  %v233_v22 = vstv %s664_s30  ;;  %s586_s19 = smov 127   ;;  %s492_s20 = sld [smem:[#allocation4 + $0x5]] }
  0x3a   : > { %v231_v18 = vld [vmem:[%s674_s9 + $0x4] sm:$0xff]  ;;  %v212_v19 = vadd.f32 %v210_v8, %v202_v5  ;;  %v226_v20 = vmul.f32 %v225_v17, %v223_v15  ;;  %v232_v21 = vld [vmem:[%s674_s9 + $0xc] sm:$0xff]  ;;  %v213_v23 = vadd.f32 %v211_v12, %v203_v6  ;;  %v227_v24 = vmul.f32 %v225_v17, %v224_v16  ;;  %s493_s21 = sld [smem:[#allocation4 + $0x6]]  ;;  %s587_s22 = smov 125  }
  0x3b   : > { %v239_v25 = vld [vmem:[%s674_s9 + $0x5] sm:$0xff]  ;;  %v241_v26 = vstv %s667_s5  ;;  %v234_v28 = vmul.f32 %v233_v22, %v231_v18  ;;  %v240_v29 = vld [vmem:[%s674_s9 + $0xd] sm:$0xff]  ;;  %v235_v31 = vmul.f32 %v233_v22, %v232_v21  ;;  %v249_v33 = vstv %s669_s6  ;;  %s494_s23 = sld [smem:[#allocation4 + $0x7]]  ;;  %s588_s24 = smov 124  }
  0x3c   : > { %v220_v27 = vadd.f32 %v218_v13, %v212_v19  ;;  %v221_v30 = vadd.f32 %v219_v14, %v213_v23  ;;  %v247_v32 = vld [vmem:[%s674_s9 + $0x6] sm:$0xff]  ;;  %v242_v35 = vmul.f32 %v241_v26, %v239_v25  ;;  %v248_v36 = vld [vmem:[%s674_s9 + $0xe] sm:$0xff]  ;;  %v243_v38 = vmul.f32 %v241_v26, %v240_v29  ;;  %s495_s25 = sld [smem:[#allocation4 + $0x8]]  ;;  %s589_s26 = smov 123  }
  0x3d   : > { %v255_v39 = vld [vmem:[%s674_s9 + $0x7] sm:$0xff]  ;;  %v257_v40 = vstv %s679_s10  ;;  %v250_v42 = vmul.f32 %v249_v33, %v247_v32  ;;  %v256_v43 = vld [vmem:[%s674_s9 + $0xf] sm:$0xff]  ;;  %v251_v45 = vmul.f32 %v249_v33, %v248_v36  ;;  %v265_v46 = vstv %s688_s11  ;;  %s590_s27 = smov 122   ;;  %s591_s28 = smov 121  }
  0x3e   : > { %v228_v34 = vadd.f32 %v226_v20, %v220_v27  ;;  %v229_v37 = vadd.f32 %v227_v24, %v221_v30  ;;  %v258_v48 = vmul.f32 %v257_v40, %v255_v39  ;;  %v259_v51 = vmul.f32 %v257_v40, %v256_v43  ;;  %s592_s29 = smov 120   ;;  %s270_s30 = sld [smem:[#allocation4]] }
  0x3f   : > { %v266_v53 = vmul.f32 %v265_v46, %v200_v2  ;;  %v267_v55 = vmul.f32 %v265_v46, %v264_v49  ;;  %v291_v58 = vstv %s489_s14  ;;  %v277_v59 = vstv %s488_s15  ;;  %s498_s4 = sshll.u32 %s724_s13, 4 }
  0x40   : > { %v236_v41 = vadd.f32 %v234_v28, %v228_v34  ;;  %v237_v44 = vadd.f32 %v235_v31, %v229_v37  ;;  %v305_v3 = vstv %s490_s16  ;;  %v319_v5 = vstv %s491_s17  ;;  %s197_s7 = scalar_lea.vmem %s713_s3, %s498_s4 }
  0x41   : > { %v333_v8 = vstv %s492_s20  ;;  %v347_v11 = vstv %s493_s21  ;;  %v361_v14 = vstv %s494_s23 }
  0x42   : > { %v244_v47 = vadd.f32 %v242_v35, %v236_v41  ;;  %v245_v50 = vadd.f32 %v243_v38, %v237_v44  ;;  %v375_v17 = vstv %s495_s25 }
  0x44   : > { %v252_v52 = vadd.f32 %v250_v42, %v244_v47  ;;  %v253_v54 = vadd.f32 %v251_v45, %v245_v50  ;;  %v271_v24 = vstv %s270_s30 }
  0x46   : > { %v260_v56 = vadd.f32 %v258_v48, %v252_v52  ;;  %v261_v57 = vadd.f32 %v259_v51, %v253_v54 }
  0x48   : > { %v268_v60 = vadd.f32 %v266_v53, %v260_v56  ;;  %v269_v61 = vadd.f32 %v267_v55, %v261_v57 }
  0x4a   : > { %v292_v62 = vmul.f32 %v291_v58, %v268_v60  ;;  %v278_v63 = vmul.f32 %v277_v59, %v268_v60  ;;  %v293_v0 = vmul.f32 %v291_v58, %v269_v61  ;;  %v279_v1 = vmul.f32 %v277_v59, %v269_v61 }
  0x4b   : > { %v307_v2 = vmul.f32 %v305_v3, %v269_v61  ;;  %v306_v4 = vmul.f32 %v305_v3, %v268_v60  ;;  %v321_v6 = vmul.f32 %v319_v5, %v269_v61  ;;  %v320_v7 = vmul.f32 %v319_v5, %v268_v60 }
  0x4c   : > { %296 = vrot.lane.b32.xlu1 %v292_v62, %s585_s18  ;;  %282 = vrot.lane.b32.xlu0 %v278_v63, %s586_s19  ;;  %v335_v9 = vmul.f32 %v333_v8, %v269_v61  ;;  %v334_v10 = vmul.f32 %v333_v8, %v268_v60  ;;  %v349_v12 = vmul.f32 %v347_v11, %v269_v61 }
  0x4d   : > { %v348_v13 = vmul.f32 %v347_v11, %v268_v60  ;;  %v363_v15 = vmul.f32 %v361_v14, %v269_v61  ;;  %v362_v16 = vmul.f32 %v361_v14, %v268_v60  ;;  %v377_v18 = vmul.f32 %v375_v17, %v269_v61 }
  0x4e   : > { %v376_v19 = vmul.f32 %v375_v17, %v268_v60  ;;  %v273_v25 = vmul.f32 %v271_v24, %v269_v61  ;;  %v272_v28 = vmul.f32 %v271_v24, %v268_v60 }
  0x50   : > { %298 = vrot.lane.b32.xlu1 %v293_v0, %s585_s18  ;;  %284 = vrot.lane.b32.xlu0 %v279_v1, %s586_s19 }
  0x54   : > { %312 = vrot.lane.b32.xlu1 %v307_v2, %s587_s22  ;;  %310 = vrot.lane.b32.xlu0 %v306_v4, %s587_s22 }
  0x58   : > { %326 = vrot.lane.b32.xlu1 %v321_v6, %s588_s24  ;;  %324 = vrot.lane.b32.xlu0 %v320_v7, %s588_s24 }
  0x5c   : > { %340 = vrot.lane.b32.xlu1 %v335_v9, %s589_s26  ;;  %338 = vrot.lane.b32.xlu0 %v334_v10, %s589_s26 }
  0x60   : > { %354 = vrot.lane.b32.xlu1 %v349_v12, %s590_s27  ;;  %352 = vrot.lane.b32.xlu0 %v348_v13, %s590_s27 }
  0x64   : > { %368 = vrot.lane.b32.xlu1 %v363_v15, %s591_s28  ;;  %366 = vrot.lane.b32.xlu0 %v362_v16, %s591_s28 }
  0x68   : > { %382 = vrot.lane.b32.xlu1 %v377_v18, %s592_s29  ;;  %380 = vrot.lane.b32.xlu0 %v376_v19, %s592_s29 }
  0xbe   : > { %v297_v20 = vpop.permute.xlu1 %296  ;;  %v283_v21 = vpop.permute.xlu0 %282 }
  0xbf   : > { %v288_v32 = vadd.f32 %v283_v21, %v272_v28 }
  0xc1   : > { %v302_v36 = vadd.f32 %v297_v20, %v288_v32 }
  0xc2   : > { %v299_v22 = vpop.permute.xlu1 %298  ;;  %v285_v23 = vpop.permute.xlu0 %284 }
  0xc3   : > { %v289_v29 = vadd.f32 %v285_v23, %v273_v25 }
  0xc5   : > { %v303_v33 = vadd.f32 %v299_v22, %v289_v29 }
  0xc6   : > { %v313_v26 = vpop.permute.xlu1 %312  ;;  %v311_v27 = vpop.permute.xlu0 %310 }
  0xc7   : > { %v317_v37 = vadd.f32 %v313_v26, %v303_v33  ;;  %v316_v38 = vadd.f32 %v311_v27, %v302_v36 }
  0xca   : > { %v327_v30 = vpop.permute.xlu1 %326  ;;  %v325_v31 = vpop.permute.xlu0 %324 }
  0xcb   : > { %v331_v41 = vadd.f32 %v327_v30, %v317_v37  ;;  %v330_v42 = vadd.f32 %v325_v31, %v316_v38 }
  0xce   : > { %v341_v34 = vpop.permute.xlu1 %340  ;;  %v339_v35 = vpop.permute.xlu0 %338 }
  0xcf   : > { %v345_v43 = vadd.f32 %v341_v34, %v331_v41  ;;  %v344_v44 = vadd.f32 %v339_v35, %v330_v42 }
  0xd2   : > { %v355_v39 = vpop.permute.xlu1 %354  ;;  %v353_v40 = vpop.permute.xlu0 %352 }
  0xd3   : > { %v359_v47 = vadd.f32 %v355_v39, %v345_v43  ;;  %v358_v48 = vadd.f32 %v353_v40, %v344_v44 }
  0xd6   : > { %v369_v45 = vpop.permute.xlu1 %368  ;;  %v367_v46 = vpop.permute.xlu0 %366 }
  0xd7   : > { %v373_v49 = vadd.f32 %v369_v45, %v359_v47  ;;  %v372_v50 = vadd.f32 %v367_v46, %v358_v48 }
  0xda   : > { %v383_v51 = vpop.permute.xlu1 %382  ;;  %v381_v52 = vpop.permute.xlu0 %380 }
  0xdb   : > { %v387_v53 = vadd.f32 %v383_v51, %v373_v49  ;;  %v386_v54 = vadd.f32 %v381_v52, %v372_v50 }
  0xdd   : > { %390 = vst.msk [vmem:[%s197_s7 + $0x8] sm:$0xff] %vm388_vm0, %v387_v53  ;;  %389 = vst.msk [vmem:[%s197_s7] sm:$0xff] %vm388_vm0, %v386_v54 }
  0xde PF: > { %s15_s12 = sadd.s32 1, %s581_s12  }
  0xdf   : > { %p12_p5 = scmp.ge.s32.totalorder %s15_s12, 4  }
  0xe1   :  { %14 = sbr.rel (!%p12_p5) target bundleno = 2 (0x2), region = 71 }
  0xe8   :  { %412 = vsyncpa [#allocation3], 1 }
  0xe9   :  { %414 = vsyncpa [#allocation3 + $0x1], 1 }
  0xea   :  { %415 = vsyncpa [#allocation5], 1 }

// kernel: forward.10
= control target key start
LH: loop header
LB: loop body
LE: loop exit
PB: predicated region body
PF: predicated region fallthrough
CT: control target
= control target key end

     0   :  { %s879_s24 = smov 0   ;;  %s979_s0 = inlined_call_operand.vmem [shape: bf16[8,18], index: 0, kind: input, shape index: {}]   ;;  %s980_s1 = inlined_call_operand.vmem [shape: f32[8,1], index: 1, kind: input, shape index: {}]   ;;  %s981_s2 = inlined_call_operand.vmem [shape: f32[8,1], index: 2, kind: input, shape index: {}]   ;;  %s982_s3 = inlined_call_operand.vmem [shape: bf16[8,72], index: 3, kind: input, shape index: {}]   ;;  %s983_s4 = inlined_call_operand.vmem [shape: f32[8,1], index: 4, kind: input, shape index: {}]   ;;  %s984_s5 = inlined_call_operand.vmem [shape: f32[8,1], index: 5, kind: input, shape index: {}]   ;;  %s985_s6 = inlined_call_operand.vmem [shape: bf16[2,18,256], index: 6, kind: input, shape index: {}]   ;;  %s986_s7 = inlined_call_operand.vmem [shape: f32[2,8,256], index: 7, kind: output, shape index: {}]  }
   0x1 LB: > { %s704_s25 = sadd.s32 4294967295, %s825_s24   ;;  %p708_p0 = scmp.ge.s32.totalorder %s825_s24, 1  ;;  %s825_s24 = sphi %s879_s24, %s17_s24  }
   0x2   : > { %p237_p1 = scmp.lt.s32.totalorder %s825_s24, 3 }
   0x4   : > { %p238_p2 = pnand %p708_p0, %p237_p1 }
   0x5   : > { %p269_p3 = scmp.lt.s32.totalorder (!%p238_p2), %s704_s25, 1  ;;  %v827_v0 = vmov (!%p238_p2), 0   ;;  %vm303_vm0 = vcmask (!%p238_p2), 1040384   ;;  %v280_v7 = vld [vmem:[%s979_s0] sm:$0xf] (!%p238_p2)  ;;  %vm299_vm1 = vcmask (!%p238_p2), 146432   ;;  %v409_v47 = vlaneseq (!%p238_p2) }
   0x6   : > { %241 = sbr.rel (%p238_p2) target bundleno = 1374 (0x55e), region = 48  ;;  %342 = vmatprep.mubr.bf16.mxu0 (!%p238_p2), %v827_v0  ;;  %768 = vset.pattern.permute.xlu1 (!%p238_p2), %v827_v0  ;;  %v368_v13 = vld [vmem:[%s980_s1] sm:$0xff] (!%p238_p2)  ;;  %vm392_vm2 = vcmask (!%p238_p2), 277504   ;;  %v828_v22 = vmov (!%p238_p2), 0.0   ;;  %s829_s13 = smov (!%p238_p2), 17   ;;  %vm400_vm5 = vcmask (!%p238_p2), 138240  }
   0x7   : > { %600 = vmatprep.mubr.bf16.mxu1 (!%p238_p2), %v827_v0  ;;  %809 = vset.pattern.permute.xlu0 (!%p238_p2), %v827_v0  ;;  %v376_v14 = vld [vmem:[%s981_s2] sm:$0xff] (!%p238_p2)  ;;  %393 = vst.msk [vmem:[#allocation2 + $0x10] sm:$0xff] (!%p238_p2), %vm392_vm2, %v828_v22  ;;  %390 = vst [vmem:[#allocation2] sm:$0xff] (!%p238_p2), %v828_v22  ;;  %vm405_vm6 = vcmask (!%p238_p2), 1047688   ;;  %s830_s14 = smov (!%p238_p2), 112   ;;  %s831_s15 = smov (!%p238_p2), 127  }
   0x8   : > { %371 = vperm.xlu1 (!%p238_p2), %768, %v368_v13   ;;  %s832_s16 = smov (!%p238_p2), 111   ;;  %s833_s17 = smov (!%p238_p2), 126   ;;  %v410_v50 = vand.u32 (!%p238_p2), 127, %v409_v47  ;;  %vm519_vm8 = vcmask (!%p238_p2), 1039360   ;;  %vm838_vm10 = vmmov (!%p238_p2), 1   ;;  %vm454_vm13 = vcmask (!%p238_p2), 1031168  }
   0x9   : > { %s834_s18 = smov (!%p238_p2), 95   ;;  %s835_s19 = smov (!%p238_p2), 110   ;;  %vm467_vm15 = vcmask (!%p238_p2), 916480  }
   0xa   : > { %s836_s20 = smov (!%p238_p2), 96   ;;  %s837_s21 = smov (!%p238_p2), 94   ;;  %v411_v52 = vadd.s32 (!%p238_p2), 128, %v410_v50  ;;  %v416_v56 = vand.u32 (!%p238_p2), 15, %v410_v50 }
   0xc   : > { %379 = vperm.xlu1 (!%p238_p2), %768, %v376_v14   ;;  %v423_v55 = vand.u32 (!%p238_p2), 15, %v411_v52  ;;  %vm908_vm9 = vcmp.ge.s32.totalorder (!%p238_p2), %v416_v56, 1 }
   0xd   : > { %s1000_s25 = smov (!%p269_p3, %s704_s25), 1  ;;  %vm922_vm12 = vmpackc.low %vm838_vm10, %vm908_vm9 }
   0xe   : > { %s747_s26 = smul.u32 24, %s1000_s25  ;;  %vm904_vm7 = vcmp.ge.s32.totalorder %v423_v55, 1  ;;  %vm930_vm14 = vcmp.le.s32.totalorder %v423_v55, 14  ;;  %s746_s30 = sshll.u32 %s1000_s25, 4 }
   0xf   : > { %vm915_vm11 = vmpackc.low %vm838_vm10, %vm904_vm7  ;;  %s278_s10 = scalar_lea.vmem %s986_s7, %s746_s30 }
  0x10   : > { %s273_s29 = scalar_lea.vmem %s985_s6, %s747_s26  ;;  %vm724_vm2 = vmpackc.low %vm904_vm7, %vm930_vm14  ;;  %vm493_vm7 = vcmask 785408  }
  0x11   : > { %v283_v1 = vld [vmem:[%s273_s29 + $0x10] sm:$0x11]  ;;  %v810_v2 = vld [vmem:[%s273_s29 + $0x4] ss:$8 sps:$4 sm:$0xff]   ;;  %v813_v4 = vld [vmem:[%s273_s29] ss:$8 sps:$4 sm:$0xff]  }
  0x12   : > { %v715_v3 = vcombine.high %v283_v1, %v283_v1  ;;  %v714_v5 = vcombine.low %v283_v1, %v283_v1  ;;  %310 = vmatprep.subr.bf16.mxu0 %v810_v2 }
  0x13   : > { %311 = vmatpush1.bf16.msra.mxu0 %v813_v4  ;;  %v625_v4 = vld [vmem:[%s983_s4] sm:$0xff] }
  0x14   : > { %716 = vmatprep.subr.msk.bf16.mxu0 %vm303_vm0, %v715_v3  ;;  %v305_v6 = vsel %vm303_vm0, %v714_v5, 0  ;;  %vm934_vm0 = vcmp.le.s32.totalorder %v416_v56, 14 }
  0x17   : > { %313 = vmatpush1.bf16.msra.mxu0 %v305_v6 }
  0x1a   : > { %717 = vmatmul.mubr.msk.bf16.vlgmr.msra.gmra.mrb[0].mxu0 %vm299_vm1, %v280_v7  ;;  %vm530_vm1 = vcmask 908288  }
  0x87   : > { %v372_v26 = vpop.permute.xlu1 %371 }
  0x8b   : > { %v380_v32 = vpop.permute.xlu1 %379 }
  0xed   : > { %v344_v8 = vpop.f32.mrb[0].mxu0 }
  0xee   : > { %v346_v9 = vpop.f32.mrb[1].mxu0 }
  0xef   : > { %v348_v10 = vpop.f32.mrb[2].mxu0  ;;  %v351_v11 = vadd.f32 %v346_v9, %v344_v8 }
  0xf0   : > { %v349_v12 = vpop.f32.mrb[3].mxu0 }
  0xf1   : > { %352 = vadd.xlane.f32.xlu0 %v351_v11 }
 0x17e   : > { %v353_v15 = vpop.xlane.xlu0 %352 }
 0x17f   : > { %v355_v16 = vmul.f32 0.00390625, %v353_v15 }
 0x181   : > { %v356_v17 = vsub.f32 %v344_v8, %v355_v16  ;;  %v357_v18 = vsub.f32 %v346_v9, %v355_v16 }
 0x183   : > { %v358_v19 = vmul.f32 %v356_v17, %v356_v17  ;;  %v359_v20 = vmul.f32 %v357_v18, %v357_v18 }
 0x185   : > { %v360_v21 = vadd.f32 %v359_v20, %v358_v19 }
 0x187   : > { %361 = vadd.xlane.f32.xlu0 %v360_v21 }
 0x214   : > { %v362_v23 = vpop.xlane.xlu0 %361 }
 0x215   : > { %v363_v24 = vmul.f32 0.00390625, %v362_v23 }
 0x217   : > { %v364_v25 = vadd.f32 1e-05, %v363_v24 }
 0x219   : > { %815 = vrsqrt.f32 %v364_v25 }
 0x223   : > { %v816_v27 = vpop.eup %815 }
 0x224   : > { %v366_v28 = vmul.f32 %v816_v27, %v356_v17  ;;  %v367_v29 = vmul.f32 %v816_v27, %v357_v18 }
 0x226   : > { %v374_v30 = vmul.f32 %v372_v26, %v366_v28  ;;  %v375_v31 = vmul.f32 %v372_v26, %v367_v29 }
 0x228   : > { %v382_v33 = vadd.f32 %v380_v32, %v374_v30  ;;  %v383_v34 = vadd.f32 %v380_v32, %v375_v31 }
 0x22a   : > { %vm385_vm3 = vcmp.ge.f32.partialorder %v383_v34, 0.0  ;;  %v387_v35 = vmul.f32 0.01, %v383_v34  ;;  %vm384_vm4 = vcmp.ge.f32.partialorder %v382_v33, 0.0  ;;  %v386_v36 = vmul.f32 0.01, %v382_v33 }
 0x22c   : > { %v389_v37 = vsel %vm385_vm3, %v383_v34, %v387_v35  ;;  %v388_v38 = vsel %vm384_vm4, %v382_v33, %v386_v36  ;;  %vm480_vm3 = vcmask 900096   ;;  %vm727_vm4 = vmpackc.low %vm908_vm9, %vm934_vm0  ;;  %vm506_vm9 = vcmask 769024  }
 0x22d   : > { %398 = vrot.lane.b32.xlu1 %v389_v37, %s829_s13  ;;  %396 = vrot.lane.b32.xlu0 %v388_v38, %s829_s13 }
 0x29f   : > { %v399_v39 = vpop.permute.xlu1 %398  ;;  %v397_v40 = vpop.permute.xlu0 %396 }
 0x2a0   : > { %408 = vst.msk [vmem:[#allocation2 + $0x10] sm:$0xff] %vm400_vm5, %v399_v39  ;;  %v401_v41 = vsel %vm400_vm5, %v397_v40, %v399_v39  ;;  %vm730_vm5 = vmpackc.low %vm930_vm14, %vm838_vm10 }
 0x2a1   : > { %406 = vst.msk [vmem:[#allocation2] sm:$0xff] %vm405_vm6, %v397_v40  ;;  %vm541_vm6 = vcmask 777216  }
 0x2a7   : > { %v442_v43 = vld [vmem:[#allocation2 + $0x10] sm:$0xff] }
 0x2a8   : > { %v436_v42 = vld [vmem:[#allocation2] sm:$0xff]  ;;  %v789_v44 = vpack.i.bf16 %v442_v43, %v401_v41 }
 0x2a9   : > { %461 = vrot.lane.b32.xlu0 %v436_v42, %s830_s14  ;;  %513 = vrot.lane.b32.xlu1 %v436_v42, %s831_s15  ;;  %v804_v45 = vpack.i.bf16 %v401_v41, %v436_v42 }
 0x2ad   : > { %524 = vrot.lane.b32.xlu0 %v436_v42, %s832_s16  ;;  %448 = vrot.lane.b32.xlu1 %v436_v42, %s833_s17 }
 0x2b1   : > { %535 = vrot.lane.b32.xlu0 %v436_v42, %s834_s18  ;;  %474 = vrot.lane.b32.xlu1 %v436_v42, %s835_s19 }
 0x2b5   : > { %487 = vrot.lane.b32.xlu1 %v436_v42, %s836_s20  ;;  %790 = vrot.lane.b32.xlu0 %v789_v44, %s832_s16 }
 0x2b9   : > { %800 = vrot.lane.b32.xlu0 %v789_v44, %s834_s18  ;;  %770 = vrot.lane.b32.xlu1 %v789_v44, %s831_s15 }
 0x2bd   : > { %504 = vrot.lane.b32.xlu0 %v442_v43, %s837_s21  ;;  %775 = vrot.lane.b32.xlu1 %v789_v44, %s833_s17 }
 0x2c1   : > { %780 = vrot.lane.b32.xlu1 %v789_v44, %s830_s14 }
 0x2c5   : > { %785 = vrot.lane.b32.xlu1 %v789_v44, %s835_s19 }
 0x2c9   : > { %795 = vrot.lane.b32.xlu1 %v789_v44, %s836_s20 }
 0x2cd   : > { %805 = vrot.lane.b32.xlu1 %v804_v45, %s837_s21 }
 0x31b   : > { %v514_v46 = vpop.permute.xlu1 %513  ;;  %v462_v48 = vpop.permute.xlu0 %461 }
 0x31f   : > { %v449_v49 = vpop.permute.xlu1 %448  ;;  %v525_v53 = vpop.permute.xlu0 %524 }
 0x323   : > { %v475_v51 = vpop.permute.xlu1 %474  ;;  %v536_v57 = vpop.permute.xlu0 %535 }
 0x327   : > { %v902_v54 = vpop.permute.xlu1 %487  ;;  %v791_v6 = vpop.permute.xlu0 %790 }
 0x328   : > { %v793_v14 = vunpack.i.h.bf16 %v791_v6  ;;  %v792_v15 = vunpack.i.l.bf16 %v791_v6 }
 0x32a   : > { %v531_v26 = vsel %vm530_vm1, %v525_v53, %v792_v15  ;;  %v532_v27 = vsel %vm530_vm1, %v792_v15, %v793_v14 }
 0x32b   : > { %v771_v58 = vpop.permute.xlu1 %770  ;;  %v801_v20 = vpop.permute.xlu0 %800 }
 0x32c   : > { %v773_v60 = vunpack.i.h.bf16 %v771_v58  ;;  %v772_v61 = vunpack.i.l.bf16 %v771_v58  ;;  %v803_v28 = vunpack.i.h.bf16 %v801_v20  ;;  %v802_v29 = vunpack.i.l.bf16 %v801_v20 }
 0x32e   : > { %v521_v63 = vsel %vm519_vm8, %v772_v61, %v773_v60  ;;  %v520_v1 = vsel %vm519_vm8, %v514_v46, %v772_v61  ;;  %vm733_vm8 = vmpackc.low %vm934_vm0, %vm838_vm10  ;;  %v542_v37 = vsel %vm541_vm6, %v536_v57, %v802_v29  ;;  %v543_v38 = vsel %vm541_vm6, %v802_v29, %v803_v28  ;;  %v633_v60 = vld [vmem:[%s984_s5] sm:$0xff] }
 0x32f   : > { %v776_v2 = vpop.permute.xlu1 %775  ;;  %v719_v3 = vpack.c.bf16 %v521_v63, %v401_v41  ;;  %v722_v5 = vpack.c.bf16 %v520_v1, %v436_v42  ;;  %v505_v46 = vpop.permute.xlu0 %504  ;;  %vm561_vm10 = vcmask 1043456  }
 0x330   : > { %v778_v7 = vunpack.i.h.bf16 %v776_v2  ;;  %v777_v8 = vunpack.i.l.bf16 %v776_v2 }
 0x331   : > { %720 = vmatprep.subr.msk.bf16.mxu1 %vm915_vm11, %v719_v3 }
 0x332   : > { %723 = vmatpush1.bf16.msk.msra.mxu1 %vm922_vm12, %v722_v5  ;;  %v455_v16 = vsel %vm454_vm13, %v449_v49, %v777_v8  ;;  %v456_v17 = vsel %vm454_vm13, %v777_v8, %v778_v7 }
 0x333   : > { %v781_v10 = vpop.permute.xlu1 %780 }
 0x334   : > { %v783_v11 = vunpack.i.h.bf16 %v781_v10  ;;  %v782_v12 = vunpack.i.l.bf16 %v781_v10 }
 0x336   : > { %v468_v18 = vsel %vm467_vm15, %v462_v48, %v782_v12  ;;  %v469_v19 = vsel %vm467_vm15, %v782_v12, %v783_v11 }
 0x337   : > { %v725_v21 = vpack.c.bf16 %v469_v19, %v456_v17  ;;  %v728_v22 = vpack.c.bf16 %v468_v18, %v455_v16  ;;  %v786_v23 = vpop.permute.xlu1 %785 }
 0x338   : > { %v788_v24 = vunpack.i.h.bf16 %v786_v23  ;;  %v787_v25 = vunpack.i.l.bf16 %v786_v23 }
 0x339   : > { %726 = vmatprep.subr.msk.bf16.mxu1 %vm724_vm2, %v725_v21 }
 0x33a   : > { %v481_v30 = vsel %vm480_vm3, %v475_v51, %v787_v25  ;;  %v482_v31 = vsel %vm480_vm3, %v787_v25, %v788_v24  ;;  %729 = vmatpush1.bf16.msk.msra.mxu1 %vm727_vm4, %v728_v22 }
 0x33b   : > { %v731_v32 = vpack.c.bf16 %v482_v31, %v532_v27  ;;  %v734_v33 = vpack.c.bf16 %v481_v30, %v531_v26  ;;  %v796_v34 = vpop.permute.xlu1 %795 }
 0x33c   : > { %v798_v35 = vunpack.i.h.bf16 %v796_v34  ;;  %v797_v36 = vunpack.i.l.bf16 %v796_v34 }
 0x33d   : > { %732 = vmatprep.subr.msk.bf16.mxu1 %vm730_vm5, %v731_v32 }
 0x33e   : > { %v494_v39 = vsel %vm493_vm7, %v902_v54, %v797_v36  ;;  %v495_v40 = vsel %vm493_vm7, %v797_v36, %v798_v35  ;;  %735 = vmatpush1.bf16.msk.msra.mxu1 %vm733_vm8, %v734_v33  ;;  %v556_v54 = vld [vmem:[%s982_s3] sm:$0xf] }
 0x33f   : > { %v737_v41 = vpack.c.bf16 %v543_v38, %v495_v40  ;;  %v740_v42 = vpack.c.bf16 %v542_v37, %v494_v39  ;;  %v806_v43 = vpop.permute.xlu1 %805 }
 0x340   : > { %v808_v44 = vunpack.i.h.bf16 %v806_v43  ;;  %v807_v45 = vunpack.i.l.bf16 %v806_v43 }
 0x341   : > { %738 = vmatprep.subr.msk.bf16.mxu1 %vm915_vm11, %v737_v41  ;;  %vm557_vm11 = vcmask 588800  }
 0x342   : > { %v508_v47 = vsel %vm506_vm9, %v808_v44, %v505_v46  ;;  %741 = vmatpush1.bf16.msk.msra.mxu1 %vm922_vm12, %v740_v42  ;;  %v507_v48 = vsel %vm506_vm9, %v807_v45, %v808_v44 }
 0x343   : > { %v512_v49 = vsel %vm930_vm14, %v508_v47, 0.0  ;;  %v511_v50 = vsel %vm934_vm0, %v507_v48, 0.0 }
 0x344   : > { %v555_v51 = vpack.c.bf16 %v512_v49, %v512_v49  ;;  %v554_v52 = vpack.c.bf16 %v511_v50, %v511_v50 }
 0x346   : > { %742 = vmatprep.subr.msk.bf16.mxu1 %vm561_vm10, %v555_v51  ;;  %v563_v53 = vsel %vm561_vm10, %v554_v52, 0 }
 0x347   : > { %577 = vmatpush1.bf16.msra.mxu1 %v563_v53 }
 0x34a   : > { %743 = vmatmul.mubr.msk.bf16.vlgmr.msra.gmra.mrb[0].mxu1 %vm557_vm11, %v556_v54 }
 0x41d   : > { %v602_v55 = vpop.f32.mrb[0].mxu1 }
 0x41e   : > { %v604_v56 = vpop.f32.mrb[1].mxu1 }
 0x41f   : > { %v606_v57 = vpop.f32.mrb[2].mxu1  ;;  %v609_v58 = vadd.f32 %v604_v56, %v602_v55 }
 0x420   : > { %v607_v59 = vpop.f32.mrb[3].mxu1 }
 0x421   : > { %610 = vadd.xlane.f32.xlu1 %v609_v58 }
 0x432   : > { %636 = vperm.xlu1 %768, %v633_v60  }
 0x4ae   : > { %v611_v61 = vpop.xlane.xlu1 %610 }
 0x4af   : > { %v612_v62 = vmul.f32 0.00390625, %v611_v61 }
 0x4b1   : > { %v613_v63 = vsub.f32 %v602_v55, %v612_v62  ;;  %v614_v0 = vsub.f32 %v604_v56, %v612_v62 }
 0x4b2   : > { %v637_v14 = vpop.permute.xlu1 %636 }
 0x4b3   : > { %v615_v1 = vmul.f32 %v613_v63, %v613_v63  ;;  %v616_v2 = vmul.f32 %v614_v0, %v614_v0 }
 0x4b5   : > { %v617_v3 = vadd.f32 %v616_v2, %v615_v1 }
 0x4b7   : > { %618 = vadd.xlane.f32.xlu0 %v617_v3 }
 0x4cd   : > { %628 = vperm.xlu0 %809, %v625_v4  }
 0x544   : > { %v619_v5 = vpop.xlane.xlu0 %618 }
 0x545   : > { %v620_v6 = vmul.f32 0.00390625, %v619_v5 }
 0x547   : > { %v621_v7 = vadd.f32 1e-05, %v620_v6 }
 0x549   : > { %817 = vrsqrt.f32 %v621_v7 }
 0x54c   : > { %v629_v9 = vpop.permute.xlu0 %628 }
 0x553   : > { %v818_v8 = vpop.eup %817 }
 0x554   : > { %v623_v10 = vmul.f32 %v818_v8, %v613_v63  ;;  %v624_v11 = vmul.f32 %v818_v8, %v614_v0 }
 0x556   : > { %v631_v12 = vmul.f32 %v629_v9, %v623_v10  ;;  %v632_v13 = vmul.f32 %v629_v9, %v624_v11 }
 0x558   : > { %v639_v15 = vadd.f32 %v637_v14, %v631_v12  ;;  %v640_v16 = vadd.f32 %v637_v14, %v632_v13 }
 0x55a   : > { %vm641_vm12 = vcmp.ge.f32.partialorder %v639_v15, 0.0  ;;  %vm642_vm13 = vcmp.ge.f32.partialorder %v640_v16, 0.0  ;;  %v643_v17 = vmul.f32 0.01, %v639_v15  ;;  %v644_v18 = vmul.f32 0.01, %v640_v16 }
 0x55c   : > { %v645_v19 = vsel %vm641_vm12, %v639_v15, %v643_v17  ;;  %v646_v20 = vsel %vm642_vm13, %v640_v16, %v644_v18 }
 0x55d   : > { %647 = vst [vmem:[%s278_s10] sm:$0xff] %v645_v19  ;;  %648 = vst [vmem:[%s278_s10 + $0x8] sm:$0xff] %v646_v20 }
 0x55e PF: > { %s17_s24 = sadd.s32 1, %s825_s24  }
 0x55f   : > { %p14_p4 = scmp.ge.s32.totalorder %s17_s24, 4  }
 0x561   :  { %16 = sbr.rel (!%p14_p4) target bundleno = 1 (0x1), region = 78 }

// kernel: forward.11
= control target key start
LH: loop header
LB: loop body
LE: loop exit
PB: predicated region body
PF: predicated region fallthrough
CT: control target
= control target key end

     0   :  { %s909_s24 = smov 0   ;;  %s1004_s0 = inlined_call_operand.vmem [shape: bf16[16,72], index: 0, kind: input, shape index: {}]   ;;  %s1005_s1 = inlined_call_operand.vmem [shape: f32[16,1], index: 1, kind: input, shape index: {}]   ;;  %s1006_s2 = inlined_call_operand.vmem [shape: f32[16,1], index: 2, kind: input, shape index: {}]   ;;  %s1007_s3 = inlined_call_operand.vmem [shape: bf16[16,144], index: 3, kind: input, shape index: {}]   ;;  %s1008_s4 = inlined_call_operand.vmem [shape: f32[16,1], index: 4, kind: input, shape index: {}]   ;;  %s1009_s5 = inlined_call_operand.vmem [shape: f32[16,1], index: 5, kind: input, shape index: {}]   ;;  %s1010_s6 = inlined_call_operand.vmem [shape: bf16[2,72,64], index: 6, kind: input, shape index: {}]   ;;  %s1011_s7 = inlined_call_operand.vmem [shape: f32[2,16,64], index: 7, kind: output, shape index: {}]  }
   0x1 LB: > { %s710_s25 = sadd.s32 4294967295, %s855_s24   ;;  %p714_p0 = scmp.ge.s32.totalorder %s855_s24, 1  ;;  %s855_s24 = sphi %s909_s24, %s17_s24  }
   0x2   : > { %p237_p1 = scmp.lt.s32.totalorder %s855_s24, 3 }
   0x4   : > { %p238_p2 = pnand %p714_p0, %p237_p1 }
   0x5   : > { %p269_p3 = scmp.lt.s32.totalorder (!%p238_p2), %s710_s25, 1  ;;  %v857_v0 = vmov (!%p238_p2), 0.0   ;;  %vm858_vm0 = vmmov (!%p238_p2), 0   ;;  %vm327_vm1 = vcmask (!%p238_p2), 1043456   ;;  %v837_v7 = vld [vmem:[%s1004_s0] sm:$0xff] (!%p238_p2)   ;;  %vm323_vm2 = vcmask (!%p238_p2), 588800  }
   0x6   : > { %241 = sbr.rel (%p238_p2) target bundleno = 1375 (0x55f), region = 48  ;;  %755 = vmatprep.subr.bf16.mxu0 (!%p238_p2), %v857_v0  ;;  %765 = vmatprep.mubr.msk.bf16.mxu0 (!%p238_p2), %vm858_vm0, %v857_v0  ;;  %v401_v8 = vld [vmem:[%s1005_s1 + $0x8] sm:$0xff] (!%p238_p2)  ;;  %v859_v9 = vmov (!%p238_p2), 0   ;;  %v414_v10 = vld [vmem:[%s1006_s2] sm:$0xff] (!%p238_p2)  ;;  %vm372_vm3 = vcmask (!%p238_p2), 523264   ;;  %vm434_vm4 = vcmask (!%p238_p2), 670720   ;;  %v448_v51 = vlaneseq (!%p238_p2) }
   0x7   : > { %791 = vset.pattern.permute.xlu1 (!%p238_p2), %v859_v9  ;;  %790 = vset.pattern.permute.xlu0 (!%p238_p2), %v859_v9  ;;  %v400_v17 = vld [vmem:[%s1005_s1] sm:$0xff] (!%p238_p2)  ;;  %v415_v28 = vld [vmem:[%s1006_s2 + $0x8] sm:$0xff] (!%p238_p2)  ;;  %435 = vst.msk [vmem:[#allocation2] sm:$0xff] (!%p238_p2), %vm434_vm4, %v857_v0  ;;  %436 = vst.msk [vmem:[#allocation2 + $0x8] sm:$0xff] (!%p238_p2), %vm434_vm4, %v857_v0  ;;  %s860_s17 = smov (!%p238_p2), 9   ;;  %vm445_vm7 = vcmask (!%p238_p2), 597064  }
   0x8   : > { %409 = vperm.xlu1 (!%p238_p2), %791, %v401_v8   ;;  %552 = vmatprep.subr.bf16.mxu1 (!%p238_p2), %v859_v9  ;;  %v449_v53 = vand.u32 (!%p238_p2), 127, %v448_v51  ;;  %s861_s18 = smov (!%p238_p2), 119   ;;  %s862_s19 = smov (!%p238_p2), 127   ;;  %v840_v61 = vld [vmem:[%s1007_s3 + $0x4] ss:$8 sps:$4 sm:$0xff] (!%p238_p2)   ;;  %vm548_vm10 = vcmask (!%p238_p2), 130048  }
   0x9   : > { %s863_s20 = smov (!%p238_p2), 112   ;;  %s864_s21 = smov (!%p238_p2), 126   ;;  %745 = vmatprep.mubr.msk.bf16.mxu1 (!%p238_p2), %vm548_vm10, %v840_v61  ;;  %v634_v51 = vld [vmem:[%s1009_s5 + $0x8] sm:$0xff] (!%p238_p2) }
   0xa   : > { %v454_v55 = vand.u32 (!%p238_p2), 7, %v449_v53  ;;  %s865_s22 = smov (!%p238_p2), 110   ;;  %s866_s23 = smov (!%p238_p2), 120  }
   0xb   : > { %s868_s27 = smov (!%p238_p2), 111  }
   0xc   : > { %418 = vperm.xlu1 (!%p238_p2), %791, %v414_v10   ;;  %vm464_vm8 = vcmp.ge.s32.totalorder (!%p238_p2), %v454_v55, 1  ;;  %vm467_vm11 = vcmp.le.s32.totalorder (!%p238_p2), %v454_v55, 6 }
   0xd   : > { %s1017_s25 = smov (!%p269_p3, %s710_s25), 1  ;;  %vm945_vm9 = vmpackc.low %vm464_vm8, %vm464_vm8 }
   0xe   : > { %s769_s26 = smul.u32 36, %s1017_s25  ;;  %vm956_vm12 = vmpackc.low %vm467_vm11, %vm467_vm11 }
  0x10   : > { %s273_s29 = scalar_lea.vmem %s1010_s6, %s769_s26  ;;  %s867_s26 = smov 118  }
  0x11   : > { %v832_v1 = vld [vmem:[%s273_s29] sm:$0xff]   ;;  %v833_v2 = vld [vmem:[%s273_s29 + $0x8] sm:$0xff]   ;;  %v834_v3 = vld [vmem:[%s273_s29 + $0x10] sm:$0xff]  }
  0x12   : > { %756 = vmatpush3.bf16.msra.mxu0 %v832_v1  ;;  %v835_v4 = vld [vmem:[%s273_s29 + $0x18] sm:$0xff]   ;;  %v836_v5 = vld [vmem:[%s273_s29 + $0x20] ss:$0 sps:$4 sm:$0xff]  }
  0x13   : > { %757 = vmatprep.subr.bf16.mxu0 %v857_v0  ;;  %v329_v6 = vsel %vm327_vm1, %v836_v5, 0 }
  0x16   : > { %758 = vmatpush3.bf16.msra.mxu0 %v833_v2 }
  0x17   : > { %759 = vmatprep.subr.bf16.mxu0 %v857_v0 }
  0x1a   : > { %760 = vmatpush3.bf16.msra.mxu0 %v834_v3 }
  0x1b   : > { %761 = vmatprep.subr.bf16.mxu0 %v857_v0 }
  0x1e   : > { %762 = vmatpush3.bf16.msra.mxu0 %v835_v4 }
  0x1f   : > { %763 = vmatprep.subr.bf16.mxu0 %v857_v0 }
  0x22   : > { %764 = vmatpush3.bf16.msra.mxu0 %v329_v6 }
  0x25   : > { %766 = vmatmul.mubr.msk.bf16.vlgmr.msra.gmra.mrb[0].mxu0 %vm323_vm2, %v837_v7 }
  0x87   : > { %v410_v29 = vpop.permute.xlu1 %409 }
  0x8b   : > { %v419_v30 = vpop.permute.xlu1 %418 }
  0xf8   : > { %v365_v11 = vpop.f32.mrb[0].mxu0 }
  0xf9   : > { %v767_v12 = vpop.f32.mrb[1].mxu0  ;;  %v373_v13 = vsel %vm372_vm3, %v365_v11, 0.0 }
  0xfa   : > { %374 = vadd.xlane.f32.xlu0 %v373_v13  ;;  %v368_v14 = vpop.f32.mrb[2].mxu0 }
  0xfb   : > { %v768_v15 = vpop.f32.mrb[3].mxu0  ;;  %v376_v16 = vsel %vm372_vm3, %v368_v14, 0.0 }
  0xfe   : > { %377 = vadd.xlane.f32.xlu0 %v376_v16 }
 0x114   : > { %404 = vperm.xlu0 %790, %v400_v17  }
 0x187   : > { %v375_v18 = vpop.xlane.xlu0 %374 }
 0x188   : > { %v380_v19 = vmul.f32 0.015625, %v375_v18 }
 0x18a   : > { %v382_v20 = vsub.f32 %v365_v11, %v380_v19 }
 0x18b   : > { %v378_v21 = vpop.xlane.xlu0 %377 }
 0x18c   : > { %v381_v22 = vmul.f32 0.015625, %v378_v21  ;;  %v384_v23 = vmul.f32 %v382_v20, %v382_v20 }
 0x18e   : > { %v383_v24 = vsub.f32 %v368_v14, %v381_v22  ;;  %v386_v25 = vsel %vm372_vm3, %v384_v23, 0.0 }
 0x18f   : > { %387 = vadd.xlane.f32.xlu1 %v386_v25 }
 0x190   : > { %v385_v26 = vmul.f32 %v383_v24, %v383_v24 }
 0x192   : > { %v389_v27 = vsel %vm372_vm3, %v385_v26, 0.0 }
 0x193   : > { %390 = vadd.xlane.f32.xlu1 %v389_v27  ;;  %v405_v38 = vpop.permute.xlu0 %404 }
 0x1a4   : > { %423 = vperm.xlu1 %791, %v415_v28  }
 0x21c   : > { %v388_v31 = vpop.xlane.xlu1 %387 }
 0x21d   : > { %v392_v32 = vmul.f32 0.015625, %v388_v31 }
 0x21f   : > { %v394_v33 = vadd.f32 1e-05, %v392_v32  ;;  %v838_v32 = vld [vmem:[%s1007_s3] ss:$8 sps:$4 sm:$0xff]  }
 0x220   : > { %v391_v34 = vpop.xlane.xlu1 %390 }
 0x221   : > { %841 = vrsqrt.f32 %v394_v33  ;;  %v393_v35 = vmul.f32 0.015625, %v391_v34 }
 0x223   : > { %v395_v36 = vadd.f32 1e-05, %v393_v35 }
 0x224   : > { %v424_v46 = vpop.permute.xlu1 %423 }
 0x225   : > { %843 = vrsqrt.f32 %v395_v36 }
 0x22b   : > { %v842_v37 = vpop.eup %841 }
 0x22c   : > { %v398_v39 = vmul.f32 %v842_v37, %v382_v20 }
 0x22e   : > { %v412_v40 = vmul.f32 %v405_v38, %v398_v39  ;;  %v619_v39 = vld [vmem:[%s1008_s4] sm:$0xff] }
 0x22f   : > { %v844_v41 = vpop.eup %843 }
 0x230   : > { %v399_v42 = vmul.f32 %v844_v41, %v383_v24  ;;  %v426_v43 = vadd.f32 %v419_v30, %v412_v40 }
 0x232   : > { %v413_v44 = vmul.f32 %v410_v29, %v399_v42  ;;  %vm428_vm5 = vcmp.ge.f32.partialorder %v426_v43, 0.0  ;;  %v430_v45 = vmul.f32 0.01, %v426_v43 }
 0x234   : > { %v427_v47 = vadd.f32 %v424_v46, %v413_v44  ;;  %v432_v48 = vsel %vm428_vm5, %v426_v43, %v430_v45 }
 0x235   : > { %439 = vrot.lane.b32.xlu1 %v432_v48, %s860_s17 }
 0x236   : > { %v431_v49 = vmul.f32 0.01, %v427_v47  ;;  %vm429_vm6 = vcmp.ge.f32.partialorder %v427_v47, 0.0 }
 0x238   : > { %v433_v50 = vsel %vm429_vm6, %v427_v47, %v431_v49 }
 0x239   : > { %441 = vrot.lane.b32.xlu1 %v433_v50, %s860_s17  ;;  %v633_v50 = vld [vmem:[%s1009_s5] sm:$0xff]  ;;  %s748_s17 = sshll.u32 %s1017_s25, 4 }
 0x2a7   : > { %v440_v52 = vpop.permute.xlu1 %439 }
 0x2a8   : > { %446 = vst.msk [vmem:[#allocation2] sm:$0xff] %vm445_vm7, %v440_v52 }
 0x2ab   : > { %v442_v54 = vpop.permute.xlu1 %441 }
 0x2ac   : > { %447 = vst.msk [vmem:[#allocation2 + $0x8] sm:$0xff] %vm445_vm7, %v442_v54 }
 0x2af   : > { %v462_v56 = vld [vmem:[#allocation2] sm:$0xff] }
 0x2b3   : > { %v463_v57 = vld [vmem:[#allocation2 + $0x8] sm:$0xff] }
 0x2b4   : > { %v807_v58 = vpack.i.bf16 %v463_v57, %v462_v56  ;;  %v728_v60 = vpack.c.bf16 %v463_v57, %v462_v56 }
 0x2b6   : > { %808 = vrot.lane.b32.xlu0 %v807_v58, %s861_s18  ;;  %793 = vrot.lane.b32.xlu1 %v807_v58, %s862_s19 }
 0x2b7   : > { %729 = vmatpush1.bf16.msk.msra.mxu1 %vm945_vm9, %v728_v60 }
 0x2b8   : > { %554 = vmatprep.subr.bf16.mxu1 %v859_v9 }
 0x2ba   : > { %818 = vrot.lane.b32.xlu0 %v807_v58, %s863_s20  ;;  %798 = vrot.lane.b32.xlu1 %v807_v58, %s864_s21  ;;  %s278_s20 = scalar_lea.vmem %s1011_s7, %s748_s17 }
 0x2be   : > { %828 = vrot.lane.b32.xlu0 %v807_v58, %s865_s22  ;;  %803 = vrot.lane.b32.xlu1 %v807_v58, %s866_s23 }
 0x2c2   : > { %813 = vrot.lane.b32.xlu1 %v807_v58, %s867_s26 }
 0x2c6   : > { %823 = vrot.lane.b32.xlu1 %v807_v58, %s868_s27 }
 0x328   : > { %v794_v62 = vpop.permute.xlu1 %793  ;;  %v809_v7 = vpop.permute.xlu0 %808 }
 0x329   : > { %v796_v63 = vunpack.i.h.bf16 %v794_v62  ;;  %v795_v0 = vunpack.i.l.bf16 %v794_v62  ;;  %v811_v12 = vunpack.i.h.bf16 %v809_v7  ;;  %v810_v13 = vunpack.i.l.bf16 %v809_v7 }
 0x32b   : > { %v529_v1 = vpack.c.bf16 %v796_v63, %v795_v0  ;;  %v532_v16 = vpack.c.bf16 %v811_v12, %v810_v13 }
 0x32c   : > { %v799_v2 = vpop.permute.xlu1 %798  ;;  %v819_v19 = vpop.permute.xlu0 %818 }
 0x32d   : > { %v801_v3 = vunpack.i.h.bf16 %v799_v2  ;;  %v800_v4 = vunpack.i.l.bf16 %v799_v2  ;;  %555 = vmatpush1.bf16.msra.mxu1 %v529_v1  ;;  %v821_v20 = vunpack.i.h.bf16 %v819_v19  ;;  %v820_v21 = vunpack.i.l.bf16 %v819_v19 }
 0x32e   : > { %556 = vmatprep.subr.bf16.mxu1 %v859_v9 }
 0x32f   : > { %v731_v6 = vpack.c.bf16 %v801_v3, %v800_v4  ;;  %v740_v24 = vpack.c.bf16 %v821_v20, %v820_v21 }
 0x330   : > { %v804_v8 = vpop.permute.xlu1 %803  ;;  %v829_v27 = vpop.permute.xlu0 %828 }
 0x331   : > { %v806_v10 = vunpack.i.h.bf16 %v804_v8  ;;  %v805_v11 = vunpack.i.l.bf16 %v804_v8  ;;  %732 = vmatpush1.bf16.msk.msra.mxu1 %vm956_vm12, %v731_v6  ;;  %v831_v28 = vunpack.i.h.bf16 %v829_v27  ;;  %v830_v29 = vunpack.i.l.bf16 %v829_v27 }
 0x332   : > { %558 = vmatprep.subr.bf16.mxu1 %v859_v9 }
 0x333   : > { %v734_v14 = vpack.c.bf16 %v806_v10, %v805_v11  ;;  %v743_v31 = vpack.c.bf16 %v831_v28, %v830_v29 }
 0x334   : > { %v814_v15 = vpop.permute.xlu1 %813 }
 0x335   : > { %735 = vmatpush1.bf16.msk.msra.mxu1 %vm945_vm9, %v734_v14  ;;  %v816_v17 = vunpack.i.h.bf16 %v814_v15  ;;  %v815_v18 = vunpack.i.l.bf16 %v814_v15 }
 0x336   : > { %560 = vmatprep.subr.bf16.mxu1 %v859_v9 }
 0x337   : > { %v737_v22 = vpack.c.bf16 %v816_v17, %v815_v18 }
 0x338   : > { %v824_v23 = vpop.permute.xlu1 %823 }
 0x339   : > { %561 = vmatpush1.bf16.msra.mxu1 %v532_v16  ;;  %v826_v25 = vunpack.i.h.bf16 %v824_v23  ;;  %v825_v26 = vunpack.i.l.bf16 %v824_v23 }
 0x33a   : > { %562 = vmatprep.subr.bf16.mxu1 %v859_v9 }
 0x33b   : > { %v535_v30 = vpack.c.bf16 %v826_v25, %v825_v26 }
 0x33d   : > { %738 = vmatpush1.bf16.msk.msra.mxu1 %vm956_vm12, %v737_v22 }
 0x33e   : > { %564 = vmatprep.subr.bf16.mxu1 %v859_v9 }
 0x341   : > { %741 = vmatpush1.bf16.msk.msra.mxu1 %vm945_vm9, %v740_v24 }
 0x342   : > { %566 = vmatprep.subr.bf16.mxu1 %v859_v9 }
 0x345   : > { %567 = vmatpush1.bf16.msra.mxu1 %v535_v30 }
 0x346   : > { %568 = vmatprep.subr.bf16.mxu1 %v859_v9  ;;  %v620_v9 = vld [vmem:[%s1008_s4 + $0x8] sm:$0xff] }
 0x349   : > { %744 = vmatpush1.bf16.msk.msra.mxu1 %vm956_vm12, %v743_v31 }
 0x34c   : > { %585 = vmatmul.mubr.bf16.vlgmr.msra.gmra.mrb[0].mxu1 %v838_v32 }
 0x41f   : > { %v586_v33 = vpop.f32.mrb[0].mxu1 }
 0x420   : > { %v588_v34 = vpop.f32.mrb[1].mxu1  ;;  %v593_v35 = vsel %vm372_vm3, %v586_v33, 0.0 }
 0x421   : > { %594 = vadd.xlane.f32.xlu1 %v593_v35  ;;  %v589_v36 = vpop.f32.mrb[2].mxu1 }
 0x422   : > { %v591_v37 = vpop.f32.mrb[3].mxu1  ;;  %v596_v38 = vsel %vm372_vm3, %v589_v36, 0.0 }
 0x423   : > { %597 = vadd.xlane.f32.xlu0 %v596_v38 }
 0x432   : > { %628 = vperm.xlu1 %791, %v620_v9  }
 0x439   : > { %623 = vperm.xlu0 %790, %v619_v39  }
 0x4ae   : > { %v595_v40 = vpop.xlane.xlu1 %594 }
 0x4af   : > { %v599_v41 = vmul.f32 0.015625, %v595_v40 }
 0x4b0   : > { %v598_v42 = vpop.xlane.xlu0 %597 }
 0x4b1   : > { %v601_v43 = vsub.f32 %v586_v33, %v599_v41  ;;  %v600_v44 = vmul.f32 0.015625, %v598_v42 }
 0x4b2   : > { %v629_v53 = vpop.permute.xlu1 %628 }
 0x4b3   : > { %v602_v45 = vsub.f32 %v589_v36, %v600_v44  ;;  %v603_v46 = vmul.f32 %v601_v43, %v601_v43 }
 0x4b5   : > { %v605_v47 = vsel %vm372_vm3, %v603_v46, 0.0  ;;  %v604_v48 = vmul.f32 %v602_v45, %v602_v45 }
 0x4b6   : > { %606 = vadd.xlane.f32.xlu0 %v605_v47 }
 0x4b7   : > { %v608_v49 = vsel %vm372_vm3, %v604_v48, 0.0 }
 0x4b8   : > { %609 = vadd.xlane.f32.xlu1 %v608_v49  ;;  %v624_v52 = vpop.permute.xlu0 %623 }
 0x4c9   : > { %637 = vperm.xlu1 %791, %v633_v50  }
 0x4cc   : > { %642 = vperm.xlu0 %790, %v634_v51  }
 0x543   : > { %v607_v54 = vpop.xlane.xlu0 %606 }
 0x544   : > { %v611_v55 = vmul.f32 0.015625, %v607_v54 }
 0x545   : > { %v610_v56 = vpop.xlane.xlu1 %609 }
 0x546   : > { %v613_v57 = vadd.f32 1e-05, %v611_v55  ;;  %v612_v58 = vmul.f32 0.015625, %v610_v56 }
 0x548   : > { %845 = vrsqrt.f32 %v613_v57  ;;  %v614_v59 = vadd.f32 1e-05, %v612_v58 }
 0x549   : > { %v638_v1 = vpop.permute.xlu1 %637 }
 0x54a   : > { %847 = vrsqrt.f32 %v614_v59 }
 0x54b   : > { %v643_v4 = vpop.permute.xlu0 %642 }
 0x552   : > { %v846_v60 = vpop.eup %845 }
 0x553   : > { %v617_v61 = vmul.f32 %v846_v60, %v601_v43 }
 0x554   : > { %v848_v62 = vpop.eup %847 }
 0x555   : > { %v631_v63 = vmul.f32 %v624_v52, %v617_v61  ;;  %v618_v0 = vmul.f32 %v848_v62, %v602_v45 }
 0x557   : > { %v645_v2 = vadd.f32 %v638_v1, %v631_v63  ;;  %v632_v3 = vmul.f32 %v629_v53, %v618_v0 }
 0x559   : > { %vm647_vm13 = vcmp.ge.f32.partialorder %v645_v2, 0.0  ;;  %v649_v5 = vmul.f32 0.01, %v645_v2  ;;  %v646_v6 = vadd.f32 %v643_v4, %v632_v3 }
 0x55b   : > { %v651_v7 = vsel %vm647_vm13, %v645_v2, %v649_v5  ;;  %vm648_vm14 = vcmp.ge.f32.partialorder %v646_v6, 0.0  ;;  %v650_v8 = vmul.f32 0.01, %v646_v6 }
 0x55c   : > { %653 = vst.msk [vmem:[%s278_s20] sm:$0xff] %vm372_vm3, %v651_v7 }
 0x55d   : > { %v652_v10 = vsel %vm648_vm14, %v646_v6, %v650_v8 }
 0x55e   : > { %654 = vst.msk [vmem:[%s278_s20 + $0x8] sm:$0xff] %vm372_vm3, %v652_v10 }
 0x55f PF: > { %s17_s24 = sadd.s32 1, %s855_s24  }
 0x560   : > { %p14_p4 = scmp.ge.s32.totalorder %s17_s24, 4  }
 0x562   :  { %16 = sbr.rel (!%p14_p4) target bundleno = 1 (0x1), region = 78 }

// kernel: forward.13
= control target key start
LH: loop header
LB: loop body
LE: loop exit
PB: predicated region body
PF: predicated region fallthrough
CT: control target
= control target key end

     0   :  { %s413_s9 = smov 0   ;;  %s454_s0 = inlined_call_operand.vmem [shape: bf16[64,32], index: 0, kind: input, shape index: {}]   ;;  %s455_s1 = inlined_call_operand.vmem [shape: bf16[2,32,16], index: 1, kind: input, shape index: {}]   ;;  %s456_s2 = inlined_call_operand.vmem [shape: f32[2,64,16], index: 2, kind: output, shape index: {}]  }
   0x1 LB: > { %s331_s10 = sadd.s32 4294967295, %s396_s9   ;;  %p335_p0 = scmp.ge.s32.totalorder %s396_s9, 1  ;;  %s396_s9 = sphi %s413_s9, %s12_s9  }
   0x2   : > { %p112_p1 = scmp.lt.s32.totalorder %s396_s9, 3 }
   0x4   : > { %p113_p2 = pnand %p335_p0, %p112_p1 }
   0x5   : > { %p134_p3 = scmp.lt.s32.totalorder (!%p113_p2), %s331_s10, 1  ;;  %v386_v0 = vld [vmem:[%s454_s0] sm:$0xff] (!%p113_p2)   ;;  %vm189_vm0 = vcmask (!%p113_p2), 261120   ;;  %v387_v1 = vld [vmem:[%s454_s0 + $0x10] sm:$0xff] (!%p113_p2)   ;;  %v388_v4 = vld [vmem:[%s454_s0 + $0x8] sm:$0xff] (!%p113_p2)   ;;  %vm267_vm1 = vcmask (!%p113_p2), 130048  }
   0x6   : > { %116 = sbr.rel (%p113_p2) target bundleno = 241 (0xf1), region = 28  ;;  %364 = vmatprep.mubr.msk.bf16.mxu0 (!%p113_p2), %vm189_vm0, %v386_v0  ;;  %368 = vmatprep.mubr.msk.bf16.mxu1 (!%p113_p2), %vm189_vm0, %v387_v1  ;;  %v389_v5 = vld [vmem:[%s454_s0 + $0x18] sm:$0xff] (!%p113_p2)  }
   0xd   : > { %s458_s10 = smov (!%p134_p3, %s331_s10), 1 }
   0xe   : > { %s352_s15 = sshll.u32 %s458_s10, 4  ;;  %s353_s23 = sshll.u32 %s458_s10, 6 }
   0xf   : > { %s138_s18 = scalar_lea.vmem %s455_s1, %s352_s15  ;;  %s143_s26 = scalar_lea.vmem %s456_s2, %s353_s23 }
  0x10   : > { %v384_v2 = vld [vmem:[%s138_s18] sm:$0xff]   ;;  %v385_v3 = vld [vmem:[%s138_s18 + $0x8] sm:$0xff]  }
  0x11   : > { %360 = vmatprep.subr.bf16.mxu0 %v384_v2  ;;  %372 = vmatprep.subr.bf16.mxu1 %v384_v2 }
  0x12   : > { %361 = vmatpush3.bf16.msra.mxu0 %v384_v2  ;;  %374 = vmatpush3.bf16.msra.mxu1 %v384_v2 }
  0x13   : > { %362 = vmatprep.subr.bf16.mxu0 %v385_v3  ;;  %373 = vmatprep.subr.bf16.mxu1 %v385_v3 }
  0x16   : > { %363 = vmatpush3.bf16.msra.mxu0 %v385_v3  ;;  %375 = vmatpush3.bf16.msra.mxu1 %v385_v3 }
  0x19   : > { %365 = vmatmul.mubr.msk.bf16.vlgmr.msra.gmra.mrb[0].mxu0 %vm189_vm0, %v388_v4  ;;  %369 = vmatmul.mubr.msk.bf16.vlgmr.msra.gmra.mrb[0].mxu1 %vm189_vm0, %v389_v5 }
  0xec   : > { %v366_v6 = vpop.f32.mrb[0].mxu0  ;;  %v370_v7 = vpop.f32.mrb[0].mxu1 }
  0xed   : > { %270 = vst.msk [vmem:[%s143_s26 + $0x10] sm:$0xff] %vm267_vm1, %v366_v6  ;;  %274 = vst.msk [vmem:[%s143_s26 + $0x30] sm:$0xff] %vm267_vm1, %v370_v7  ;;  %v236_v8 = vpop.f32.mrb[1].mxu0  ;;  %v252_v9 = vpop.f32.mrb[1].mxu1 }
  0xee   : > { %268 = vst.msk [vmem:[%s143_s26] sm:$0xff] %vm267_vm1, %v236_v8  ;;  %272 = vst.msk [vmem:[%s143_s26 + $0x20] sm:$0xff] %vm267_vm1, %v252_v9  ;;  %v367_v10 = vpop.f32.mrb[2].mxu0  ;;  %v371_v11 = vpop.f32.mrb[2].mxu1 }
  0xef   : > { %271 = vst.msk [vmem:[%s143_s26 + $0x18] sm:$0xff] %vm267_vm1, %v367_v10  ;;  %275 = vst.msk [vmem:[%s143_s26 + $0x38] sm:$0xff] %vm267_vm1, %v371_v11  ;;  %v239_v12 = vpop.f32.mrb[3].mxu0  ;;  %v255_v13 = vpop.f32.mrb[3].mxu1 }
  0xf0   : > { %269 = vst.msk [vmem:[%s143_s26 + $0x8] sm:$0xff] %vm267_vm1, %v239_v12  ;;  %273 = vst.msk [vmem:[%s143_s26 + $0x28] sm:$0xff] %vm267_vm1, %v255_v13 }
  0xf1 PF: > { %s12_s9 = sadd.s32 1, %s396_s9  }
  0xf2   : > { %p9_p4 = scmp.ge.s32.totalorder %s12_s9, 4  }
  0xf4   :  { %11 = sbr.rel (!%p9_p4) target bundleno = 1 (0x1), region = 58 }

// kernel: forward.12
= control target key start
LH: loop header
LB: loop body
LE: loop exit
PB: predicated region body
PF: predicated region fallthrough
CT: control target
= control target key end

     0   :  { %s1371_s24 = smov 0   ;;  %s1532_s0 = inlined_call_operand.vmem [shape: bf16[32,144], index: 0, kind: input, shape index: {}]   ;;  %s1533_s1 = inlined_call_operand.vmem [shape: f32[32,1], index: 1, kind: input, shape index: {}]   ;;  %s1534_s2 = inlined_call_operand.vmem [shape: f32[32,1], index: 2, kind: input, shape index: {}]   ;;  %s1535_s3 = inlined_call_operand.vmem [shape: bf16[32,288], index: 3, kind: input, shape index: {}]   ;;  %s1536_s4 = inlined_call_operand.vmem [shape: f32[32,1], index: 4, kind: input, shape index: {}]   ;;  %s1537_s5 = inlined_call_operand.vmem [shape: f32[32,1], index: 5, kind: input, shape index: {}]   ;;  %s1538_s6 = inlined_call_operand.vmem [shape: bf16[2,144,16], index: 6, kind: input, shape index: {}]   ;;  %s1539_s7 = inlined_call_operand.vmem [shape: f32[2,32,16], index: 7, kind: output, shape index: {}]  }
   0x1 LB: > { %s1061_s25 = sadd.s32 4294967295, %s1318_s24   ;;  %p1065_p0 = scmp.ge.s32.totalorder %s1318_s24, 1  ;;  %s1318_s24 = sphi %s1371_s24, %s17_s24  }
   0x2   : > { %p237_p1 = scmp.lt.s32.totalorder %s1318_s24, 3 }
   0x4   : > { %p238_p2 = pnand %p1065_p0, %p237_p1 }
   0x5   : > { %p269_p3 = scmp.lt.s32.totalorder (!%p238_p2), %s1061_s25, 1  ;;  %v1320_v0 = vmov (!%p238_p2), 0   ;;  %v1284_v1 = vld [vmem:[%s1532_s0 + $0x4] ss:$8 sps:$4 sm:$0xff] (!%p238_p2)   ;;  %vm374_vm0 = vcmask (!%p238_p2), 130048   ;;  %v485_v45 = vld [vmem:[%s1533_s1 + $0x10] sm:$0xff] (!%p238_p2) }
   0x6   : > { %241 = sbr.rel (%p238_p2) target bundleno = 1488 (0x5d0), region = 48  ;;  %381 = vmatprep.subr.bf16.mxu0 (!%p238_p2), %v1320_v0  ;;  %1192 = vset.pattern.permute.xlu1 (!%p238_p2), %v1320_v0  ;;  %v1282_v11 = vld [vmem:[%s1532_s0] ss:$8 sps:$4 sm:$0xff] (!%p238_p2)   ;;  %v1285_v12 = vld [vmem:[%s1532_s0 + $0x14] ss:$8 sps:$4 sm:$0xff] (!%p238_p2)   ;;  %vm551_vm1 = vcmask (!%p238_p2), 211968  }
   0x7   : > { %1191 = vset.pattern.permute.xlu0 (!%p238_p2), %v1320_v0  ;;  %1082 = vmatprep.mubr.msk.bf16.mxu0 (!%p238_p2), %vm374_vm0, %v1284_v1  ;;  %v1287_v13 = vld [vmem:[%s1532_s0 + $0x10] ss:$8 sps:$4 sm:$0xff] (!%p238_p2)   ;;  %v484_v41 = vld [vmem:[%s1533_s1 + $0x8] sm:$0xff] (!%p238_p2)  ;;  %v511_v42 = vld [vmem:[%s1534_s2] sm:$0xff] (!%p238_p2)  ;;  %v1321_v54 = vmov (!%p238_p2), 0.0   ;;  %s1322_s10 = smov (!%p238_p2), 5  }
   0x8   : > { %v512_v43 = vld [vmem:[%s1534_s2 + $0x8] sm:$0xff] (!%p238_p2)  ;;  %v483_v44 = vld [vmem:[%s1533_s1] sm:$0xff] (!%p238_p2)  ;;  %v486_v46 = vld [vmem:[%s1533_s1 + $0x18] sm:$0xff] (!%p238_p2)  ;;  %552 = vst.msk [vmem:[#allocation2] sm:$0xff] (!%p238_p2), %vm551_vm1, %v1321_v54  ;;  %vm572_vm6 = vcmask (!%p238_p2), 171048   ;;  %s1323_s11 = smov (!%p238_p2), 123  }
   0x9   : > { %v513_v47 = vld [vmem:[%s1534_s2 + $0x10] sm:$0xff] (!%p238_p2)  ;;  %v514_v53 = vld [vmem:[%s1534_s2 + $0x18] sm:$0xff] (!%p238_p2)  ;;  %553 = vst.msk [vmem:[#allocation2 + $0x8] sm:$0xff] (!%p238_p2), %vm551_vm1, %v1321_v54  ;;  %554 = vst.msk [vmem:[#allocation2 + $0x10] sm:$0xff] (!%p238_p2), %vm551_vm1, %v1321_v54  ;;  %s1324_s12 = smov (!%p238_p2), 122   ;;  %s1325_s13 = smov (!%p238_p2), 120  }
   0xa   : > { %555 = vst.msk [vmem:[#allocation2 + $0x18] sm:$0xff] (!%p238_p2), %vm551_vm1, %v1321_v54  ;;  %s1326_s14 = smov (!%p238_p2), 127   ;;  %s1327_s15 = smov (!%p238_p2), 119   ;;  %vm777_vm11 = vcmask (!%p238_p2), 261120  }
   0xb   : > { %s1328_s16 = smov (!%p238_p2), 126   ;;  %s1329_s19 = smov (!%p238_p2), 118  }
   0xc   : > { %s1330_s20 = smov (!%p238_p2), 124  }
   0xd   : > { %s1545_s25 = smov (!%p269_p3, %s1061_s25), 1 }
   0xe   : > { %s1171_s28 = smul.u32 72, %s1545_s25 }
  0x10   : > { %s273_s8 = scalar_lea.vmem %s1538_s6, %s1171_s28  ;;  %s1130_s28 = sshll.u32 %s1545_s25, 5 }
  0x11   : > { %v1273_v2 = vld [vmem:[%s273_s8] sm:$0xff]   ;;  %v1274_v3 = vld [vmem:[%s273_s8 + $0x8] sm:$0xff]   ;;  %v1275_v4 = vld [vmem:[%s273_s8 + $0x10] sm:$0xff]  }
  0x12   : > { %382 = vmatpush1.bf16.msra.mxu0 %v1273_v2  ;;  %v1276_v5 = vld [vmem:[%s273_s8 + $0x18] sm:$0xff]   ;;  %v1277_v6 = vld [vmem:[%s273_s8 + $0x20] sm:$0xff]   ;;  %v1278_v7 = vld [vmem:[%s273_s8 + $0x28] sm:$0xff]  }
  0x13   : > { %383 = vmatprep.subr.bf16.mxu0 %v1320_v0  ;;  %v1279_v8 = vld [vmem:[%s273_s8 + $0x30] sm:$0xff]   ;;  %v1280_v9 = vld [vmem:[%s273_s8 + $0x38] sm:$0xff]   ;;  %v1281_v10 = vld [vmem:[%s273_s8 + $0x40] sm:$0xff]   ;;  %s278_s8 = scalar_lea.vmem %s1539_s7, %s1130_s28 }
  0x16   : > { %384 = vmatpush1.bf16.msra.mxu0 %v1274_v3 }
  0x17   : > { %385 = vmatprep.subr.bf16.mxu0 %v1320_v0 }
  0x1a   : > { %386 = vmatpush1.bf16.msra.mxu0 %v1275_v4 }
  0x1b   : > { %387 = vmatprep.subr.bf16.mxu0 %v1320_v0 }
  0x1e   : > { %388 = vmatpush1.bf16.msra.mxu0 %v1276_v5 }
  0x1f   : > { %389 = vmatprep.subr.bf16.mxu0 %v1320_v0 }
  0x22   : > { %390 = vmatpush1.bf16.msra.mxu0 %v1277_v6 }
  0x23   : > { %391 = vmatprep.subr.bf16.mxu0 %v1320_v0 }
  0x26   : > { %392 = vmatpush1.bf16.msra.mxu0 %v1278_v7 }
  0x27   : > { %393 = vmatprep.subr.bf16.mxu0 %v1320_v0 }
  0x2a   : > { %394 = vmatpush1.bf16.msra.mxu0 %v1279_v8 }
  0x2b   : > { %395 = vmatprep.subr.bf16.mxu0 %v1320_v0 }
  0x2e   : > { %396 = vmatpush1.bf16.msra.mxu0 %v1280_v9 }
  0x2f   : > { %397 = vmatprep.subr.bf16.mxu0 %v1320_v0 }
  0x32   : > { %398 = vmatpush1.bf16.msra.mxu0 %v1281_v10 }
  0x35   : > { %414 = vmatmul.mubr.bf16.vlgmr.msra.gmra.mrb[0].mxu0 %v1282_v11 }
  0x36   : > { %1083 = vmatprep.mubr.msk.bf16.mxu0 %vm374_vm0, %v1285_v12 }
  0x3d   : > { %422 = vmatmul.mubr.bf16.gmra.mrb[4].mxu0 %v1287_v13 }
 0x108   : > { %v415_v14 = vpop.f32.mrb[0].mxu0 }
 0x109   : > { %v417_v15 = vpop.f32.mrb[1].mxu0  ;;  %v430_v16 = vsel %vm374_vm0, %v415_v14, 0.0 }
 0x10a   : > { %431 = vadd.xlane.f32.xlu0 %v430_v16  ;;  %v418_v17 = vpop.f32.mrb[2].mxu0 }
 0x10b   : > { %v420_v18 = vpop.f32.mrb[3].mxu0  ;;  %v433_v19 = vsel %vm374_vm0, %v418_v17, 0.0 }
 0x10e   : > { %434 = vadd.xlane.f32.xlu0 %v433_v19 }
 0x110   : > { %v423_v20 = vpop.f32.mrb[4].mxu0 }
 0x111   : > { %v436_v21 = vsel %vm374_vm0, %v423_v20, 0.0  ;;  %v425_v22 = vpop.f32.mrb[5].mxu0 }
 0x112   : > { %437 = vadd.xlane.f32.xlu1 %v436_v21  ;;  %v426_v23 = vpop.f32.mrb[6].mxu0 }
 0x113   : > { %v439_v24 = vsel %vm374_vm0, %v426_v23, 0.0  ;;  %v428_v25 = vpop.f32.mrb[7].mxu0 }
 0x116   : > { %440 = vadd.xlane.f32.xlu1 %v439_v24 }
 0x197   : > { %v432_v26 = vpop.xlane.xlu0 %431 }
 0x198   : > { %v443_v27 = vmul.f32 0.0625, %v432_v26 }
 0x19a   : > { %v447_v28 = vsub.f32 %v415_v14, %v443_v27 }
 0x19b   : > { %v435_v29 = vpop.xlane.xlu0 %434 }
 0x19c   : > { %v444_v30 = vmul.f32 0.0625, %v435_v29  ;;  %v451_v31 = vmul.f32 %v447_v28, %v447_v28 }
 0x19e   : > { %v448_v32 = vsub.f32 %v418_v17, %v444_v30  ;;  %v455_v33 = vsel %vm374_vm0, %v451_v31, 0.0 }
 0x19f   : > { %456 = vadd.xlane.f32.xlu0 %v455_v33  ;;  %v438_v34 = vpop.xlane.xlu1 %437 }
 0x1a0   : > { %v445_v35 = vmul.f32 0.0625, %v438_v34  ;;  %v452_v36 = vmul.f32 %v448_v32, %v448_v32 }
 0x1a2   : > { %v449_v37 = vsub.f32 %v423_v20, %v445_v35  ;;  %v458_v38 = vsel %vm374_vm0, %v452_v36, 0.0 }
 0x1a3   : > { %459 = vadd.xlane.f32.xlu1 %v458_v38  ;;  %v441_v48 = vpop.xlane.xlu1 %440 }
 0x1a4   : > { %v453_v39 = vmul.f32 %v449_v37, %v449_v37  ;;  %v446_v49 = vmul.f32 0.0625, %v441_v48  ;;  %v577_v48 = vlaneseq }
 0x1a6   : > { %v461_v40 = vsel %vm374_vm0, %v453_v39, 0.0  ;;  %v450_v50 = vsub.f32 %v426_v23, %v446_v49  ;;  %v578_v49 = vand.u32 127, %v577_v48 }
 0x1a7   : > { %462 = vadd.xlane.f32.xlu0 %v461_v40 }
 0x1a8   : > { %v454_v51 = vmul.f32 %v450_v50, %v450_v50 }
 0x1aa   : > { %v464_v52 = vsel %vm374_vm0, %v454_v51, 0.0 }
 0x1b4   : > { %494 = vperm.xlu1 %1192, %v484_v41  }
 0x1b8   : > { %517 = vperm.xlu1 %1192, %v511_v42  }
 0x1bc   : > { %522 = vperm.xlu1 %1192, %v512_v43  }
 0x1bd   : > { %489 = vperm.xlu0 %1191, %v483_v44  }
 0x1c0   : > { %499 = vperm.xlu1 %1192, %v485_v45  }
 0x1c4   : > { %504 = vperm.xlu1 %1192, %v486_v46  }
 0x1c8   : > { %527 = vperm.xlu1 %1192, %v513_v47   ;;  %v1290_v47 = vld [vmem:[%s1535_s3 + $0x4] ss:$12 sps:$4 sm:$0xff]  }
 0x1c9   : > { %816 = vmatprep.mubr.bf16.mxu1 %v1290_v47 }
 0x1ec   : > { %465 = vadd.xlane.f32.xlu1 %v464_v52 }
 0x1fd   : > { %532 = vperm.xlu1 %1192, %v514_v53  }
 0x22c   : > { %v457_v55 = vpop.xlane.xlu0 %456 }
 0x22d   : > { %v467_v56 = vmul.f32 0.0625, %v457_v55  ;;  %v1293_v55 = vld [vmem:[%s1535_s3 + $0x18] ss:$12 sps:$4 sm:$0xff]  }
 0x22f   : > { %v471_v57 = vadd.f32 1e-05, %v467_v56 }
 0x230   : > { %v460_v58 = vpop.xlane.xlu1 %459 }
 0x231   : > { %1296 = vrsqrt.f32 %v471_v57  ;;  %v468_v59 = vmul.f32 0.0625, %v460_v58 }
 0x233   : > { %v472_v60 = vadd.f32 1e-05, %v468_v59 }
 0x234   : > { %v463_v61 = vpop.xlane.xlu0 %462  ;;  %v495_v62 = vpop.permute.xlu1 %494 }
 0x235   : > { %1298 = vrsqrt.f32 %v472_v60  ;;  %v469_v63 = vmul.f32 0.0625, %v463_v61 }
 0x237   : > { %v473_v0 = vadd.f32 1e-05, %v469_v63 }
 0x238   : > { %v518_v1 = vpop.permute.xlu1 %517 }
 0x239   : > { %1300 = vrsqrt.f32 %v473_v0 }
 0x23b   : > { %v1297_v2 = vpop.eup %1296 }
 0x23c   : > { %v523_v3 = vpop.permute.xlu1 %522  ;;  %v479_v4 = vmul.f32 %v1297_v2, %v447_v28  ;;  %v490_v5 = vpop.permute.xlu0 %489 }
 0x23e   : > { %v507_v6 = vmul.f32 %v490_v5, %v479_v4 }
 0x23f   : > { %v1299_v7 = vpop.eup %1298 }
 0x240   : > { %v480_v8 = vmul.f32 %v1299_v7, %v448_v32  ;;  %v535_v9 = vadd.f32 %v518_v1, %v507_v6  ;;  %v500_v10 = vpop.permute.xlu1 %499 }
 0x242   : > { %v508_v11 = vmul.f32 %v495_v62, %v480_v8  ;;  %vm539_vm2 = vcmp.ge.f32.partialorder %v535_v9, 0.0  ;;  %v543_v12 = vmul.f32 0.01, %v535_v9 }
 0x243   : > { %v1301_v13 = vpop.eup %1300 }
 0x244   : > { %v536_v14 = vadd.f32 %v523_v3, %v508_v11  ;;  %v481_v15 = vmul.f32 %v1301_v13, %v449_v37  ;;  %v505_v16 = vpop.permute.xlu1 %504  ;;  %v547_v17 = vsel %vm539_vm2, %v535_v9, %v543_v12 }
 0x245   : > { %560 = vrot.lane.b32.xlu1 %v547_v17, %s1322_s10 }
 0x246   : > { %v544_v18 = vmul.f32 0.01, %v536_v14  ;;  %v509_v19 = vmul.f32 %v500_v10, %v481_v15  ;;  %vm540_vm3 = vcmp.ge.f32.partialorder %v536_v14, 0.0 }
 0x248   : > { %v528_v20 = vpop.permute.xlu1 %527  ;;  %v548_v21 = vsel %vm540_vm3, %v536_v14, %v544_v18 }
 0x249   : > { %v537_v22 = vadd.f32 %v528_v20, %v509_v19  ;;  %562 = vrot.lane.b32.xlu0 %v548_v21, %s1322_s10 }
 0x24b   : > { %v545_v23 = vmul.f32 0.01, %v537_v22  ;;  %vm541_vm4 = vcmp.ge.f32.partialorder %v537_v22, 0.0 }
 0x24d   : > { %v549_v24 = vsel %vm541_vm4, %v537_v22, %v545_v23 }
 0x24e   : > { %564 = vrot.lane.b32.xlu1 %v549_v24, %s1322_s10 }
 0x279   : > { %v466_v25 = vpop.xlane.xlu1 %465 }
 0x27a   : > { %v470_v26 = vmul.f32 0.0625, %v466_v25 }
 0x27c   : > { %v474_v27 = vadd.f32 1e-05, %v470_v26 }
 0x27d   : > { %v533_v31 = vpop.permute.xlu1 %532 }
 0x27e   : > { %1302 = vrsqrt.f32 %v474_v27 }
 0x288   : > { %v1303_v28 = vpop.eup %1302 }
 0x289   : > { %v482_v29 = vmul.f32 %v1303_v28, %v450_v50  ;;  %v583_v50 = vand.u32 3, %v578_v49 }
 0x28b   : > { %v510_v30 = vmul.f32 %v505_v16, %v482_v29  ;;  %vm595_vm7 = vcmp.ge.s32.totalorder %v583_v50, 1  ;;  %vm600_vm9 = vcmp.le.s32.totalorder %v583_v50, 2 }
 0x28c   : > { %vm1438_vm8 = vmpackc.low %vm595_vm7, %vm595_vm7 }
 0x28d   : > { %v538_v32 = vadd.f32 %v533_v31, %v510_v30  ;;  %vm1444_vm10 = vmpackc.low %vm600_vm9, %vm600_vm9 }
 0x28f   : > { %v546_v33 = vmul.f32 0.01, %v538_v32  ;;  %vm542_vm5 = vcmp.ge.f32.partialorder %v538_v32, 0.0 }
 0x291   : > { %v550_v34 = vsel %vm542_vm5, %v538_v32, %v546_v33 }
 0x292   : > { %566 = vrot.lane.b32.xlu0 %v550_v34, %s1322_s10 }
 0x2b7   : > { %v561_v35 = vpop.permute.xlu1 %560 }
 0x2b8   : > { %573 = vst.msk [vmem:[#allocation2] sm:$0xff] %vm572_vm6, %v561_v35 }
 0x2bb   : > { %v563_v36 = vpop.permute.xlu0 %562 }
 0x2bc   : > { %574 = vst.msk [vmem:[#allocation2 + $0x8] sm:$0xff] %vm572_vm6, %v563_v36 }
 0x2bf   : > { %v591_v38 = vld [vmem:[#allocation2] sm:$0xff] }
 0x2c0   : > { %v565_v37 = vpop.permute.xlu1 %564 }
 0x2c1   : > { %575 = vst.msk [vmem:[#allocation2 + $0x10] sm:$0xff] %vm572_vm6, %v565_v37 }
 0x2c3   : > { %v592_v39 = vld [vmem:[#allocation2 + $0x8] sm:$0xff] }
 0x2c4   : > { %v1193_v40 = vpack.i.bf16 %v592_v39, %v591_v38  ;;  %v1091_v41 = vpack.c.bf16 %v592_v39, %v591_v38 }
 0x2c6   : > { %1194 = vrot.lane.b32.xlu1 %v1193_v40, %s1323_s11 }
 0x2c8   : > { %v593_v43 = vld [vmem:[#allocation2 + $0x10] sm:$0xff] }
 0x2ca   : > { %1204 = vrot.lane.b32.xlu1 %v1193_v40, %s1324_s12 }
 0x304   : > { %v567_v42 = vpop.permute.xlu0 %566 }
 0x305   : > { %576 = vst.msk [vmem:[#allocation2 + $0x18] sm:$0xff] %vm572_vm6, %v567_v42 }
 0x30c   : > { %v594_v44 = vld [vmem:[#allocation2 + $0x18] sm:$0xff] }
 0x30d   : > { %v1213_v45 = vpack.i.bf16 %v594_v44, %v593_v43  ;;  %v1094_v46 = vpack.c.bf16 %v594_v44, %v593_v43 }
 0x30f   : > { %1214 = vrot.lane.b32.xlu1 %v1213_v45, %s1324_s12  ;;  %1199 = vrot.lane.b32.xlu0 %v1213_v45, %s1323_s11 }
 0x313   : > { %1219 = vrot.lane.b32.xlu1 %v1193_v40, %s1325_s13  ;;  %1209 = vrot.lane.b32.xlu0 %v1193_v40, %s1326_s14 }
 0x317   : > { %1234 = vrot.lane.b32.xlu1 %v1213_v45, %s1325_s13  ;;  %1224 = vrot.lane.b32.xlu0 %v1213_v45, %s1326_s14 }
 0x31b   : > { %1239 = vrot.lane.b32.xlu1 %v1193_v40, %s1327_s15  ;;  %1229 = vrot.lane.b32.xlu0 %v1193_v40, %s1328_s16 }
 0x31f   : > { %1254 = vrot.lane.b32.xlu1 %v1213_v45, %s1327_s15  ;;  %1244 = vrot.lane.b32.xlu0 %v1213_v45, %s1328_s16 }
 0x323   : > { %1264 = vrot.lane.b32.xlu1 %v1193_v40, %s1329_s19  ;;  %1249 = vrot.lane.b32.xlu0 %v1193_v40, %s1330_s20 }
 0x327   : > { %1259 = vrot.lane.b32.xlu0 %v1213_v45, %s1330_s20 }
 0x32b   : > { %1269 = vrot.lane.b32.xlu0 %v1213_v45, %s1329_s19 }
 0x338   : > { %v1195_v51 = vpop.permute.xlu1 %1194 }
 0x339   : > { %v1197_v52 = vunpack.i.h.bf16 %v1195_v51  ;;  %v1196_v53 = vunpack.i.l.bf16 %v1195_v51 }
 0x33b   : > { %v729_v54 = vpack.c.bf16 %v1197_v52, %v1196_v53  ;;  %v1288_v52 = vld [vmem:[%s1535_s3] ss:$12 sps:$4 sm:$0xff]   ;;  %v1291_v53 = vld [vmem:[%s1535_s3 + $0x1c] ss:$12 sps:$4 sm:$0xff]  }
 0x33c   : > { %v1205_v56 = vpop.permute.xlu1 %1204 }
 0x33d   : > { %1131 = vmatprep.subr.bf16.mxu1 %v729_v54  ;;  %v1207_v59 = vunpack.i.h.bf16 %v1205_v56  ;;  %v1206_v60 = vunpack.i.l.bf16 %v1205_v56  ;;  %v1294_v56 = vld [vmem:[%s1535_s3 + $0x8] ss:$12 sps:$4 sm:$0xff]  }
 0x33e   : > { %1132 = vmatpush3.bf16.msk.msra.mxu1 %vm1438_vm8, %v1091_v41 }
 0x33f   : > { %v1109_v5 = vpack.c.bf16 %v1207_v59, %v1206_v60 }
 0x381   : > { %v1200_v57 = vpop.permute.xlu0 %1199  ;;  %v1215_v58 = vpop.permute.xlu1 %1214 }
 0x382   : > { %v1202_v61 = vunpack.i.h.bf16 %v1200_v57  ;;  %v1201_v62 = vunpack.i.l.bf16 %v1200_v57  ;;  %v1217_v1 = vunpack.i.h.bf16 %v1215_v58  ;;  %v1216_v2 = vunpack.i.l.bf16 %v1215_v58  ;;  %v1295_v57 = vld [vmem:[%s1535_s3 + $0x20] ss:$12 sps:$4 sm:$0xff]  }
 0x384   : > { %v730_v63 = vpack.c.bf16 %v1202_v61, %v1201_v62  ;;  %v1112_v9 = vpack.c.bf16 %v1217_v1, %v1216_v2 }
 0x385   : > { %v1210_v3 = vpop.permute.xlu0 %1209  ;;  %v1220_v4 = vpop.permute.xlu1 %1219 }
 0x386   : > { %v1212_v6 = vunpack.i.h.bf16 %v1210_v3  ;;  %v1211_v7 = vunpack.i.l.bf16 %v1210_v3  ;;  %1133 = vmatprep.subr.bf16.mxu1 %v730_v63  ;;  %v1222_v12 = vunpack.i.h.bf16 %v1220_v4  ;;  %v1221_v13 = vunpack.i.l.bf16 %v1220_v4 }
 0x387   : > { %1134 = vmatpush3.bf16.msk.msra.mxu1 %vm1438_vm8, %v1094_v46 }
 0x388   : > { %v723_v8 = vpack.c.bf16 %v1212_v6, %v1211_v7  ;;  %1135 = vmatprep.subr.msk.bf16.mxu1 %vm1444_vm10, %v1109_v5  ;;  %v1115_v21 = vpack.c.bf16 %v1222_v12, %v1221_v13 }
 0x389   : > { %v1225_v10 = vpop.permute.xlu0 %1224  ;;  %v1235_v11 = vpop.permute.xlu1 %1234 }
 0x38a   : > { %v1227_v14 = vunpack.i.h.bf16 %v1225_v10  ;;  %v1226_v15 = vunpack.i.l.bf16 %v1225_v10  ;;  %v1237_v17 = vunpack.i.h.bf16 %v1235_v11  ;;  %v1236_v18 = vunpack.i.l.bf16 %v1235_v11 }
 0x38b   : > { %1136 = vmatpush3.bf16.msra.mxu1 %v723_v8 }
 0x38c   : > { %v724_v16 = vpack.c.bf16 %v1227_v14, %v1226_v15  ;;  %1137 = vmatprep.subr.msk.bf16.mxu1 %vm1444_vm10, %v1112_v9  ;;  %v1118_v25 = vpack.c.bf16 %v1237_v17, %v1236_v18  ;;  %v935_v18 = vld [vmem:[%s1536_s4 + $0x8] sm:$0xff] }
 0x38d   : > { %v1230_v19 = vpop.permute.xlu0 %1229  ;;  %v1240_v20 = vpop.permute.xlu1 %1239 }
 0x38e   : > { %v1232_v22 = vunpack.i.h.bf16 %v1230_v19  ;;  %v1231_v23 = vunpack.i.l.bf16 %v1230_v19  ;;  %v1242_v28 = vunpack.i.h.bf16 %v1240_v20  ;;  %v1241_v29 = vunpack.i.l.bf16 %v1240_v20  ;;  %v936_v19 = vld [vmem:[%s1536_s4 + $0x10] sm:$0xff]  ;;  %v934_v20 = vld [vmem:[%s1536_s4] sm:$0xff] }
 0x38f   : > { %1138 = vmatpush3.bf16.msra.mxu1 %v724_v16 }
 0x390   : > { %v1097_v24 = vpack.c.bf16 %v1232_v22, %v1231_v23  ;;  %1139 = vmatprep.subr.msk.bf16.mxu1 %vm1438_vm8, %v1115_v21  ;;  %v735_v36 = vpack.c.bf16 %v1242_v28, %v1241_v29  ;;  %v962_v21 = vld [vmem:[%s1537_s5] sm:$0xff]  ;;  %v937_v22 = vld [vmem:[%s1536_s4 + $0x18] sm:$0xff]  ;;  %v963_v23 = vld [vmem:[%s1537_s5 + $0x8] sm:$0xff] }
 0x391   : > { %v1245_v26 = vpop.permute.xlu0 %1244  ;;  %v1255_v27 = vpop.permute.xlu1 %1254 }
 0x392   : > { %v1247_v30 = vunpack.i.h.bf16 %v1245_v26  ;;  %v1246_v31 = vunpack.i.l.bf16 %v1245_v26  ;;  %v1257_v33 = vunpack.i.h.bf16 %v1255_v27  ;;  %v1256_v34 = vunpack.i.l.bf16 %v1255_v27 }
 0x393   : > { %1140 = vmatpush3.bf16.msk.msra.mxu1 %vm1444_vm10, %v1097_v24 }
 0x394   : > { %v1100_v32 = vpack.c.bf16 %v1247_v30, %v1246_v31  ;;  %1141 = vmatprep.subr.msk.bf16.mxu1 %vm1438_vm8, %v1118_v25  ;;  %v736_v41 = vpack.c.bf16 %v1257_v33, %v1256_v34 }
 0x395   : > { %v1250_v35 = vpop.permute.xlu0 %1249  ;;  %v1265_v39 = vpop.permute.xlu1 %1264 }
 0x396   : > { %v1252_v37 = vunpack.i.h.bf16 %v1250_v35  ;;  %v1251_v38 = vunpack.i.l.bf16 %v1250_v35  ;;  %v1267_v43 = vunpack.i.h.bf16 %v1265_v39  ;;  %v1266_v44 = vunpack.i.l.bf16 %v1265_v39 }
 0x397   : > { %1142 = vmatpush3.bf16.msk.msra.mxu1 %vm1444_vm10, %v1100_v32 }
 0x398   : > { %v1103_v40 = vpack.c.bf16 %v1252_v37, %v1251_v38  ;;  %1143 = vmatprep.subr.bf16.mxu1 %v735_v36  ;;  %v1121_v49 = vpack.c.bf16 %v1267_v43, %v1266_v44  ;;  %v964_v44 = vld [vmem:[%s1537_s5 + $0x10] sm:$0xff] }
 0x399   : > { %v1260_v42 = vpop.permute.xlu0 %1259 }
 0x39a   : > { %v1262_v45 = vunpack.i.h.bf16 %v1260_v42  ;;  %v1261_v46 = vunpack.i.l.bf16 %v1260_v42 }
 0x39b   : > { %1144 = vmatpush3.bf16.msk.msra.mxu1 %vm1438_vm8, %v1103_v40 }
 0x39c   : > { %v1106_v47 = vpack.c.bf16 %v1262_v45, %v1261_v46  ;;  %1145 = vmatprep.subr.bf16.mxu1 %v736_v41  ;;  %v965_v45 = vld [vmem:[%s1537_s5 + $0x18] sm:$0xff] }
 0x39d   : > { %v1270_v48 = vpop.permute.xlu0 %1269 }
 0x39e   : > { %v1272_v50 = vunpack.i.h.bf16 %v1270_v48  ;;  %v1271_v51 = vunpack.i.l.bf16 %v1270_v48 }
 0x39f   : > { %1146 = vmatpush3.bf16.msk.msra.mxu1 %vm1438_vm8, %v1106_v47 }
 0x3a0   : > { %1163 = vmatprep.subr.msk.bf16.mxu1 %vm1444_vm10, %v1121_v49  ;;  %v1124_v54 = vpack.c.bf16 %v1272_v50, %v1271_v51 }
 0x3a2   : > { %817 = vmatmul.mubr.bf16.vlgmr.msra.gmra.mrb[0].mxu1 %v1288_v52 }
 0x3a3   : > { %1164 = vmatpush3.bf16.msk.msra.mxu1 %vm1444_vm10, %v1121_v49  ;;  %824 = vmatprep.mubr.bf16.mxu1 %v1291_v53 }
 0x3a4   : > { %1165 = vmatprep.subr.msk.bf16.mxu1 %vm1444_vm10, %v1124_v54 }
 0x3a7   : > { %1166 = vmatpush3.bf16.msk.msra.mxu1 %vm1444_vm10, %v1124_v54 }
 0x3aa   : > { %825 = vmatmul.mubr.bf16.gmra.mrb[4].mxu1 %v1293_v55 }
 0x3ab   : > { %1167 = vmatprep.mubr.msk.bf16.mxu1 %vm777_vm11, %v1294_v56 }
 0x3b2   : > { %1168 = vmatmul.mubr.msk.bf16.vlgmr.msra.gmra.mrb[8].mxu1 %vm777_vm11, %v1295_v57 }
 0x475   : > { %v1147_v58 = vpop.f32.mrb[0].mxu1 }
 0x476   : > { %v1148_v59 = vpop.f32.mrb[1].mxu1 }
 0x477   : > { %v1149_v60 = vadd.f32 %v1148_v59, %v1147_v58  ;;  %v1150_v61 = vpop.f32.mrb[2].mxu1 }
 0x478   : > { %v1151_v62 = vpop.f32.mrb[3].mxu1 }
 0x479   : > { %v1152_v63 = vadd.f32 %v1151_v62, %v1150_v61 }
 0x47d   : > { %v1153_v0 = vpop.f32.mrb[4].mxu1 }
 0x47e   : > { %v1154_v1 = vpop.f32.mrb[5].mxu1 }
 0x47f   : > { %v1155_v2 = vadd.f32 %v1154_v1, %v1153_v0  ;;  %v1156_v3 = vpop.f32.mrb[6].mxu1 }
 0x480   : > { %v1157_v4 = vpop.f32.mrb[7].mxu1 }
 0x481   : > { %v1158_v5 = vadd.f32 %v1157_v4, %v1156_v3 }
 0x485   : > { %v1169_v6 = vpop.f32.mrb[8].mxu1 }
 0x486   : > { %v876_v7 = vadd.f32 %v1169_v6, %v1155_v2  ;;  %v867_v8 = vpop.f32.mrb[9].mxu1 }
 0x487   : > { %v868_v9 = vadd.f32 %v1149_v60, %v867_v8  ;;  %v1170_v10 = vpop.f32.mrb[10].mxu1 }
 0x488   : > { %v879_v11 = vadd.f32 %v1170_v10, %v1158_v5  ;;  %v870_v12 = vpop.f32.mrb[11].mxu1  ;;  %v888_v17 = vsel %vm374_vm0, %v876_v7, 0.0 }
 0x489   : > { %v871_v13 = vadd.f32 %v1152_v63, %v870_v12  ;;  %v882_v14 = vsel %vm374_vm0, %v868_v9, 0.0 }
 0x48a   : > { %883 = vadd.xlane.f32.xlu1 %v882_v14  ;;  %v891_v16 = vsel %vm374_vm0, %v879_v11, 0.0 }
 0x48b   : > { %v885_v15 = vsel %vm374_vm0, %v871_v13, 0.0 }
 0x48c   : > { %886 = vadd.xlane.f32.xlu0 %v885_v15 }
 0x48e   : > { %892 = vadd.xlane.f32.xlu1 %v891_v16 }
 0x490   : > { %889 = vadd.xlane.f32.xlu0 %v888_v17 }
 0x49f   : > { %945 = vperm.xlu1 %1192, %v935_v18  }
 0x4a3   : > { %950 = vperm.xlu1 %1192, %v936_v19  }
 0x4a6   : > { %940 = vperm.xlu0 %1191, %v934_v20  }
 0x4a7   : > { %968 = vperm.xlu1 %1192, %v962_v21  }
 0x4aa   : > { %955 = vperm.xlu0 %1191, %v937_v22  }
 0x4ae   : > { %973 = vperm.xlu0 %1191, %v963_v23  }
 0x517   : > { %v884_v24 = vpop.xlane.xlu1 %883 }
 0x518   : > { %v894_v28 = vmul.f32 0.0625, %v884_v24 }
 0x519   : > { %v887_v25 = vpop.xlane.xlu0 %886 }
 0x51a   : > { %v895_v26 = vmul.f32 0.0625, %v887_v25  ;;  %v898_v34 = vsub.f32 %v868_v9, %v894_v28 }
 0x51b   : > { %v893_v27 = vpop.xlane.xlu1 %892 }
 0x51c   : > { %v897_v29 = vmul.f32 0.0625, %v893_v27  ;;  %v899_v31 = vsub.f32 %v871_v13, %v895_v26  ;;  %v902_v41 = vmul.f32 %v898_v34, %v898_v34 }
 0x51d   : > { %v890_v30 = vpop.xlane.xlu0 %889 }
 0x51e   : > { %v901_v32 = vsub.f32 %v879_v11, %v897_v29  ;;  %v896_v33 = vmul.f32 0.0625, %v890_v30  ;;  %v903_v39 = vmul.f32 %v899_v31, %v899_v31  ;;  %v906_v43 = vsel %vm374_vm0, %v902_v41, 0.0 }
 0x51f   : > { %v946_v46 = vpop.permute.xlu1 %945 }
 0x520   : > { %v900_v35 = vsub.f32 %v876_v7, %v896_v33  ;;  %v905_v36 = vmul.f32 %v901_v32, %v901_v32  ;;  %v909_v42 = vsel %vm374_vm0, %v903_v39, 0.0 }
 0x522   : > { %v915_v37 = vsel %vm374_vm0, %v905_v36, 0.0  ;;  %v904_v38 = vmul.f32 %v900_v35, %v900_v35 }
 0x523   : > { %916 = vadd.xlane.f32.xlu1 %v915_v37  ;;  %v951_v48 = vpop.permute.xlu1 %950 }
 0x524   : > { %v912_v40 = vsel %vm374_vm0, %v904_v38, 0.0 }
 0x525   : > { %913 = vadd.xlane.f32.xlu0 %v912_v40  ;;  %v941_v47 = vpop.permute.xlu0 %940 }
 0x527   : > { %910 = vadd.xlane.f32.xlu1 %v909_v42  ;;  %v969_v50 = vpop.permute.xlu1 %968 }
 0x529   : > { %907 = vadd.xlane.f32.xlu0 %v906_v43  ;;  %v956_v49 = vpop.permute.xlu0 %955 }
 0x52d   : > { %v974_v51 = vpop.permute.xlu0 %973 }
 0x538   : > { %978 = vperm.xlu1 %1192, %v964_v44  }
 0x53f   : > { %983 = vperm.xlu0 %1191, %v965_v45  }
 0x5b0   : > { %v917_v52 = vpop.xlane.xlu1 %916 }
 0x5b1   : > { %v921_v53 = vmul.f32 0.0625, %v917_v52 }
 0x5b2   : > { %v914_v54 = vpop.xlane.xlu0 %913 }
 0x5b3   : > { %v925_v55 = vadd.f32 1e-05, %v921_v53  ;;  %v920_v56 = vmul.f32 0.0625, %v914_v54 }
 0x5b4   : > { %v911_v57 = vpop.xlane.xlu1 %910 }
 0x5b5   : > { %1304 = vrsqrt.f32 %v925_v55  ;;  %v924_v58 = vadd.f32 1e-05, %v920_v56  ;;  %v919_v59 = vmul.f32 0.0625, %v911_v57 }
 0x5b6   : > { %v908_v60 = vpop.xlane.xlu0 %907 }
 0x5b7   : > { %1306 = vrsqrt.f32 %v924_v58  ;;  %v923_v61 = vadd.f32 1e-05, %v919_v59  ;;  %v918_v62 = vmul.f32 0.0625, %v908_v60 }
 0x5b8   : > { %v979_v11 = vpop.permute.xlu1 %978 }
 0x5b9   : > { %1308 = vrsqrt.f32 %v923_v61  ;;  %v922_v63 = vadd.f32 1e-05, %v918_v62 }
 0x5bb   : > { %1310 = vrsqrt.f32 %v922_v63 }
 0x5be   : > { %v984_v6 = vpop.permute.xlu0 %983 }
 0x5bf   : > { %v1305_v0 = vpop.eup %1304 }
 0x5c0   : > { %v933_v1 = vmul.f32 %v1305_v0, %v901_v32 }
 0x5c1   : > { %v1307_v2 = vpop.eup %1306 }
 0x5c2   : > { %v932_v3 = vmul.f32 %v1307_v2, %v900_v35  ;;  %v961_v4 = vmul.f32 %v956_v49, %v933_v1 }
 0x5c3   : > { %v1309_v5 = vpop.eup %1308 }
 0x5c4   : > { %v931_v7 = vmul.f32 %v1309_v5, %v899_v31  ;;  %v960_v8 = vmul.f32 %v951_v48, %v932_v3  ;;  %v989_v9 = vadd.f32 %v984_v6, %v961_v4 }
 0x5c5   : > { %v1311_v10 = vpop.eup %1310 }
 0x5c6   : > { %v959_v12 = vmul.f32 %v946_v46, %v931_v7  ;;  %v930_v13 = vmul.f32 %v1311_v10, %v898_v34  ;;  %v988_v14 = vadd.f32 %v979_v11, %v960_v8  ;;  %vm993_vm12 = vcmp.ge.f32.partialorder %v989_v9, 0.0 }
 0x5c7   : > { %v997_v15 = vmul.f32 0.01, %v989_v9 }
 0x5c8   : > { %v987_v16 = vadd.f32 %v974_v51, %v959_v12  ;;  %v958_v17 = vmul.f32 %v941_v47, %v930_v13  ;;  %vm992_vm13 = vcmp.ge.f32.partialorder %v988_v14, 0.0  ;;  %v996_v18 = vmul.f32 0.01, %v988_v14 }
 0x5c9   : > { %v1001_v19 = vsel %vm993_vm12, %v989_v9, %v997_v15 }
 0x5ca   : > { %v995_v20 = vmul.f32 0.01, %v987_v16  ;;  %v986_v21 = vadd.f32 %v969_v50, %v958_v17  ;;  %vm991_vm14 = vcmp.ge.f32.partialorder %v987_v16, 0.0  ;;  %v1000_v22 = vsel %vm992_vm13, %v988_v14, %v996_v18  ;;  %1005 = vst.msk [vmem:[%s278_s8 + $0x18] sm:$0xff] %vm374_vm0, %v1001_v19 }
 0x5cb   : > { %1004 = vst.msk [vmem:[%s278_s8 + $0x10] sm:$0xff] %vm374_vm0, %v1000_v22 }
 0x5cc   : > { %v994_v23 = vmul.f32 0.01, %v986_v21  ;;  %vm990_vm15 = vcmp.ge.f32.partialorder %v986_v21, 0.0  ;;  %v999_v24 = vsel %vm991_vm14, %v987_v16, %v995_v20 }
 0x5cd   : > { %1003 = vst.msk [vmem:[%s278_s8 + $0x8] sm:$0xff] %vm374_vm0, %v999_v24 }
 0x5ce   : > { %v998_v25 = vsel %vm990_vm15, %v986_v21, %v994_v23 }
 0x5cf   : > { %1002 = vst.msk [vmem:[%s278_s8] sm:$0xff] %vm374_vm0, %v998_v25 }
 0x5d0 PF: > { %s17_s24 = sadd.s32 1, %s1318_s24  }
 0x5d1   : > { %p14_p4 = scmp.ge.s32.totalorder %s17_s24, 4  }
 0x5d3   :  { %16 = sbr.rel (!%p14_p4) target bundleno = 1 (0x1), region = 78 }

// kernel: forward.15
= control target key start
LH: loop header
LB: loop body
LE: loop exit
PB: predicated region body
PF: predicated region fallthrough
CT: control target
= control target key end

     0   :  { %s344_s9 = smov 0   ;;  %s367_s0 = inlined_call_operand.vmem [shape: bf16[32,16], index: 0, kind: input, shape index: {}]   ;;  %s368_s1 = inlined_call_operand.vmem [shape: bf16[2,16,64], index: 1, kind: input, shape index: {}]   ;;  %s369_s2 = inlined_call_operand.vmem [shape: f32[2,32,64], index: 2, kind: output, shape index: {}]  }
   0x1 LB: > { %s283_s10 = sadd.s32 4294967295, %s327_s9   ;;  %p287_p0 = scmp.ge.s32.totalorder %s327_s9, 1  ;;  %s327_s9 = sphi %s344_s9, %s12_s9  }
   0x2   : > { %p112_p1 = scmp.lt.s32.totalorder %s327_s9, 3 }
   0x4   : > { %p113_p2 = pnand %p287_p0, %p112_p1 }
   0x5   : > { %p134_p3 = scmp.lt.s32.totalorder (!%p113_p2), %s283_s10, 1  ;;  %v319_v0 = vld [vmem:[%s367_s0] sm:$0xff] (!%p113_p2)   ;;  %vm167_vm0 = vcmask (!%p113_p2), 130048   ;;  %v320_v2 = vld [vmem:[%s367_s0 + $0x8] sm:$0xff] (!%p113_p2)   ;;  %vm223_vm1 = vcmask (!%p113_p2), 523264  }
   0x6   : > { %116 = sbr.rel (%p113_p2) target bundleno = 237 (0xed), region = 28  ;;  %306 = vmatprep.mubr.msk.bf16.mxu0 (!%p113_p2), %vm167_vm0, %v319_v0 }
   0xd   : > { %s371_s10 = smov (!%p134_p3, %s283_s10), 1 }
   0xe   : > { %s299_s13 = sshll.u32 %s371_s10, 3  ;;  %s300_s19 = sshll.u32 %s371_s10, 5 }
   0xf   : > { %s138_s16 = scalar_lea.vmem %s368_s1, %s299_s13  ;;  %s143_s22 = scalar_lea.vmem %s369_s2, %s300_s19 }
  0x10   : > { %v318_v1 = vld [vmem:[%s138_s16] sm:$0xff]  }
  0x11   : > { %304 = vmatprep.subr.bf16.mxu0 %v318_v1 }
  0x12   : > { %305 = vmatpush3.bf16.msra.mxu0 %v318_v1 }
  0x15   : > { %307 = vmatmul.mubr.msk.bf16.vlgmr.msra.gmra.mrb[0].mxu0 %vm167_vm0, %v320_v2 }
  0xe8   : > { %v308_v3 = vpop.f32.mrb[0].mxu0 }
  0xe9   : > { %226 = vst.msk [vmem:[%s143_s22 + $0x10] sm:$0xff] %vm223_vm1, %v308_v3  ;;  %v208_v4 = vpop.f32.mrb[1].mxu0 }
  0xea   : > { %224 = vst.msk [vmem:[%s143_s22] sm:$0xff] %vm223_vm1, %v208_v4  ;;  %v309_v5 = vpop.f32.mrb[2].mxu0 }
  0xeb   : > { %227 = vst.msk [vmem:[%s143_s22 + $0x18] sm:$0xff] %vm223_vm1, %v309_v5  ;;  %v211_v6 = vpop.f32.mrb[3].mxu0 }
  0xec   : > { %225 = vst.msk [vmem:[%s143_s22 + $0x8] sm:$0xff] %vm223_vm1, %v211_v6 }
  0xed PF: > { %s12_s9 = sadd.s32 1, %s327_s9  }
  0xee   : > { %p9_p4 = scmp.ge.s32.totalorder %s12_s9, 4  }
  0xf0   :  { %11 = sbr.rel (!%p9_p4) target bundleno = 1 (0x1), region = 58 }

// kernel: forward.14
= control target key start
LH: loop header
LB: loop body
LE: loop exit
PB: predicated region body
PF: predicated region fallthrough
CT: control target
= control target key end

     0   :  { %s1110_s24 = smov 0   ;;  %s1231_s0 = inlined_call_operand.vmem [shape: bf16[16,288], index: 0, kind: input, shape index: {}]   ;;  %s1232_s1 = inlined_call_operand.vmem [shape: f32[16,1], index: 1, kind: input, shape index: {}]   ;;  %s1233_s2 = inlined_call_operand.vmem [shape: f32[16,1], index: 2, kind: input, shape index: {}]   ;;  %s1234_s3 = inlined_call_operand.vmem [shape: bf16[16,144], index: 3, kind: input, shape index: {}]   ;;  %s1235_s4 = inlined_call_operand.vmem [shape: f32[16,1], index: 4, kind: input, shape index: {}]   ;;  %s1236_s5 = inlined_call_operand.vmem [shape: f32[16,1], index: 5, kind: input, shape index: {}]   ;;  %s1237_s6 = inlined_call_operand.vmem [shape: bf16[2,288,64], index: 6, kind: input, shape index: {}]   ;;  %s1238_s7 = inlined_call_operand.vmem [shape: f32[2,16,64], index: 7, kind: output, shape index: {}]  }
   0x1 LB: > { %s867_s25 = sadd.s32 4294967295, %s1056_s24   ;;  %p871_p0 = scmp.ge.s32.totalorder %s1056_s24, 1  ;;  %s1056_s24 = sphi %s1110_s24, %s17_s24  }
   0x2   : > { %p237_p1 = scmp.lt.s32.totalorder %s1056_s24, 3 }
   0x4   : > { %p238_p2 = pnand %p871_p0, %p237_p1 }
   0x5   : > { %p269_p3 = scmp.lt.s32.totalorder (!%p238_p2), %s867_s25, 1  ;;  %v1035_v0 = vld [vmem:[%s1231_s0 + $0x4] ss:$12 sps:$4 sm:$0xff] (!%p238_p2)   ;;  %v1033_v17 = vld [vmem:[%s1231_s0] ss:$12 sps:$4 sm:$0xff] (!%p238_p2)   ;;  %v1058_v19 = vmov (!%p238_p2), 0.0  }
   0x6   : > { %241 = sbr.rel (%p238_p2) target bundleno = 1398 (0x576), region = 48  ;;  %479 = vmatprep.mubr.bf16.mxu0 (!%p238_p2), %v1035_v0  ;;  %vm1059_vm0 = vmmov (!%p238_p2), 0   ;;  %v1038_v21 = vld [vmem:[%s1231_s0 + $0x8] ss:$12 sps:$4 sm:$0xff] (!%p238_p2)   ;;  %vm443_vm1 = vcmask (!%p238_p2), 261120   ;;  %v1060_v23 = vmov (!%p238_p2), 0  }
   0x7   : > { %v558_v22 = vld [vmem:[%s1232_s1 + $0x8] sm:$0xff] (!%p238_p2)  ;;  %976 = vset.pattern.permute.xlu1 (!%p238_p2), %v1060_v23  ;;  %975 = vset.pattern.permute.xlu0 (!%p238_p2), %v1060_v23  ;;  %v571_v24 = vld [vmem:[%s1233_s2] sm:$0xff] (!%p238_p2)  ;;  %vm529_vm2 = vcmask (!%p238_p2), 523264   ;;  %vm591_vm3 = vcmask (!%p238_p2), 670720   ;;  %s1061_s21 = smov (!%p238_p2), 9   ;;  %vm602_vm6 = vcmask (!%p238_p2), 597064  }
   0x8   : > { %566 = vperm.xlu1 (!%p238_p2), %976, %v558_v22   ;;  %709 = vmatprep.subr.bf16.mxu1 (!%p238_p2), %v1060_v23  ;;  %v557_v39 = vld [vmem:[%s1232_s1] sm:$0xff] (!%p238_p2)  ;;  %v572_v50 = vld [vmem:[%s1233_s2 + $0x8] sm:$0xff] (!%p238_p2)  ;;  %592 = vst.msk [vmem:[#allocation2] sm:$0xff] (!%p238_p2), %vm591_vm3, %v1058_v19  ;;  %593 = vst.msk [vmem:[#allocation2 + $0x8] sm:$0xff] (!%p238_p2), %vm591_vm3, %v1058_v19  ;;  %s1062_s22 = smov (!%p238_p2), 119   ;;  %s1063_s23 = smov (!%p238_p2), 127  }
   0x9   : > { %s1064_s26 = smov (!%p238_p2), 112   ;;  %s1065_s27 = smov (!%p238_p2), 126   ;;  %vm705_vm9 = vcmask (!%p238_p2), 130048  }
   0xa   : > { %s1067_s29 = smov (!%p238_p2), 120   ;;  %s1068_s30 = smov (!%p238_p2), 118  }
   0xc   : > { %575 = vperm.xlu1 (!%p238_p2), %976, %v571_v24  }
   0xd   : > { %s1244_s25 = smov (!%p269_p3, %s867_s25), 1 }
   0xe   : > { %s954_s28 = smul.u32 144, %s1244_s25 }
  0x10   : > { %s1127_s8 = scalar_lea.vmem %s1237_s6, %s954_s28  ;;  %s1066_s28 = smov 110  }
  0x11   : > { %v1017_v1 = vld [vmem:[%s1127_s8 + $0x40] sm:$0xff]   ;;  %v1019_v3 = vld [vmem:[%s1127_s8 + $0x48] sm:$0xff]   ;;  %v1021_v5 = vld [vmem:[%s1127_s8 + $0x50] sm:$0xff]  }
  0x12   : > { %v1018_v2 = vld [vmem:[%s1127_s8] sm:$0xff]   ;;  %921 = vmatprep.subr.bf16.mxu0 %v1017_v1  ;;  %v1020_v4 = vld [vmem:[%s1127_s8 + $0x8] sm:$0xff]   ;;  %v1022_v6 = vld [vmem:[%s1127_s8 + $0x10] sm:$0xff]  }
  0x13   : > { %922 = vmatpush3.bf16.msra.mxu0 %v1018_v2  ;;  %v1023_v7 = vld [vmem:[%s1127_s8 + $0x58] sm:$0xff]   ;;  %v1025_v9 = vld [vmem:[%s1127_s8 + $0x60] sm:$0xff]   ;;  %v1027_v11 = vld [vmem:[%s1127_s8 + $0x68] sm:$0xff]  }
  0x14   : > { %923 = vmatprep.subr.bf16.mxu0 %v1019_v3  ;;  %v1024_v8 = vld [vmem:[%s1127_s8 + $0x18] sm:$0xff]   ;;  %v1026_v10 = vld [vmem:[%s1127_s8 + $0x20] sm:$0xff]   ;;  %v1028_v12 = vld [vmem:[%s1127_s8 + $0x28] sm:$0xff]  }
  0x15   : > { %v1029_v13 = vld [vmem:[%s1127_s8 + $0x70] sm:$0xff]   ;;  %v1031_v15 = vld [vmem:[%s1127_s8 + $0x78] sm:$0xff]   ;;  %v1036_v18 = vld [vmem:[%s1127_s8 + $0x80] sm:$0xff]  }
  0x16   : > { %v1030_v14 = vld [vmem:[%s1127_s8 + $0x30] sm:$0xff]   ;;  %v1032_v16 = vld [vmem:[%s1127_s8 + $0x38] sm:$0xff]   ;;  %v1037_v20 = vld [vmem:[%s1127_s8 + $0x88] sm:$0xff]   ;;  %s1069_s8 = smov 111  }
  0x17   : > { %924 = vmatpush3.bf16.msra.mxu0 %v1020_v4 }
  0x18   : > { %925 = vmatprep.subr.bf16.mxu0 %v1021_v5 }
  0x1b   : > { %926 = vmatpush3.bf16.msra.mxu0 %v1022_v6 }
  0x1c   : > { %927 = vmatprep.subr.bf16.mxu0 %v1023_v7 }
  0x1f   : > { %928 = vmatpush3.bf16.msra.mxu0 %v1024_v8 }
  0x20   : > { %929 = vmatprep.subr.bf16.mxu0 %v1025_v9  ;;  %v605_v9 = vlaneseq }
  0x23   : > { %930 = vmatpush3.bf16.msra.mxu0 %v1026_v10 }
  0x24   : > { %931 = vmatprep.subr.bf16.mxu0 %v1027_v11  ;;  %v606_v11 = vand.u32 127, %v605_v9  ;;  %v791_v9 = vld [vmem:[%s1236_s5 + $0x8] sm:$0xff] }
  0x27   : > { %932 = vmatpush3.bf16.msra.mxu0 %v1028_v12 }
  0x28   : > { %933 = vmatprep.subr.bf16.mxu0 %v1029_v13  ;;  %v611_v13 = vand.u32 7, %v606_v11 }
  0x2a   : > { %vm621_vm7 = vcmp.ge.s32.totalorder %v611_v13, 1  ;;  %vm624_vm10 = vcmp.le.s32.totalorder %v611_v13, 6 }
  0x2b   : > { %934 = vmatpush3.bf16.msra.mxu0 %v1030_v14  ;;  %vm1172_vm8 = vmpackc.low %vm621_vm7, %vm621_vm7 }
  0x2c   : > { %935 = vmatprep.subr.bf16.mxu0 %v1031_v15  ;;  %vm1183_vm11 = vmpackc.low %vm624_vm10, %vm624_vm10 }
  0x2f   : > { %936 = vmatpush3.bf16.msra.mxu0 %v1032_v16 }
  0x30   : > { %946 = vmatprep.subr.bf16.mxu0 %v1058_v19 }
  0x32   : > { %480 = vmatmul.mubr.bf16.vlgmr.msra.gmra.mrb[0].mxu0 %v1033_v17 }
  0x33   : > { %947 = vmatpush3.bf16.msra.mxu0 %v1036_v18  ;;  %950 = vmatprep.mubr.msk.bf16.mxu0 %vm1059_vm0, %v1058_v19 }
  0x34   : > { %948 = vmatprep.subr.bf16.mxu0 %v1058_v19  ;;  %v1041_v19 = vld [vmem:[%s1234_s3 + $0x4] ss:$8 sps:$4 sm:$0xff]  }
  0x35   : > { %917 = vmatprep.mubr.msk.bf16.mxu1 %vm705_vm9, %v1041_v19 }
  0x37   : > { %949 = vmatpush3.bf16.msra.mxu0 %v1037_v20 }
  0x3a   : > { %951 = vmatmul.mubr.msk.bf16.vlgmr.msra.gmra.mrb[4].mxu0 %vm443_vm1, %v1038_v21 }
  0x87   : > { %v567_v51 = vpop.permute.xlu1 %566 }
  0x8b   : > { %v576_v52 = vpop.permute.xlu1 %575 }
 0x105   : > { %v937_v25 = vpop.f32.mrb[0].mxu0 }
 0x106   : > { %v938_v26 = vpop.f32.mrb[1].mxu0 }
 0x107   : > { %v939_v27 = vadd.f32 %v938_v26, %v937_v25  ;;  %v940_v28 = vpop.f32.mrb[2].mxu0 }
 0x108   : > { %v941_v29 = vpop.f32.mrb[3].mxu0 }
 0x109   : > { %v942_v30 = vadd.f32 %v941_v29, %v940_v28 }
 0x10d   : > { %v522_v31 = vpop.f32.mrb[4].mxu0 }
 0x10e   : > { %v523_v32 = vadd.f32 %v939_v27, %v522_v31  ;;  %v952_v33 = vpop.f32.mrb[5].mxu0 }
 0x10f   : > { %v525_v34 = vpop.f32.mrb[6].mxu0 }
 0x110   : > { %v526_v35 = vadd.f32 %v942_v30, %v525_v34  ;;  %v953_v36 = vpop.f32.mrb[7].mxu0  ;;  %v530_v37 = vsel %vm529_vm2, %v523_v32, 0.0 }
 0x111   : > { %531 = vadd.xlane.f32.xlu0 %v530_v37 }
 0x112   : > { %v533_v38 = vsel %vm529_vm2, %v526_v35, 0.0 }
 0x115   : > { %534 = vadd.xlane.f32.xlu0 %v533_v38 }
 0x12b   : > { %561 = vperm.xlu0 %975, %v557_v39  }
 0x19e   : > { %v532_v40 = vpop.xlane.xlu0 %531 }
 0x19f   : > { %v537_v41 = vmul.f32 0.015625, %v532_v40 }
 0x1a1   : > { %v539_v42 = vsub.f32 %v523_v32, %v537_v41 }
 0x1a2   : > { %v535_v43 = vpop.xlane.xlu0 %534 }
 0x1a3   : > { %v538_v44 = vmul.f32 0.015625, %v535_v43  ;;  %v541_v45 = vmul.f32 %v539_v42, %v539_v42 }
 0x1a5   : > { %v540_v46 = vsub.f32 %v526_v35, %v538_v44  ;;  %v543_v47 = vsel %vm529_vm2, %v541_v45, 0.0 }
 0x1a6   : > { %544 = vadd.xlane.f32.xlu1 %v543_v47 }
 0x1a7   : > { %v542_v48 = vmul.f32 %v540_v46, %v540_v46 }
 0x1a9   : > { %v546_v49 = vsel %vm529_vm2, %v542_v48, 0.0 }
 0x1aa   : > { %547 = vadd.xlane.f32.xlu1 %v546_v49  ;;  %v562_v60 = vpop.permute.xlu0 %561 }
 0x1bb   : > { %580 = vperm.xlu1 %976, %v572_v50  }
 0x233   : > { %v545_v53 = vpop.xlane.xlu1 %544 }
 0x234   : > { %v549_v54 = vmul.f32 0.015625, %v545_v53 }
 0x236   : > { %v551_v55 = vadd.f32 1e-05, %v549_v54  ;;  %v1039_v54 = vld [vmem:[%s1234_s3] ss:$8 sps:$4 sm:$0xff]  }
 0x237   : > { %v548_v56 = vpop.xlane.xlu1 %547 }
 0x238   : > { %1042 = vrsqrt.f32 %v551_v55  ;;  %v550_v57 = vmul.f32 0.015625, %v548_v56 }
 0x23a   : > { %v552_v58 = vadd.f32 1e-05, %v550_v57 }
 0x23b   : > { %v581_v4 = vpop.permute.xlu1 %580 }
 0x23c   : > { %1044 = vrsqrt.f32 %v552_v58 }
 0x242   : > { %v1043_v59 = vpop.eup %1042 }
 0x243   : > { %v555_v61 = vmul.f32 %v1043_v59, %v539_v42 }
 0x245   : > { %v569_v62 = vmul.f32 %v562_v60, %v555_v61  ;;  %v776_v61 = vld [vmem:[%s1235_s4] sm:$0xff] }
 0x246   : > { %v1045_v63 = vpop.eup %1044 }
 0x247   : > { %v556_v0 = vmul.f32 %v1045_v63, %v540_v46  ;;  %v583_v1 = vadd.f32 %v576_v52, %v569_v62 }
 0x249   : > { %v570_v2 = vmul.f32 %v567_v51, %v556_v0  ;;  %vm585_vm4 = vcmp.ge.f32.partialorder %v583_v1, 0.0  ;;  %v587_v3 = vmul.f32 0.01, %v583_v1 }
 0x24b   : > { %v584_v5 = vadd.f32 %v581_v4, %v570_v2  ;;  %v589_v6 = vsel %vm585_vm4, %v583_v1, %v587_v3 }
 0x24c   : > { %596 = vrot.lane.b32.xlu1 %v589_v6, %s1061_s21 }
 0x24d   : > { %v588_v7 = vmul.f32 0.01, %v584_v5  ;;  %vm586_vm5 = vcmp.ge.f32.partialorder %v584_v5, 0.0 }
 0x24f   : > { %v590_v8 = vsel %vm586_vm5, %v584_v5, %v588_v7 }
 0x250   : > { %598 = vrot.lane.b32.xlu1 %v590_v8, %s1061_s21  ;;  %v790_v8 = vld [vmem:[%s1236_s5] sm:$0xff]  ;;  %s920_s21 = sshll.u32 %s1244_s25, 4 }
 0x2be   : > { %v597_v10 = vpop.permute.xlu1 %596 }
 0x2bf   : > { %603 = vst.msk [vmem:[#allocation2] sm:$0xff] %vm602_vm6, %v597_v10 }
 0x2c2   : > { %v599_v12 = vpop.permute.xlu1 %598 }
 0x2c3   : > { %604 = vst.msk [vmem:[#allocation2 + $0x8] sm:$0xff] %vm602_vm6, %v599_v12 }
 0x2c6   : > { %v619_v14 = vld [vmem:[#allocation2] sm:$0xff] }
 0x2ca   : > { %v620_v15 = vld [vmem:[#allocation2 + $0x8] sm:$0xff] }
 0x2cb   : > { %v992_v16 = vpack.i.bf16 %v620_v15, %v619_v14  ;;  %v900_v18 = vpack.c.bf16 %v620_v15, %v619_v14 }
 0x2cd   : > { %993 = vrot.lane.b32.xlu0 %v992_v16, %s1062_s22  ;;  %978 = vrot.lane.b32.xlu1 %v992_v16, %s1063_s23 }
 0x2ce   : > { %901 = vmatpush1.bf16.msk.msra.mxu1 %vm1172_vm8, %v900_v18 }
 0x2cf   : > { %711 = vmatprep.subr.bf16.mxu1 %v1060_v23 }
 0x2d1   : > { %1003 = vrot.lane.b32.xlu0 %v992_v16, %s1064_s26  ;;  %983 = vrot.lane.b32.xlu1 %v992_v16, %s1065_s27  ;;  %s278_s26 = scalar_lea.vmem %s1238_s7, %s920_s21 }
 0x2d5   : > { %1013 = vrot.lane.b32.xlu0 %v992_v16, %s1066_s28  ;;  %988 = vrot.lane.b32.xlu1 %v992_v16, %s1067_s29 }
 0x2d9   : > { %998 = vrot.lane.b32.xlu1 %v992_v16, %s1068_s30 }
 0x2dd   : > { %1008 = vrot.lane.b32.xlu1 %v992_v16, %s1069_s8 }
 0x33f   : > { %v979_v20 = vpop.permute.xlu1 %978  ;;  %v994_v30 = vpop.permute.xlu0 %993 }
 0x340   : > { %v981_v21 = vunpack.i.h.bf16 %v979_v20  ;;  %v980_v22 = vunpack.i.l.bf16 %v979_v20  ;;  %v996_v34 = vunpack.i.h.bf16 %v994_v30  ;;  %v995_v35 = vunpack.i.l.bf16 %v994_v30 }
 0x342   : > { %v686_v24 = vpack.c.bf16 %v981_v21, %v980_v22  ;;  %v689_v38 = vpack.c.bf16 %v996_v34, %v995_v35 }
 0x343   : > { %v984_v25 = vpop.permute.xlu1 %983  ;;  %v1004_v41 = vpop.permute.xlu0 %1003 }
 0x344   : > { %v986_v26 = vunpack.i.h.bf16 %v984_v25  ;;  %v985_v27 = vunpack.i.l.bf16 %v984_v25  ;;  %712 = vmatpush1.bf16.msra.mxu1 %v686_v24  ;;  %v1006_v42 = vunpack.i.h.bf16 %v1004_v41  ;;  %v1005_v43 = vunpack.i.l.bf16 %v1004_v41 }
 0x345   : > { %713 = vmatprep.subr.bf16.mxu1 %v1060_v23 }
 0x346   : > { %v903_v29 = vpack.c.bf16 %v986_v26, %v985_v27  ;;  %v912_v46 = vpack.c.bf16 %v1006_v42, %v1005_v43 }
 0x347   : > { %v989_v31 = vpop.permute.xlu1 %988  ;;  %v1014_v49 = vpop.permute.xlu0 %1013 }
 0x348   : > { %v991_v32 = vunpack.i.h.bf16 %v989_v31  ;;  %v990_v33 = vunpack.i.l.bf16 %v989_v31  ;;  %904 = vmatpush1.bf16.msk.msra.mxu1 %vm1183_vm11, %v903_v29  ;;  %v1016_v50 = vunpack.i.h.bf16 %v1014_v49  ;;  %v1015_v51 = vunpack.i.l.bf16 %v1014_v49 }
 0x349   : > { %715 = vmatprep.subr.bf16.mxu1 %v1060_v23 }
 0x34a   : > { %v906_v36 = vpack.c.bf16 %v991_v32, %v990_v33  ;;  %v915_v53 = vpack.c.bf16 %v1016_v50, %v1015_v51 }
 0x34b   : > { %v999_v37 = vpop.permute.xlu1 %998 }
 0x34c   : > { %907 = vmatpush1.bf16.msk.msra.mxu1 %vm1172_vm8, %v906_v36  ;;  %v1001_v39 = vunpack.i.h.bf16 %v999_v37  ;;  %v1000_v40 = vunpack.i.l.bf16 %v999_v37 }
 0x34d   : > { %717 = vmatprep.subr.bf16.mxu1 %v1060_v23 }
 0x34e   : > { %v909_v44 = vpack.c.bf16 %v1001_v39, %v1000_v40 }
 0x34f   : > { %v1009_v45 = vpop.permute.xlu1 %1008 }
 0x350   : > { %718 = vmatpush1.bf16.msra.mxu1 %v689_v38  ;;  %v1011_v47 = vunpack.i.h.bf16 %v1009_v45  ;;  %v1010_v48 = vunpack.i.l.bf16 %v1009_v45 }
 0x351   : > { %719 = vmatprep.subr.bf16.mxu1 %v1060_v23 }
 0x352   : > { %v692_v52 = vpack.c.bf16 %v1011_v47, %v1010_v48 }
 0x354   : > { %910 = vmatpush1.bf16.msk.msra.mxu1 %vm1183_vm11, %v909_v44 }
 0x355   : > { %721 = vmatprep.subr.bf16.mxu1 %v1060_v23 }
 0x358   : > { %913 = vmatpush1.bf16.msk.msra.mxu1 %vm1172_vm8, %v912_v46 }
 0x359   : > { %723 = vmatprep.subr.bf16.mxu1 %v1060_v23 }
 0x35c   : > { %724 = vmatpush1.bf16.msra.mxu1 %v692_v52 }
 0x35d   : > { %725 = vmatprep.subr.bf16.mxu1 %v1060_v23  ;;  %v777_v23 = vld [vmem:[%s1235_s4 + $0x8] sm:$0xff] }
 0x360   : > { %916 = vmatpush1.bf16.msk.msra.mxu1 %vm1183_vm11, %v915_v53 }
 0x363   : > { %742 = vmatmul.mubr.bf16.vlgmr.msra.gmra.mrb[0].mxu1 %v1039_v54 }
 0x436   : > { %v743_v55 = vpop.f32.mrb[0].mxu1 }
 0x437   : > { %v745_v56 = vpop.f32.mrb[1].mxu1  ;;  %v750_v57 = vsel %vm529_vm2, %v743_v55, 0.0 }
 0x438   : > { %751 = vadd.xlane.f32.xlu1 %v750_v57  ;;  %v746_v58 = vpop.f32.mrb[2].mxu1 }
 0x439   : > { %v748_v59 = vpop.f32.mrb[3].mxu1  ;;  %v753_v60 = vsel %vm529_vm2, %v746_v58, 0.0 }
 0x43a   : > { %754 = vadd.xlane.f32.xlu0 %v753_v60 }
 0x449   : > { %785 = vperm.xlu1 %976, %v777_v23  }
 0x450   : > { %780 = vperm.xlu0 %975, %v776_v61  }
 0x4c5   : > { %v752_v62 = vpop.xlane.xlu1 %751 }
 0x4c6   : > { %v756_v63 = vmul.f32 0.015625, %v752_v62 }
 0x4c7   : > { %v755_v0 = vpop.xlane.xlu0 %754 }
 0x4c8   : > { %v758_v1 = vsub.f32 %v743_v55, %v756_v63  ;;  %v757_v2 = vmul.f32 0.015625, %v755_v0 }
 0x4c9   : > { %v786_v11 = vpop.permute.xlu1 %785 }
 0x4ca   : > { %v759_v3 = vsub.f32 %v746_v58, %v757_v2  ;;  %v760_v4 = vmul.f32 %v758_v1, %v758_v1 }
 0x4cc   : > { %v762_v5 = vsel %vm529_vm2, %v760_v4, 0.0  ;;  %v761_v6 = vmul.f32 %v759_v3, %v759_v3 }
 0x4cd   : > { %763 = vadd.xlane.f32.xlu0 %v762_v5 }
 0x4ce   : > { %v765_v7 = vsel %vm529_vm2, %v761_v6, 0.0 }
 0x4cf   : > { %766 = vadd.xlane.f32.xlu1 %v765_v7  ;;  %v781_v10 = vpop.permute.xlu0 %780 }
 0x4e0   : > { %794 = vperm.xlu1 %976, %v790_v8  }
 0x4e3   : > { %799 = vperm.xlu0 %975, %v791_v9  }
 0x55a   : > { %v764_v12 = vpop.xlane.xlu0 %763 }
 0x55b   : > { %v768_v13 = vmul.f32 0.015625, %v764_v12 }
 0x55c   : > { %v767_v14 = vpop.xlane.xlu1 %766 }
 0x55d   : > { %v770_v15 = vadd.f32 1e-05, %v768_v13  ;;  %v769_v16 = vmul.f32 0.015625, %v767_v14 }
 0x55f   : > { %1046 = vrsqrt.f32 %v770_v15  ;;  %v771_v17 = vadd.f32 1e-05, %v769_v16 }
 0x560   : > { %v795_v24 = vpop.permute.xlu1 %794 }
 0x561   : > { %1048 = vrsqrt.f32 %v771_v17 }
 0x562   : > { %v800_v27 = vpop.permute.xlu0 %799 }
 0x569   : > { %v1047_v18 = vpop.eup %1046 }
 0x56a   : > { %v774_v19 = vmul.f32 %v1047_v18, %v758_v1 }
 0x56b   : > { %v1049_v20 = vpop.eup %1048 }
 0x56c   : > { %v788_v21 = vmul.f32 %v781_v10, %v774_v19  ;;  %v775_v22 = vmul.f32 %v1049_v20, %v759_v3 }
 0x56e   : > { %v802_v25 = vadd.f32 %v795_v24, %v788_v21  ;;  %v789_v26 = vmul.f32 %v786_v11, %v775_v22 }
 0x570   : > { %vm804_vm12 = vcmp.ge.f32.partialorder %v802_v25, 0.0  ;;  %v806_v28 = vmul.f32 0.01, %v802_v25  ;;  %v803_v29 = vadd.f32 %v800_v27, %v789_v26 }
 0x572   : > { %v808_v30 = vsel %vm804_vm12, %v802_v25, %v806_v28  ;;  %vm805_vm13 = vcmp.ge.f32.partialorder %v803_v29, 0.0  ;;  %v807_v31 = vmul.f32 0.01, %v803_v29 }
 0x573   : > { %810 = vst.msk [vmem:[%s278_s26] sm:$0xff] %vm529_vm2, %v808_v30 }
 0x574   : > { %v809_v32 = vsel %vm805_vm13, %v803_v29, %v807_v31 }
 0x575   : > { %811 = vst.msk [vmem:[%s278_s26 + $0x8] sm:$0xff] %vm529_vm2, %v809_v32 }
 0x576 PF: > { %s17_s24 = sadd.s32 1, %s1056_s24  }
 0x577   : > { %p14_p4 = scmp.ge.s32.totalorder %s17_s24, 4  }
 0x579   :  { %16 = sbr.rel (!%p14_p4) target bundleno = 1 (0x1), region = 78 }

// kernel: forward.16
= control target key start
LH: loop header
LB: loop body
LE: loop exit
PB: predicated region body
PF: predicated region fallthrough
CT: control target
= control target key end

     0   :  { %s1007_s24 = smov 0   ;;  %s1127_s0 = inlined_call_operand.vmem [shape: bf16[8,144], index: 0, kind: input, shape index: {}]   ;;  %s1128_s1 = inlined_call_operand.vmem [shape: f32[8,1], index: 1, kind: input, shape index: {}]   ;;  %s1129_s2 = inlined_call_operand.vmem [shape: f32[8,1], index: 2, kind: input, shape index: {}]   ;;  %s1130_s3 = inlined_call_operand.vmem [shape: bf16[8,72], index: 3, kind: input, shape index: {}]   ;;  %s1131_s4 = inlined_call_operand.vmem [shape: f32[8,1], index: 4, kind: input, shape index: {}]   ;;  %s1132_s5 = inlined_call_operand.vmem [shape: f32[8,1], index: 5, kind: input, shape index: {}]   ;;  %s1133_s6 = inlined_call_operand.vmem [shape: bf16[2,144,256], index: 6, kind: input, shape index: {}]   ;;  %s1134_s7 = inlined_call_operand.vmem [shape: f32[2,8,256], index: 7, kind: output, shape index: {}]  }
   0x1 LB: > { %s793_s25 = sadd.s32 4294967295, %s953_s24   ;;  %p797_p0 = scmp.ge.s32.totalorder %s953_s24, 1  ;;  %s953_s24 = sphi %s1007_s24, %s17_s24  }
   0x2   : > { %p237_p1 = scmp.lt.s32.totalorder %s953_s24, 3 }
   0x4   : > { %p238_p2 = pnand %p797_p0, %p237_p1 }
   0x5   : > { %p269_p3 = scmp.lt.s32.totalorder (!%p238_p2), %s793_s25, 1  ;;  %v280_v0 = vld [vmem:[%s1127_s0] sm:$0xff] (!%p238_p2)  ;;  %vm395_vm0 = vcmask (!%p238_p2), 130048   ;;  %v955_v27 = vmov (!%p238_p2), 0   ;;  %vm481_vm1 = vcmask (!%p238_p2), 277504   ;;  %v956_v36 = vmov (!%p238_p2), 0.0  }
   0x6   : > { %241 = sbr.rel (%p238_p2) target bundleno = 1402 (0x57a), region = 48  ;;  %v802_v1 = vcombine.high (!%p238_p2), %v280_v0, %v280_v0  ;;  %v801_v20 = vcombine.low (!%p238_p2), %v280_v0, %v280_v0  ;;  %v457_v26 = vld [vmem:[%s1128_s1] sm:$0xff] (!%p238_p2)  ;;  %872 = vset.pattern.permute.xlu1 (!%p238_p2), %v955_v27  ;;  %689 = vmatprep.mubr.bf16.mxu1 (!%p238_p2), %v955_v27  ;;  %482 = vst.msk [vmem:[#allocation2 + $0x10] sm:$0xff] (!%p238_p2), %vm481_vm1, %v956_v36  ;;  %479 = vst [vmem:[#allocation2] sm:$0xff] (!%p238_p2), %v956_v36  ;;  %s957_s13 = smov (!%p238_p2), 17   ;;  %vm489_vm4 = vcmask (!%p238_p2), 138240   ;;  %v498_v61 = vlaneseq (!%p238_p2) }
   0x7   : > { %460 = vperm.xlu1 (!%p238_p2), %872, %v457_v26   ;;  %913 = vset.pattern.permute.xlu0 (!%p238_p2), %v955_v27  ;;  %v465_v28 = vld [vmem:[%s1129_s2] sm:$0xff] (!%p238_p2)  ;;  %vm494_vm5 = vcmask (!%p238_p2), 1047688   ;;  %s958_s14 = smov (!%p238_p2), 112   ;;  %s959_s15 = smov (!%p238_p2), 127   ;;  %vm608_vm7 = vcmask (!%p238_p2), 1039360   ;;  %vm966_vm9 = vmmov (!%p238_p2), 1  }
   0x8   : > { %821 = vmatprep.mubr.msk.bf16.mxu0 (!%p238_p2), %vm395_vm0, %v802_v1  ;;  %s960_s16 = smov (!%p238_p2), 111   ;;  %s961_s17 = smov (!%p238_p2), 126   ;;  %v499_v0 = vand.u32 (!%p238_p2), 127, %v498_v61  ;;  %vm543_vm12 = vcmask (!%p238_p2), 1031168   ;;  %vm556_vm14 = vcmask (!%p238_p2), 916480   ;;  %vm619_vm0 = vcmask (!%p238_p2), 908288  }
   0x9   : > { %s962_s18 = smov (!%p238_p2), 95   ;;  %s963_s19 = smov (!%p238_p2), 110  }
   0xa   : > { %s964_s20 = smov (!%p238_p2), 96   ;;  %s965_s21 = smov (!%p238_p2), 94  }
   0xb   : > { %468 = vperm.xlu1 (!%p238_p2), %872, %v465_v28  }
   0xd   : > { %s1148_s25 = smov (!%p269_p3, %s793_s25), 1 }
   0xe   : > { %s851_s28 = smul.u32 144, %s1148_s25  ;;  %s850_s30 = sshll.u32 %s1148_s25, 4 }
   0xf   : > { %s278_s10 = scalar_lea.vmem %s1134_s7, %s850_s30 }
  0x10   : > { %s1024_s8 = scalar_lea.vmem %s1133_s6, %s851_s28 }
  0x11   : > { %v914_v2 = vld [vmem:[%s1024_s8 + $0x4] ss:$8 sps:$4 sm:$0xff]   ;;  %v916_v3 = vld [vmem:[%s1024_s8] ss:$8 sps:$4 sm:$0xff]   ;;  %v917_v4 = vld [vmem:[%s1024_s8 + $0x14] ss:$8 sps:$4 sm:$0xff]  }
  0x12   : > { %399 = vmatprep.subr.bf16.mxu0 %v914_v2  ;;  %v919_v5 = vld [vmem:[%s1024_s8 + $0x10] ss:$8 sps:$4 sm:$0xff]   ;;  %v920_v6 = vld [vmem:[%s1024_s8 + $0x24] ss:$8 sps:$4 sm:$0xff]   ;;  %v922_v7 = vld [vmem:[%s1024_s8 + $0x20] ss:$8 sps:$4 sm:$0xff]  }
  0x13   : > { %400 = vmatpush1.bf16.msra.mxu0 %v916_v3  ;;  %v923_v8 = vld [vmem:[%s1024_s8 + $0x34] ss:$8 sps:$4 sm:$0xff]   ;;  %v925_v9 = vld [vmem:[%s1024_s8 + $0x30] ss:$8 sps:$4 sm:$0xff]   ;;  %v926_v10 = vld [vmem:[%s1024_s8 + $0x44] ss:$8 sps:$4 sm:$0xff]  }
  0x14   : > { %401 = vmatprep.subr.bf16.mxu0 %v917_v4  ;;  %v928_v11 = vld [vmem:[%s1024_s8 + $0x40] ss:$8 sps:$4 sm:$0xff]   ;;  %v929_v12 = vld [vmem:[%s1024_s8 + $0x54] ss:$8 sps:$4 sm:$0xff]   ;;  %v931_v13 = vld [vmem:[%s1024_s8 + $0x50] ss:$8 sps:$4 sm:$0xff]  }
  0x15   : > { %v932_v14 = vld [vmem:[%s1024_s8 + $0x64] ss:$8 sps:$4 sm:$0xff]   ;;  %v934_v15 = vld [vmem:[%s1024_s8 + $0x60] ss:$8 sps:$4 sm:$0xff]   ;;  %v935_v16 = vld [vmem:[%s1024_s8 + $0x74] ss:$8 sps:$4 sm:$0xff]  }
  0x16   : > { %v937_v17 = vld [vmem:[%s1024_s8 + $0x70] ss:$8 sps:$4 sm:$0xff]   ;;  %v938_v18 = vld [vmem:[%s1024_s8 + $0x84] ss:$8 sps:$4 sm:$0xff]   ;;  %v940_v19 = vld [vmem:[%s1024_s8 + $0x80] ss:$8 sps:$4 sm:$0xff]  }
  0x17   : > { %402 = vmatpush1.bf16.msra.mxu0 %v919_v5  ;;  %v500_v2 = vadd.s32 128, %v499_v0 }
  0x18   : > { %403 = vmatprep.subr.bf16.mxu0 %v920_v6  ;;  %v505_v6 = vand.u32 15, %v499_v0 }
  0x19   : > { %v512_v5 = vand.u32 15, %v500_v2 }
  0x1a   : > { %vm1056_vm8 = vcmp.ge.s32.totalorder %v505_v6, 1  ;;  %vm1082_vm15 = vcmp.le.s32.totalorder %v505_v6, 14 }
  0x1b   : > { %404 = vmatpush1.bf16.msra.mxu0 %v922_v7  ;;  %vm1052_vm6 = vcmp.ge.s32.totalorder %v512_v5, 1  ;;  %vm1070_vm11 = vmpackc.low %vm966_vm9, %vm1056_vm8  ;;  %vm1078_vm13 = vcmp.le.s32.totalorder %v512_v5, 14 }
  0x1c   : > { %405 = vmatprep.subr.bf16.mxu0 %v923_v8  ;;  %vm1063_vm10 = vmpackc.low %vm966_vm9, %vm1052_vm6 }
  0x1d   : > { %vm828_vm1 = vmpackc.low %vm1052_vm6, %vm1078_vm13  ;;  %vm582_vm6 = vcmask 785408  }
  0x1f   : > { %406 = vmatpush1.bf16.msra.mxu0 %v925_v9 }
  0x20   : > { %407 = vmatprep.subr.bf16.mxu0 %v926_v10 }
  0x23   : > { %408 = vmatpush1.bf16.msra.mxu0 %v928_v11 }
  0x24   : > { %409 = vmatprep.subr.bf16.mxu0 %v929_v12 }
  0x27   : > { %410 = vmatpush1.bf16.msra.mxu0 %v931_v13 }
  0x28   : > { %411 = vmatprep.subr.bf16.mxu0 %v932_v14 }
  0x2b   : > { %412 = vmatpush1.bf16.msra.mxu0 %v934_v15 }
  0x2c   : > { %413 = vmatprep.subr.bf16.mxu0 %v935_v16 }
  0x2f   : > { %414 = vmatpush1.bf16.msra.mxu0 %v937_v17 }
  0x30   : > { %415 = vmatprep.subr.bf16.mxu0 %v938_v18  ;;  %v714_v18 = vld [vmem:[%s1131_s4] sm:$0xff] }
  0x33   : > { %416 = vmatpush1.bf16.msra.mxu0 %v940_v19 }
  0x36   : > { %432 = vmatmul.mubr.bf16.vlgmr.msra.gmra.mrb[0].mxu0 %v801_v20 }
  0x86   : > { %v461_v40 = vpop.permute.xlu1 %460 }
  0x8a   : > { %v469_v46 = vpop.permute.xlu1 %468 }
 0x109   : > { %v433_v21 = vpop.f32.mrb[0].mxu0 }
 0x10a   : > { %v435_v22 = vpop.f32.mrb[1].mxu0 }
 0x10b   : > { %v437_v23 = vpop.f32.mrb[2].mxu0  ;;  %v440_v24 = vadd.f32 %v435_v22, %v433_v21 }
 0x10c   : > { %v438_v25 = vpop.f32.mrb[3].mxu0 }
 0x10d   : > { %441 = vadd.xlane.f32.xlu0 %v440_v24 }
 0x19a   : > { %v442_v29 = vpop.xlane.xlu0 %441 }
 0x19b   : > { %v444_v30 = vmul.f32 0.00390625, %v442_v29 }
 0x19d   : > { %v445_v31 = vsub.f32 %v433_v21, %v444_v30  ;;  %v446_v32 = vsub.f32 %v435_v22, %v444_v30 }
 0x19f   : > { %v447_v33 = vmul.f32 %v445_v31, %v445_v31  ;;  %v448_v34 = vmul.f32 %v446_v32, %v446_v32 }
 0x1a1   : > { %v449_v35 = vadd.f32 %v448_v34, %v447_v33 }
 0x1a3   : > { %450 = vadd.xlane.f32.xlu0 %v449_v35 }
 0x230   : > { %v451_v37 = vpop.xlane.xlu0 %450 }
 0x231   : > { %v452_v38 = vmul.f32 0.00390625, %v451_v37 }
 0x233   : > { %v453_v39 = vadd.f32 1e-05, %v452_v38 }
 0x235   : > { %943 = vrsqrt.f32 %v453_v39 }
 0x23f   : > { %v944_v41 = vpop.eup %943 }
 0x240   : > { %v455_v42 = vmul.f32 %v944_v41, %v445_v31  ;;  %v456_v43 = vmul.f32 %v944_v41, %v446_v32 }
 0x242   : > { %v463_v44 = vmul.f32 %v461_v40, %v455_v42  ;;  %v464_v45 = vmul.f32 %v461_v40, %v456_v43 }
 0x244   : > { %v471_v47 = vadd.f32 %v469_v46, %v463_v44  ;;  %v472_v48 = vadd.f32 %v469_v46, %v464_v45 }
 0x246   : > { %vm474_vm2 = vcmp.ge.f32.partialorder %v472_v48, 0.0  ;;  %v476_v49 = vmul.f32 0.01, %v472_v48  ;;  %vm473_vm3 = vcmp.ge.f32.partialorder %v471_v47, 0.0  ;;  %v475_v50 = vmul.f32 0.01, %v471_v47 }
 0x248   : > { %v478_v51 = vsel %vm474_vm2, %v472_v48, %v476_v49  ;;  %v477_v52 = vsel %vm473_vm3, %v471_v47, %v475_v50  ;;  %vm569_vm2 = vcmask 900096   ;;  %vm831_vm3 = vmpackc.low %vm1056_vm8, %vm1082_vm15  ;;  %vm595_vm8 = vcmask 769024  }
 0x249   : > { %487 = vrot.lane.b32.xlu1 %v478_v51, %s957_s13  ;;  %485 = vrot.lane.b32.xlu0 %v477_v52, %s957_s13 }
 0x2bb   : > { %v488_v53 = vpop.permute.xlu1 %487  ;;  %v486_v54 = vpop.permute.xlu0 %485 }
 0x2bc   : > { %497 = vst.msk [vmem:[#allocation2 + $0x10] sm:$0xff] %vm489_vm4, %v488_v53  ;;  %v490_v55 = vsel %vm489_vm4, %v486_v54, %v488_v53  ;;  %vm834_vm4 = vmpackc.low %vm1078_vm13, %vm966_vm9 }
 0x2bd   : > { %495 = vst.msk [vmem:[#allocation2] sm:$0xff] %vm494_vm5, %v486_v54  ;;  %vm630_vm5 = vcmask 777216  }
 0x2c3   : > { %v531_v57 = vld [vmem:[#allocation2 + $0x10] sm:$0xff] }
 0x2c4   : > { %v525_v56 = vld [vmem:[#allocation2] sm:$0xff]  ;;  %v893_v58 = vpack.i.bf16 %v531_v57, %v490_v55 }
 0x2c5   : > { %550 = vrot.lane.b32.xlu0 %v525_v56, %s958_s14  ;;  %602 = vrot.lane.b32.xlu1 %v525_v56, %s959_s15  ;;  %v908_v59 = vpack.i.bf16 %v490_v55, %v525_v56 }
 0x2c9   : > { %613 = vrot.lane.b32.xlu0 %v525_v56, %s960_s16  ;;  %537 = vrot.lane.b32.xlu1 %v525_v56, %s961_s17 }
 0x2cd   : > { %624 = vrot.lane.b32.xlu0 %v525_v56, %s962_s18  ;;  %563 = vrot.lane.b32.xlu1 %v525_v56, %s963_s19 }
 0x2d1   : > { %576 = vrot.lane.b32.xlu1 %v525_v56, %s964_s20  ;;  %894 = vrot.lane.b32.xlu0 %v893_v58, %s960_s16 }
 0x2d5   : > { %904 = vrot.lane.b32.xlu0 %v893_v58, %s962_s18  ;;  %874 = vrot.lane.b32.xlu1 %v893_v58, %s959_s15 }
 0x2d9   : > { %593 = vrot.lane.b32.xlu0 %v531_v57, %s965_s21  ;;  %879 = vrot.lane.b32.xlu1 %v893_v58, %s961_s17 }
 0x2dd   : > { %884 = vrot.lane.b32.xlu1 %v893_v58, %s958_s14 }
 0x2e1   : > { %889 = vrot.lane.b32.xlu1 %v893_v58, %s963_s19 }
 0x2e5   : > { %899 = vrot.lane.b32.xlu1 %v893_v58, %s964_s20 }
 0x2e9   : > { %909 = vrot.lane.b32.xlu1 %v908_v59, %s965_s21 }
 0x337   : > { %v603_v60 = vpop.permute.xlu1 %602  ;;  %v551_v62 = vpop.permute.xlu0 %550 }
 0x33b   : > { %v538_v63 = vpop.permute.xlu1 %537  ;;  %v614_v3 = vpop.permute.xlu0 %613 }
 0x33f   : > { %v564_v1 = vpop.permute.xlu1 %563  ;;  %v625_v7 = vpop.permute.xlu0 %624 }
 0x343   : > { %v1050_v4 = vpop.permute.xlu1 %576  ;;  %v895_v20 = vpop.permute.xlu0 %894 }
 0x344   : > { %v897_v28 = vunpack.i.h.bf16 %v895_v20  ;;  %v896_v29 = vunpack.i.l.bf16 %v895_v20 }
 0x346   : > { %v620_v40 = vsel %vm619_vm0, %v614_v3, %v896_v29  ;;  %v621_v41 = vsel %vm619_vm0, %v896_v29, %v897_v28 }
 0x347   : > { %v875_v8 = vpop.permute.xlu1 %874  ;;  %v905_v34 = vpop.permute.xlu0 %904 }
 0x348   : > { %v877_v10 = vunpack.i.h.bf16 %v875_v8  ;;  %v876_v11 = vunpack.i.l.bf16 %v875_v8  ;;  %v907_v42 = vunpack.i.h.bf16 %v905_v34  ;;  %v906_v43 = vunpack.i.l.bf16 %v905_v34 }
 0x34a   : > { %v610_v13 = vsel %vm608_vm7, %v876_v11, %v877_v10  ;;  %v609_v15 = vsel %vm608_vm7, %v603_v60, %v876_v11  ;;  %vm837_vm7 = vmpackc.low %vm1082_vm15, %vm966_vm9  ;;  %v631_v51 = vsel %vm630_vm5, %v625_v7, %v906_v43  ;;  %v632_v52 = vsel %vm630_vm5, %v906_v43, %v907_v42  ;;  %v722_v10 = vld [vmem:[%s1132_s5] sm:$0xff] }
 0x34b   : > { %v880_v16 = vpop.permute.xlu1 %879  ;;  %v823_v17 = vpack.c.bf16 %v610_v13, %v490_v55  ;;  %v826_v19 = vpack.c.bf16 %v609_v15, %v525_v56  ;;  %v594_v60 = vpop.permute.xlu0 %593  ;;  %vm650_vm9 = vcmask 1043456  }
 0x34c   : > { %v882_v21 = vunpack.i.h.bf16 %v880_v16  ;;  %v881_v22 = vunpack.i.l.bf16 %v880_v16 }
 0x34d   : > { %824 = vmatprep.subr.msk.bf16.mxu1 %vm1063_vm10, %v823_v17 }
 0x34e   : > { %827 = vmatpush1.bf16.msk.msra.mxu1 %vm1070_vm11, %v826_v19  ;;  %v544_v30 = vsel %vm543_vm12, %v538_v63, %v881_v22  ;;  %v545_v31 = vsel %vm543_vm12, %v881_v22, %v882_v21 }
 0x34f   : > { %v885_v24 = vpop.permute.xlu1 %884 }
 0x350   : > { %v887_v25 = vunpack.i.h.bf16 %v885_v24  ;;  %v886_v26 = vunpack.i.l.bf16 %v885_v24 }
 0x352   : > { %v557_v32 = vsel %vm556_vm14, %v551_v62, %v886_v26  ;;  %v558_v33 = vsel %vm556_vm14, %v886_v26, %v887_v25 }
 0x353   : > { %v829_v35 = vpack.c.bf16 %v558_v33, %v545_v31  ;;  %v832_v36 = vpack.c.bf16 %v557_v32, %v544_v30  ;;  %v890_v37 = vpop.permute.xlu1 %889 }
 0x354   : > { %v892_v38 = vunpack.i.h.bf16 %v890_v37  ;;  %v891_v39 = vunpack.i.l.bf16 %v890_v37 }
 0x355   : > { %830 = vmatprep.subr.msk.bf16.mxu1 %vm828_vm1, %v829_v35 }
 0x356   : > { %v570_v44 = vsel %vm569_vm2, %v564_v1, %v891_v39  ;;  %v571_v45 = vsel %vm569_vm2, %v891_v39, %v892_v38  ;;  %833 = vmatpush1.bf16.msk.msra.mxu1 %vm831_vm3, %v832_v36 }
 0x357   : > { %v835_v46 = vpack.c.bf16 %v571_v45, %v621_v41  ;;  %v838_v47 = vpack.c.bf16 %v570_v44, %v620_v40  ;;  %v900_v48 = vpop.permute.xlu1 %899 }
 0x358   : > { %v902_v49 = vunpack.i.h.bf16 %v900_v48  ;;  %v901_v50 = vunpack.i.l.bf16 %v900_v48 }
 0x359   : > { %836 = vmatprep.subr.msk.bf16.mxu1 %vm834_vm4, %v835_v46 }
 0x35a   : > { %v583_v53 = vsel %vm582_vm6, %v1050_v4, %v901_v50  ;;  %v584_v54 = vsel %vm582_vm6, %v901_v50, %v902_v49  ;;  %839 = vmatpush1.bf16.msk.msra.mxu1 %vm837_vm7, %v838_v47  ;;  %v645_v4 = vld [vmem:[%s1130_s3] sm:$0xf] }
 0x35b   : > { %v841_v55 = vpack.c.bf16 %v632_v52, %v584_v54  ;;  %v844_v56 = vpack.c.bf16 %v631_v51, %v583_v53  ;;  %v910_v57 = vpop.permute.xlu1 %909 }
 0x35c   : > { %v912_v58 = vunpack.i.h.bf16 %v910_v57  ;;  %v911_v59 = vunpack.i.l.bf16 %v910_v57 }
 0x35d   : > { %842 = vmatprep.subr.msk.bf16.mxu1 %vm1063_vm10, %v841_v55  ;;  %vm646_vm10 = vcmask 588800  }
 0x35e   : > { %v597_v61 = vsel %vm595_vm8, %v912_v58, %v594_v60  ;;  %845 = vmatpush1.bf16.msk.msra.mxu1 %vm1070_vm11, %v844_v56  ;;  %v596_v62 = vsel %vm595_vm8, %v911_v59, %v912_v58 }
 0x35f   : > { %v601_v63 = vsel %vm1078_vm13, %v597_v61, 0.0  ;;  %v600_v0 = vsel %vm1082_vm15, %v596_v62, 0.0 }
 0x360   : > { %v644_v1 = vpack.c.bf16 %v601_v63, %v601_v63  ;;  %v643_v2 = vpack.c.bf16 %v600_v0, %v600_v0 }
 0x362   : > { %846 = vmatprep.subr.msk.bf16.mxu1 %vm650_vm9, %v644_v1  ;;  %v652_v3 = vsel %vm650_vm9, %v643_v2, 0 }
 0x363   : > { %666 = vmatpush1.bf16.msra.mxu1 %v652_v3 }
 0x366   : > { %847 = vmatmul.mubr.msk.bf16.vlgmr.msra.gmra.mrb[0].mxu1 %vm646_vm10, %v645_v4 }
 0x439   : > { %v691_v5 = vpop.f32.mrb[0].mxu1 }
 0x43a   : > { %v693_v6 = vpop.f32.mrb[1].mxu1 }
 0x43b   : > { %v695_v7 = vpop.f32.mrb[2].mxu1  ;;  %v698_v8 = vadd.f32 %v693_v6, %v691_v5 }
 0x43c   : > { %v696_v9 = vpop.f32.mrb[3].mxu1 }
 0x43d   : > { %699 = vadd.xlane.f32.xlu1 %v698_v8 }
 0x44e   : > { %725 = vperm.xlu1 %872, %v722_v10  }
 0x4ca   : > { %v700_v11 = vpop.xlane.xlu1 %699 }
 0x4cb   : > { %v701_v12 = vmul.f32 0.00390625, %v700_v11 }
 0x4cd   : > { %v702_v13 = vsub.f32 %v691_v5, %v701_v12  ;;  %v703_v14 = vsub.f32 %v693_v6, %v701_v12 }
 0x4ce   : > { %v726_v28 = vpop.permute.xlu1 %725 }
 0x4cf   : > { %v704_v15 = vmul.f32 %v702_v13, %v702_v13  ;;  %v705_v16 = vmul.f32 %v703_v14, %v703_v14 }
 0x4d1   : > { %v706_v17 = vadd.f32 %v705_v16, %v704_v15 }
 0x4d3   : > { %707 = vadd.xlane.f32.xlu0 %v706_v17 }
 0x4e9   : > { %717 = vperm.xlu0 %913, %v714_v18  }
 0x560   : > { %v708_v19 = vpop.xlane.xlu0 %707 }
 0x561   : > { %v709_v20 = vmul.f32 0.00390625, %v708_v19 }
 0x563   : > { %v710_v21 = vadd.f32 1e-05, %v709_v20 }
 0x565   : > { %945 = vrsqrt.f32 %v710_v21 }
 0x568   : > { %v718_v23 = vpop.permute.xlu0 %717 }
 0x56f   : > { %v946_v22 = vpop.eup %945 }
 0x570   : > { %v712_v24 = vmul.f32 %v946_v22, %v702_v13  ;;  %v713_v25 = vmul.f32 %v946_v22, %v703_v14 }
 0x572   : > { %v720_v26 = vmul.f32 %v718_v23, %v712_v24  ;;  %v721_v27 = vmul.f32 %v718_v23, %v713_v25 }
 0x574   : > { %v728_v29 = vadd.f32 %v726_v28, %v720_v26  ;;  %v729_v30 = vadd.f32 %v726_v28, %v721_v27 }
 0x576   : > { %vm730_vm11 = vcmp.ge.f32.partialorder %v728_v29, 0.0  ;;  %vm731_vm12 = vcmp.ge.f32.partialorder %v729_v30, 0.0  ;;  %v732_v31 = vmul.f32 0.01, %v728_v29  ;;  %v733_v32 = vmul.f32 0.01, %v729_v30 }
 0x578   : > { %v734_v33 = vsel %vm730_vm11, %v728_v29, %v732_v31  ;;  %v735_v34 = vsel %vm731_vm12, %v729_v30, %v733_v32 }
 0x579   : > { %736 = vst [vmem:[%s278_s10] sm:$0xff] %v734_v33  ;;  %737 = vst [vmem:[%s278_s10 + $0x8] sm:$0xff] %v735_v34 }
 0x57a PF: > { %s17_s24 = sadd.s32 1, %s953_s24  }
 0x57b   : > { %p14_p4 = scmp.ge.s32.totalorder %s17_s24, 4  }
 0x57d   :  { %16 = sbr.rel (!%p14_p4) target bundleno = 1 (0x1), region = 78 }

// kernel: forward.17
= control target key start
LH: loop header
LB: loop body
LE: loop exit
PB: predicated region body
PF: predicated region fallthrough
CT: control target
= control target key end

     0   :  { %s355_s12 = smov 0   ;;  %s378_s0 = inlined_call_operand.vmem [shape: bf16[3,8], index: 0, kind: input, shape index: {}]   ;;  %s379_s1 = inlined_call_operand.vmem [shape: bf16[2,8,256], index: 1, kind: input, shape index: {}]   ;;  %s380_s2 = inlined_call_operand.vmem [shape: f32[3,1], index: 2, kind: input, shape index: {}]   ;;  %s381_s3 = inlined_call_operand.vmem [shape: f32[2,3,256], index: 3, kind: output, shape index: {}]  }
   0x1 LB: > { %s297_s13 = sadd.s32 4294967295, %s332_s12   ;;  %p301_p0 = scmp.ge.s32.totalorder %s332_s12, 1  ;;  %s332_s12 = sphi %s355_s12, %s13_s12  }
   0x2   : > { %p137_p1 = scmp.lt.s32.totalorder %s332_s12, 3 }
   0x4   : > { %p138_p2 = pnand %p301_p0, %p137_p1 }
   0x5   : > { %p161_p3 = scmp.lt.s32.totalorder (!%p138_p2), %s297_s13, 1  ;;  %v334_v0 = vmov (!%p138_p2), 0   ;;  %v174_v1 = vld [vmem:[%s380_s2] sm:$0x7] (!%p138_p2)  ;;  %vm189_vm0 = vcmask (!%p138_p2), 1043456   ;;  %vm185_vm1 = vcmask (!%p138_p2), 64512  }
   0x6   : > { %141 = sbr.rel (%p138_p2) target bundleno = 241 (0xf1), region = 32  ;;  %228 = vmatprep.mubr.bf16.mxu0 (!%p138_p2), %v334_v0  ;;  %323 = vset.pattern.permute.xlu0 (!%p138_p2), %v334_v0  ;;  %v172_v6 = vld [vmem:[%s378_s0] sm:$0x3] (!%p138_p2) }
   0x7   : > { %177 = vperm.xlu0 (!%p138_p2), %323, %v174_v1  }
   0xd   : > { %s383_s13 = smov (!%p161_p3, %s297_s13), 1 }
   0xe   : > { %s312_s16 = sshll.u32 %s383_s13, 3 }
   0xf   : > { %s165_s19 = scalar_lea.vmem %s379_s1, %s312_s16  ;;  %s170_s24 = scalar_lea.vmem %s381_s3, %s312_s16 }
  0x10   : > { %v173_v2 = vld [vmem:[%s165_s19] sm:$0xff] }
  0x11   : > { %v307_v3 = vcombine.high %v173_v2, %v173_v2  ;;  %v306_v4 = vcombine.low %v173_v2, %v173_v2 }
  0x13   : > { %308 = vmatprep.subr.msk.bf16.mxu0 %vm189_vm0, %v307_v3  ;;  %v191_v5 = vsel %vm189_vm0, %v306_v4, 0 }
  0x14   : > { %197 = vmatpush1.bf16.msra.mxu0 %v191_v5 }
  0x17   : > { %309 = vmatmul.mubr.msk.bf16.vlgmr.msra.gmra.mrb[0].mxu0 %vm185_vm1, %v172_v6 }
  0x86   : > { %v178_v7 = vpop.permute.xlu0 %177 }
  0xea   : > { %v230_v8 = vpop.f32.mrb[0].mxu0 }
  0xeb   : > { %v231_v9 = vadd.f32 %v230_v8, %v178_v7  ;;  %v232_v10 = vpop.f32.mrb[1].mxu0 }
  0xec   : > { %v233_v11 = vadd.f32 %v232_v10, %v178_v7  ;;  %v234_v12 = vpop.f32.mrb[2].mxu0 }
  0xed   : > { %v235_v13 = vpop.f32.mrb[3].mxu0 }
  0xee   : > { %v239_v14 = vcombine.low %v231_v9, %v233_v11 }
  0xf0   : > { %241 = vst [vmem:[%s170_s24] sm:$0x77] %v239_v14 }
  0xf1 PF: > { %s13_s12 = sadd.s32 1, %s332_s12  }
  0xf2   : > { %p10_p4 = scmp.ge.s32.totalorder %s13_s12, 4  }
  0xf4   :  { %12 = sbr.rel (!%p10_p4) target bundleno = 1 (0x1), region = 62 }

</bundles_post_ra>
